<compile_context>
chip_gen: v7x
topology: tpu7x:2x2x1
jax: 0.10.0
libtpu: 0.0.40
codegen_flags: <defaults>
</compile_context>

<pallas_src>
import functools

import jax
import jax.numpy as jnp
from jax.experimental import pallas as pl
from jax.experimental.pallas import tpu as pltpu


# ----------------------------------------------------------------------------------
# Kernel
# ----------------------------------------------------------------------------------
def _cond_mlp_kernel(q_ref, k_ref, w1s_ref, b1s_ref, w2s_ref, b2s_ref,
                     wg_ref, bg_ref, expand_ref, o_ref, *, inv_temp):
    q = q_ref[...]                                    # [TB, D], native dtype
    k = k_ref[...]                                    # [TB, D]

    # ---- gate: softmax( ([q, k] @ Wg + bg) / temp ) over experts -----------------
    qk = jnp.concatenate([q, k], axis=-1)             # [TB, 2D]
    logits = (jnp.dot(qk, wg_ref[...], preferred_element_type=jnp.float32)
              + bg_ref[...].astype(jnp.float32)) * inv_temp          # [TB, E]
    m = jnp.max(logits, axis=-1, keepdims=True)
    ex = jnp.exp(logits - m)
    gate = ex * pl.reciprocal(jnp.sum(ex, axis=-1, keepdims=True), approx=True)

    # ---- experts fused into two wide matmuls -------------------------------------
    h = jnp.dot(q, w1s_ref[...], preferred_element_type=jnp.float32)  # [TB, E*H]
    h = jnp.maximum(h + b1s_ref[...].astype(jnp.float32), 0.0)

    # Broadcast each expert's gate across its hidden block on the MXU (no reshape /
    # cross-lane work): gate_wide[b, e*H + j] = gate[b, e].
    gate_lo = gate.astype(expand_ref.dtype)
    gate_wide = jnp.dot(gate_lo, expand_ref[...],
                        preferred_element_type=jnp.float32)           # [TB, E*H]
    hg = (h * gate_wide).astype(w2s_ref.dtype)

    out = (jnp.dot(hg, w2s_ref[...], preferred_element_type=jnp.float32)
           + jnp.dot(gate_lo, b2s_ref[...], preferred_element_type=jnp.float32))
    o_ref[...] = out.astype(o_ref.dtype)


# ----------------------------------------------------------------------------------
# Wrapper
# ----------------------------------------------------------------------------------
def conditioned_mlp(q, k, packed, temp=1.0, block_b=256):
    """q, k: [B, D]. packed: dict from pack_params()."""
    B, D = q.shape

    tb = min(block_b, B)
    if B % tb != 0 or tb % 8 != 0:
        tb = B                       # fallback: single batch tile (small batches)
    grid = (B // tb,)

    act_spec = pl.BlockSpec((tb, D), lambda i: (i, 0))

    def const_spec(arr):             # weight stays VMEM-resident across grid steps
        return pl.BlockSpec(arr.shape, lambda i: (0,) * arr.ndim)

    kernel = functools.partial(_cond_mlp_kernel, inv_temp=1.0 / float(temp))
    return pl.pallas_call(
        kernel,
        out_shape=jax.ShapeDtypeStruct((B, D), q.dtype),
        grid=grid,
        in_specs=[
            act_spec, act_spec,
            const_spec(packed["w1s"]),
            const_spec(packed["b1s"]),
            const_spec(packed["w2s"]),
            const_spec(packed["b2s"]),
            const_spec(packed["wg"]),
            const_spec(packed["bg"]),
            const_spec(packed["expand"]),
        ],
        out_specs=act_spec,
        compiler_params=pltpu.CompilerParams(
            dimension_semantics=("parallel",)),
    )(q, k, packed["w1s"], packed["b1s"], packed["w2s"], packed["b2s"],
      packed["wg"], packed["bg"], packed["expand"])


# ----------------------------------------------------------------------------------
# Parameter prep (natural per-expert layout -> stacked/fused kernel layout)
# ----------------------------------------------------------------------------------
def pack_params(p, dtype=None):
    E, D, H = p["w1"].shape
    w1s = jnp.transpose(p["w1"], (1, 0, 2)).reshape(D, E * H)   # [D, E*H]
    b1s = p["b1"].reshape(1, E * H)                             # [1, E*H]
    w2s = p["w2"].reshape(E * H, D)                             # [E*H, D]
    b2s = p["b2"]                                               # [E, D]
    wg = p["wg"]                                                # [2D, E]
    bg = p["bg"].reshape(1, E)                                  # [1, E]
    expand = jnp.kron(jnp.eye(E, dtype=w1s.dtype),
                      jnp.ones((1, H), dtype=w1s.dtype))        # [E, E*H]
    packed = dict(w1s=w1s, b1s=b1s, w2s=w2s, b2s=b2s, wg=wg, bg=bg, expand=expand)
    if dtype is not None:
        packed = {kk: vv.astype(dtype) for kk, vv in packed.items()}
    return packed


def init_params(key, dim, hidden, n_experts=4, dtype=jnp.float32):
    ks = jax.random.split(key, 6)
    s = 0.02
    return {
        "w1": (jax.random.normal(ks[0], (n_experts, dim, hidden)) * s).astype(dtype),
        "b1": (jax.random.normal(ks[1], (n_experts, hidden)) * s).astype(dtype),
        "w2": (jax.random.normal(ks[2], (n_experts, hidden, dim)) * s).astype(dtype),
        "b2": (jax.random.normal(ks[3], (n_experts, dim)) * s).astype(dtype),
        "wg": (jax.random.normal(ks[4], (2 * dim, n_experts)) * s).astype(dtype),
        "bg": (jax.random.normal(ks[5], (n_experts,)) * s).astype(dtype),
    }


# ----------------------------------------------------------------------------------
# Pure-JAX reference mirroring the PyTorch forward (per-expert, un-fused)
# ----------------------------------------------------------------------------------
def _reference(q, k, p, temp=1.0):
    E = p["w1"].shape[0]
    preds = []
    for e in range(E):
        h = jnp.maximum(q @ p["w1"][e] + p["b1"][e], 0.0)
        preds.append(h @ p["w2"][e] + p["b2"][e])
    q_pred = jnp.stack(preds, axis=1)                                 # [B, E, D]
    logits = (jnp.concatenate([q, k], axis=-1) @ p["wg"] + p["bg"]) / temp
    gate = jax.nn.softmax(logits, axis=-1)                            # [B, E]
    return (q_pred * gate[..., None]).sum(axis=1)


if __name__ == "__main__":
    B, D, H, E = 256, 128, 256, 4
    key = jax.random.PRNGKey(0)
    kq, kk, kp = jax.random.split(key, 3)

    q = jax.random.normal(kq, (B, D), dtype=jnp.float32)
    k = jax.random.normal(kk, (B, D), dtype=jnp.float32)
    params = init_params(kp, D, H, E)
    packed = pack_params(params)

    out = conditioned_mlp(q, k, packed, temp=1.0, block_b=128)   # grid=(2,)
    out = jax.block_until_ready(out)

    ref = _reference(q, k, params, temp=1.0)
    assert out.shape == (B, D)
    max_err = float(jnp.max(jnp.abs(out - ref)))
    assert jnp.allclose(out, ref, atol=1e-3, rtol=1e-3), f"mismatch vs reference: {max_err}"

    print("KERNEL_OK")
</pallas_src>

<mosaic_0001>
module attributes {stable_mosaic.version = 11 : i64} {
  func.func @_cond_mlp_kernel(%arg0: i32, %arg1: memref<128x128xf32, #tpu.memory_space<vmem>>, %arg2: memref<128x128xf32, #tpu.memory_space<vmem>>, %arg3: memref<128x1024xf32, #tpu.memory_space<vmem>>, %arg4: memref<1x1024xf32, #tpu.memory_space<vmem>>, %arg5: memref<1024x128xf32, #tpu.memory_space<vmem>>, %arg6: memref<4x128xf32, #tpu.memory_space<vmem>>, %arg7: memref<256x4xf32, #tpu.memory_space<vmem>>, %arg8: memref<1x4xf32, #tpu.memory_space<vmem>>, %arg9: memref<4x1024xf32, #tpu.memory_space<vmem>>, %arg10: memref<128x128xf32, #tpu.memory_space<vmem>>) attributes {dimension_semantics = [#tpu.dimension_semantics<parallel>], iteration_bounds = array<i64: 2>, scalar_prefetch = 0 : i64, scratch_operands = 0 : i64, tpu.core_type = #tpu.core_type<tc>, window_params = [{transform_indices = @transform_0, window_bounds = array<i64: 128, 128>}, {transform_indices = @transform_1, window_bounds = array<i64: 128, 128>}, {pipeline_mode = #tpu.pipeline_mode<synchronous>, transform_indices = @transform_2, window_bounds = array<i64: 128, 1024>}, {pipeline_mode = #tpu.pipeline_mode<synchronous>, transform_indices = @transform_3, window_bounds = array<i64: 1, 1024>}, {pipeline_mode = #tpu.pipeline_mode<synchronous>, transform_indices = @transform_4, window_bounds = array<i64: 1024, 128>}, {pipeline_mode = #tpu.pipeline_mode<synchronous>, transform_indices = @transform_5, window_bounds = array<i64: 4, 128>}, {pipeline_mode = #tpu.pipeline_mode<synchronous>, transform_indices = @transform_6, window_bounds = array<i64: 256, 4>}, {pipeline_mode = #tpu.pipeline_mode<synchronous>, transform_indices = @transform_7, window_bounds = array<i64: 1, 4>}, {pipeline_mode = #tpu.pipeline_mode<synchronous>, transform_indices = @transform_8, window_bounds = array<i64: 4, 1024>}, {transform_indices = @transform_9, window_bounds = array<i64: 128, 128>}]} {
    %c0 = arith.constant 0 : index
    %c0_0 = arith.constant 0 : index
    %0 = vector.load %arg1[%c0, %c0_0] : memref<128x128xf32, #tpu.memory_space<vmem>>, vector<128x128xf32>
    %c0_1 = arith.constant 0 : index
    %c0_2 = arith.constant 0 : index
    %1 = vector.load %arg2[%c0_1, %c0_2] : memref<128x128xf32, #tpu.memory_space<vmem>>, vector<128x128xf32>
    %2 = tpu.concatenate %0, %1 in 1 : vector<128x128xf32>, vector<128x128xf32> -> vector<128x256xf32>
    %c0_3 = arith.constant 0 : index
    %c0_4 = arith.constant 0 : index
    %3 = vector.load %arg7[%c0_3, %c0_4] : memref<256x4xf32, #tpu.memory_space<vmem>>, vector<256x4xf32>
    %cst = arith.constant dense<0.000000e+00> : vector<128x4xf32>
    %4 = tpu.matmul %2, %3, %cst {dimension_numbers = #tpu.dot_dimension_numbers<[1], [0], [0], [1], [0, 0, 1, 1], [], []>} : vector<128x256xf32>, vector<256x4xf32>, vector<128x4xf32> -> vector<128x4xf32>
    %c0_5 = arith.constant 0 : index
    %c0_6 = arith.constant 0 : index
    %5 = vector.load %arg8[%c0_5, %c0_6] : memref<1x4xf32, #tpu.memory_space<vmem>>, vector<1x4xf32>
    %6 = vector.broadcast %5 : vector<1x4xf32> to vector<128x4xf32>
    %7 = arith.addf %4, %6 : vector<128x4xf32>
    %cst_7 = arith.constant 1.000000e+00 : f32
    %8 = vector.broadcast %cst_7 : f32 to vector<128x4xf32>
    %9 = arith.mulf %7, %8 : vector<128x4xf32>
    %cst_8 = arith.constant dense<0xFF800000> : vector<128xf32>
    %10 = vector.multi_reduction <maximumf>, %9, %cst_8 [1] : vector<128x4xf32> to vector<128xf32>
    %11 = vector.shape_cast %10 : vector<128xf32> to vector<128x1xf32>
    %12 = vector.broadcast %11 : vector<128x1xf32> to vector<128x4xf32>
    %13 = arith.subf %9, %12 : vector<128x4xf32>
    %14 = math.exp %13 : vector<128x4xf32>
    %cst_9 = arith.constant dense<0.000000e+00> : vector<128xf32>
    %15 = vector.multi_reduction <add>, %14, %cst_9 [1] : vector<128x4xf32> to vector<128xf32>
    %16 = vector.shape_cast %15 : vector<128xf32> to vector<128x1xf32>
    %17 = tpu.reciprocal %16 {approx = true} : vector<128x1xf32> -> vector<128x1xf32>
    %18 = vector.broadcast %17 : vector<128x1xf32> to vector<128x4xf32>
    %19 = arith.mulf %14, %18 : vector<128x4xf32>
    %c0_10 = arith.constant 0 : index
    %c0_11 = arith.constant 0 : index
    %20 = vector.load %arg3[%c0_10, %c0_11] : memref<128x1024xf32, #tpu.memory_space<vmem>>, vector<128x1024xf32>
    %cst_12 = arith.constant dense<0.000000e+00> : vector<128x1024xf32>
    %21 = tpu.matmul %0, %20, %cst_12 {dimension_numbers = #tpu.dot_dimension_numbers<[1], [0], [0], [1], [0, 0, 1, 1], [], []>} : vector<128x128xf32>, vector<128x1024xf32>, vector<128x1024xf32> -> vector<128x1024xf32>
    %c0_13 = arith.constant 0 : index
    %c0_14 = arith.constant 0 : index
    %22 = vector.load %arg4[%c0_13, %c0_14] : memref<1x1024xf32, #tpu.memory_space<vmem>>, vector<1x1024xf32>
    %23 = vector.broadcast %22 : vector<1x1024xf32> to vector<128x1024xf32>
    %24 = arith.addf %21, %23 : vector<128x1024xf32>
    %cst_15 = arith.constant 0.000000e+00 : f32
    %25 = vector.broadcast %cst_15 : f32 to vector<128x1024xf32>
    %26 = arith.maximumf %24, %25 : vector<128x1024xf32>
    %c0_16 = arith.constant 0 : index
    %c0_17 = arith.constant 0 : index
    %27 = vector.load %arg9[%c0_16, %c0_17] : memref<4x1024xf32, #tpu.memory_space<vmem>>, vector<4x1024xf32>
    %cst_18 = arith.constant dense<0.000000e+00> : vector<128x1024xf32>
    %28 = tpu.matmul %19, %27, %cst_18 {dimension_numbers = #tpu.dot_dimension_numbers<[1], [0], [0], [1], [0, 0, 1, 1], [], []>} : vector<128x4xf32>, vector<4x1024xf32>, vector<128x1024xf32> -> vector<128x1024xf32>
    %29 = arith.mulf %26, %28 : vector<128x1024xf32>
    %c0_19 = arith.constant 0 : index
    %c0_20 = arith.constant 0 : index
    %30 = vector.load %arg5[%c0_19, %c0_20] : memref<1024x128xf32, #tpu.memory_space<vmem>>, vector<1024x128xf32>
    %cst_21 = arith.constant dense<0.000000e+00> : vector<128x128xf32>
    %31 = tpu.matmul %29, %30, %cst_21 {dimension_numbers = #tpu.dot_dimension_numbers<[1], [0], [0], [1], [0, 0, 1, 1], [], []>} : vector<128x1024xf32>, vector<1024x128xf32>, vector<128x128xf32> -> vector<128x128xf32>
    %c0_22 = arith.constant 0 : index
    %c0_23 = arith.constant 0 : index
    %32 = vector.load %arg6[%c0_22, %c0_23] : memref<4x128xf32, #tpu.memory_space<vmem>>, vector<4x128xf32>
    %cst_24 = arith.constant dense<0.000000e+00> : vector<128x128xf32>
    %33 = tpu.matmul %19, %32, %cst_24 {dimension_numbers = #tpu.dot_dimension_numbers<[1], [0], [0], [1], [0, 0, 1, 1], [], []>} : vector<128x4xf32>, vector<4x128xf32>, vector<128x128xf32> -> vector<128x128xf32>
    %34 = arith.addf %31, %33 : vector<128x128xf32>
    %c0_25 = arith.constant 0 : index
    %c0_26 = arith.constant 0 : index
    %35 = vector.load %arg10[%c0_25, %c0_26] : memref<128x128xf32, #tpu.memory_space<vmem>>, vector<128x128xf32>
    tpu.vector_store %arg10[%c0_25, %c0_26], %34 {strides = array<i32>} : memref<128x128xf32, #tpu.memory_space<vmem>>, vector<128x128xf32>,
    return
  }
  func.func @transform_0(%arg0: i32) -> (i32, i32) {
    %c0_i32 = arith.constant 0 : i32
    %c0_i32_0 = arith.constant 0 : i32
    return %arg0, %c0_i32 : i32, i32
  }
  func.func @transform_1(%arg0: i32) -> (i32, i32) {
    %c0_i32 = arith.constant 0 : i32
    %c0_i32_0 = arith.constant 0 : i32
    return %arg0, %c0_i32 : i32, i32
  }
  func.func @transform_2(%arg0: i32) -> (i32, i32) {
    %c0_i32 = arith.constant 0 : i32
    %c0_i32_0 = arith.constant 0 : i32
    %c0_i32_1 = arith.constant 0 : i32
    return %c0_i32, %c0_i32_0 : i32, i32
  }
  func.func @transform_3(%arg0: i32) -> (i32, i32) {
    %c0_i32 = arith.constant 0 : i32
    %c0_i32_0 = arith.constant 0 : i32
    %c0_i32_1 = arith.constant 0 : i32
    return %c0_i32, %c0_i32_0 : i32, i32
  }
  func.func @transform_4(%arg0: i32) -> (i32, i32) {
    %c0_i32 = arith.constant 0 : i32
    %c0_i32_0 = arith.constant 0 : i32
    %c0_i32_1 = arith.constant 0 : i32
    return %c0_i32, %c0_i32_0 : i32, i32
  }
  func.func @transform_5(%arg0: i32) -> (i32, i32) {
    %c0_i32 = arith.constant 0 : i32
    %c0_i32_0 = arith.constant 0 : i32
    %c0_i32_1 = arith.constant 0 : i32
    return %c0_i32, %c0_i32_0 : i32, i32
  }
  func.func @transform_6(%arg0: i32) -> (i32, i32) {
    %c0_i32 = arith.constant 0 : i32
    %c0_i32_0 = arith.constant 0 : i32
    %c0_i32_1 = arith.constant 0 : i32
    return %c0_i32, %c0_i32_0 : i32, i32
  }
  func.func @transform_7(%arg0: i32) -> (i32, i32) {
    %c0_i32 = arith.constant 0 : i32
    %c0_i32_0 = arith.constant 0 : i32
    %c0_i32_1 = arith.constant 0 : i32
    return %c0_i32, %c0_i32_0 : i32, i32
  }
  func.func @transform_8(%arg0: i32) -> (i32, i32) {
    %c0_i32 = arith.constant 0 : i32
    %c0_i32_0 = arith.constant 0 : i32
    %c0_i32_1 = arith.constant 0 : i32
    return %c0_i32, %c0_i32_0 : i32, i32
  }
  func.func @transform_9(%arg0: i32) -> (i32, i32) {
    %c0_i32 = arith.constant 0 : i32
    %c0_i32_0 = arith.constant 0 : i32
    return %arg0, %c0_i32 : i32, i32
  }
}

</mosaic_0001>

<bundles_post_ra>
// kernel: tpu_custom_call.1
= control target key start
LH: loop header
LB: loop body
LE: loop exit
PB: predicated region body
PF: predicated region fallthrough
CT: control target
= control target key end

     0   :  { %s6786_s0 = inlined_call_operand.vmem [shape: f32[256,128], index: 0, kind: input, shape index: {}]   ;;  %s6787_s1 = inlined_call_operand.hbm [shape: f32[256,128], index: 1, kind: input, shape index: {}]   ;;  %s6788_s2 = inlined_call_operand.hbm [shape: f32[128,1024], index: 2, kind: input, shape index: {}]   ;;  %s6789_s3 = inlined_call_operand.hbm [shape: f32[1,1024], index: 3, kind: input, shape index: {}]   ;;  %s6790_s4 = inlined_call_operand.hbm [shape: f32[1024,128], index: 4, kind: input, shape index: {}]   ;;  %s6791_s5 = inlined_call_operand.hbm [shape: f32[4,128], index: 5, kind: input, shape index: {}]   ;;  %s6792_s6 = inlined_call_operand.vmem [shape: f32[256,4], index: 6, kind: input, shape index: {}]   ;;  %s6793_s7 = inlined_call_operand.vmem [shape: f32[1,4], index: 7, kind: input, shape index: {}]   ;;  %s6794_s8 = inlined_call_operand.vmem [shape: f32[4,1024], index: 8, kind: input, shape index: {}]   ;;  %s6795_s9 = inlined_call_operand.hbm [shape: f32[256,128], index: 9, kind: output, shape index: {}]  }
   0x1   :  { %6803 = sst [smem:[#allocation114_spill]] %s6788_s2 }
   0x2   :  { %14 = vsyncpa [#allocation3], 0 }
   0x3   :  { %16 = vsyncpa [#allocation3 + $0x1], 0 }
   0x4   :  { %17 = vsyncpa [#allocation6], 0 }
   0x5   :  { %18 = vsyncpa [#allocation9], 0 }
   0x6   :  { %19 = vsyncpa [#allocation4], 0 }
   0x7   :  { %21 = vsyncpa [#allocation4 + $0x1], 0  ;;  %s4945_s30 = smov 0   ;;  %s4947_s10 = smov 0  }
   0x8   :  { %s4949_s11 = smov 0   ;;  %s4951_s12 = smov 0  }
   0x9 LB: > { %6804 = sst [smem:[#allocation16_spill]] %s4868_s30  ;;  %s4966_s13 = sadd.s32 4294967295, %s4880_s12   ;;  %s4880_s12 = sphi %s4951_s12, %s7021_s12   ;;  %s4876_s11 = sphi %s4949_s11, %s7020_s11   ;;  %s4872_s10 = sphi %s4947_s10, %s7019_s10   ;;  %s4868_s30 = sphi %s4945_s30, %s7018_s30  }
   0xa   : > { %s3623_s14 = sadd.s32 4294967294, %s4880_s12   ;;  %p73_p0 = scmp.ne.s32.totalorder %s4872_s10, %s4868_s30 }
   0xb   : > { %p6796_p1 = scmp.eq.s32.totalorder %s4966_s13, 0  ;;  %p250_p3 = scmp.eq.s32.totalorder %s3623_s14, 1 }
   0xc   : > { %p3624_p5 = scmp.ge.s32.totalorder %s4880_s12, 1  ;;  %p257_p7 = scmp.lt.s32.totalorder %s4880_s12, 3 }
   0xd   : > { %p4975_p4 = por %p6796_p1, %p73_p0  ;;  %p4980_p6 = por %p250_p3, %p73_p0 }
   0xe   : > { %p4985_p8 = pnand %p3624_p5, %p257_p7  ;;  %s4882_s18 = smov [#allocation5]  }
   0xf   : > { %s6805_s15 = scalar_select %p4975_p4, 1, 0 }
  0x10   : > { %s6806_s16 = scalar_select %p4980_p6, 1, 0 }
  0x11   : > { %s6808_s17 = scalar_select %p4985_p8, 1, 0 }
  0x12   : > { %6807 = sst [smem:[#allocation17_spill]] %s6806_s16  ;;  %s269_s19 = sshll.u32 %s4882_s18, 4  ;;  %s4989_s19 = int_to_ptr.vmem [resolvable:$true] %s269_s19 }
  0x13   : > { %p4506_p9 = pneg %p4985_p8  ;;  %s4883_s21 = smov [#allocation8]  }
  0x14   : > { %s293_s22 = sshll.u32 %s4883_s21, 4  ;;  %s6810_s2 = sld [smem:[#allocation114_spill]]  ;;  %s5000_s22 = int_to_ptr.vmem [resolvable:$true] %s293_s22 }
  0x15   : > { %p4996_p11 = pnand %p4506_p9, %p6796_p1 }
  0x17   : > { %p5010_p13 = pneg %p4996_p11 }
  0x1a   : > { %s4664_s25 = scalar_lea.hbm %s6810_s2, 16384 }
  0x1b   : > { %p4665_p12 = scmp.ne.s32.totalorder %s6810_s2, %s4664_s25  ;;  %p4671_p5 = scmp.lt.u32.totalorder %s4664_s25, %s6810_s2 }
  0x1d   : > { %p4667_p0 = pnand %p5010_p13, %p4665_p12 }
  0x1f   : > { %p4668_p3 = pneg %p4667_p0 }
  0x21   : > { %p4673_p7 = pnand %p4671_p5, %p4668_p3 }
  0x23   : > { %4676 = shalt.err (!%p4673_p7)
}
  0x24   : > { %s4677_s18 = scalar_lea.vmem %s4989_s19, 16384  ;;  %p4685_p2 = scmp.lt.s32.totalorder %s4989_s19, %s4989_s19 }
  0x25   : > { %p4678_p9 = scmp.ne.s32.totalorder %s4989_s19, %s4677_s18  ;;  %p4686_p6 = scmp.lt.s32.totalorder %s4677_s18, %s4677_s18 }
  0x27   : > { %p4680_p10 = pnand %p4678_p9, %p5010_p13  ;;  %p4687_p12 = por %p4686_p6, %p4685_p2 }
  0x29   : > { %p4681_p1 = pneg %p4680_p10 }
  0x2b   : > { %p4688_p0 = pnand %p4687_p12, %p4681_p1 }
  0x2d   : > { %4691 = shalt.err (!%p4688_p0)
}
  0x2e   : > { %s4884_s21 = smov 1024   ;;  %s4885_s23 = smov 64  }
  0x2f   : > { %4509 = dma.hbm_to_vmem [thread:$0]  (!%p4996_p11), %s6810_s2, 16384, %s4989_s19, [#allocation6], %s4884_s21, %s4884_s21, %s4885_s23  }
  0x30   : > { %s4692_s29 = scalar_lea.hbm %s6790_s4, 16384 }
  0x31   : > { %p4693_p2 = scmp.ne.s32.totalorder %s6790_s4, %s4692_s29  ;;  %p4699_p10 = scmp.lt.u32.totalorder %s4692_s29, %s6790_s4 }
  0x33   : > { %p4695_p1 = pnand %p4693_p2, %p5010_p13 }
  0x35   : > { %p4696_p6 = pneg %p4695_p1 }
  0x37   : > { %p4701_p3 = pnand %p4699_p10, %p4696_p6 }
  0x39   : > { %4704 = shalt.err (!%p4701_p3)
}
  0x3a   : > { %s4705_s19 = scalar_lea.vmem %s5000_s22, 16384  ;;  %p4713_p12 = scmp.lt.s32.totalorder %s5000_s22, %s5000_s22 }
  0x3b   : > { %p4706_p5 = scmp.ne.s32.totalorder %s5000_s22, %s4705_s19  ;;  %p4714_p0 = scmp.lt.s32.totalorder %s4705_s19, %s4705_s19 }
  0x3d   : > { %p4708_p7 = pnand %p4706_p5, %p5010_p13  ;;  %p4715_p2 = por %p4714_p0, %p4713_p12 }
  0x3f   : > { %p4709_p9 = pneg %p4708_p7 }
  0x41   : > { %p4716_p1 = pnand %p4715_p2, %p4709_p9 }
  0x43   : > { %4719 = shalt.err (!%p4716_p1)
}
  0x44   : > { %s4886_s16 = smov 128   ;;  %s4887_s30 = smov 8  }
  0x45   : > { %4515 = dma.hbm_to_vmem [thread:$0]  (!%p4996_p11), %s6790_s4, 16384, %s5000_s22, [#allocation9], %s4886_s16, %s4886_s16, %s4887_s30  }
  0x46   : > { %s4888_s24 = smov [#allocation7]   ;;  %s4889_s26 = smov [#allocation10]  }
  0x47   : > { %s283_s25 = sshll.u32 %s4888_s24, 4  ;;  %s307_s27 = sshll.u32 %s4889_s26, 4  ;;  %s284_s25 = int_to_ptr.vmem [resolvable:$true] %s283_s25  ;;  %s5057_s27 = int_to_ptr.vmem [resolvable:$true] %s307_s27 }
  0x48   : > { %s4720_s18 = scalar_lea.hbm %s6789_s3, 128 }
  0x49   : > { %p4721_p6 = scmp.ne.s32.totalorder %s6789_s3, %s4720_s18  ;;  %p4727_p5 = scmp.lt.u32.totalorder %s4720_s18, %s6789_s3 }
  0x4b   : > { %p4723_p10 = pnand %p4721_p6, %p5010_p13 }
  0x4d   : > { %p4724_p3 = pneg %p4723_p10 }
  0x4f   : > { %p4729_p7 = pnand %p4727_p5, %p4724_p3 }
  0x51   : > { %4732 = shalt.err (!%p4729_p7)
}
  0x52   : > { %s4733_s23 = scalar_lea.vmem %s284_s25, 128  ;;  %p4741_p2 = scmp.lt.s32.totalorder %s284_s25, %s284_s25 }
  0x53   : > { %p4734_p9 = scmp.ne.s32.totalorder %s284_s25, %s4733_s23  ;;  %p4742_p1 = scmp.lt.s32.totalorder %s4733_s23, %s4733_s23 }
  0x55   : > { %p4736_p12 = pnand %p4734_p9, %p5010_p13  ;;  %p4743_p4 = por %p4742_p1, %p4741_p2 }
  0x57   : > { %p4737_p0 = pneg %p4736_p12 }
  0x59   : > { %p4744_p8 = pnand %p4743_p4, %p4737_p0 }
  0x5b   : > { %4747 = shalt.err (!%p4744_p8)
}
  0x5c   : > { %4512 = dma.hbm_to_vmem [thread:$0]  (!%p4996_p11), %s6789_s3, 128, %s284_s25, [#allocation6]  }
  0x5d   : > { %s4748_s14 = scalar_lea.hbm %s6791_s5, 64 }
  0x5e   : > { %p4749_p6 = scmp.ne.s32.totalorder %s6791_s5, %s4748_s14  ;;  %p4755_p4 = scmp.lt.u32.totalorder %s4748_s14, %s6791_s5 }
  0x60   : > { %p4751_p10 = pnand %p4749_p6, %p5010_p13 }
  0x62   : > { %p4752_p3 = pneg %p4751_p10 }
  0x64   : > { %p4757_p8 = pnand %p4755_p4, %p4752_p3 }
  0x66   : > { %4760 = shalt.err (!%p4757_p8)
}
  0x67   : > { %s4761_s25 = scalar_lea.vmem %s5057_s27, 64  ;;  %p4769_p12 = scmp.lt.s32.totalorder %s5057_s27, %s5057_s27 }
  0x68   : > { %p4762_p5 = scmp.ne.s32.totalorder %s5057_s27, %s4761_s25  ;;  %p4770_p0 = scmp.lt.s32.totalorder %s4761_s25, %s4761_s25 }
  0x6a   : > { %p4764_p7 = pnand %p4762_p5, %p5010_p13  ;;  %p4771_p2 = por %p4770_p0, %p4769_p12 }
  0x6c   : > { %p4765_p9 = pneg %p4764_p7 }
  0x6e   : > { %p4772_p1 = pnand %p4771_p2, %p4765_p9 }
  0x70   : > { %4775 = shalt.err (!%p4772_p1)
}
  0x71   : > { %4518 = dma.hbm_to_vmem [thread:$0]  (!%p4996_p11), %s6791_s5, 64, %s5057_s27, [#allocation9]  }
  0x72   : > { %s5101_s28 = sadd.s32 1, %s4880_s12   ;;  %s60_s24 = sadd.s32 1, %s4876_s11 }
  0x73   : > { %s57_s20 = ssub.s32 %s4880_s12, %s5101_s28  ;;  %p67_p6 = scmp.ne.s32.totalorder %s4876_s11, %s4872_s10 }
  0x74   : > { %p58_p13 = scmp.eq.s32.totalorder %s57_s20, 0  ;;  %p68_p10 = scmp.eq.s32.totalorder %s4880_s12, 0 }
  0x75   : > { %p6812_p4 = scmp.eq.s32.totalorder %s4966_s13, 1  ;;  %p4531_p5 = scmp.lt.s32.totalorder %s4880_s12, 2 }
  0x76   : > { %s5110_s26 = scalar_select %p58_p13, %s4876_s11, %s60_s24  }
  0x77   : > { %p69_p3 = por %p68_p10, %p67_p6  ;;  %p5114_p8 = por %p6812_p4, %p67_p6 }
  0x78   : > { %s336_s14 = sand.u32 1, %s4876_s11   ;;  %s3737_s27 = sshll.u32 %s4880_s12, 11 }
  0x79   : > { %s3630_s18 = sshll.u32 %s336_s14, 7  ;;  %s5124_s22 = scalar_lea.hbm %s6787_s1, %s3737_s27 }
  0x7a   : > { %s340_s25 = scalar_lea.vmem [#allocation2], %s3630_s18  ;;  %p5128_p11 = pnand %p4531_p5, %p69_p3 }
  0x7b   : > { %s347_s23 = sshll.u32 %s340_s25, 4  ;;  %s5132_s20 = scalar_lea.sflag [#allocation3], %s336_s14  ;;  %s5126_s23 = int_to_ptr.vmem [resolvable:$true] %s347_s23 }
  0x7c   : > { %s4776_s24 = scalar_lea.hbm %s5124_s22, 2048  ;;  %p4778_p9 = pneg %p5128_p11 }
  0x7d   : > { %p4777_p7 = scmp.ne.s32.totalorder %s5124_s22, %s4776_s24  ;;  %s4781_s19 = scalar_lea.hbm %s6787_s1, 4096 }
  0x7e   : > { %p4782_p2 = scmp.lt.u32.totalorder %s5124_s22, %s6787_s1  ;;  %p4783_p1 = scmp.lt.u32.totalorder %s4781_s19, %s4776_s24 }
  0x7f   : > { %p4779_p12 = pnand %p4778_p9, %p4777_p7  ;;  %p4785_p6 = scmp.lt.u32.totalorder %s4776_s24, %s5124_s22 }
  0x80   : > { %p4784_p13 = por %p4783_p1, %p4782_p2 }
  0x81   : > { %p4780_p0 = pneg %p4779_p12 }
  0x82   : > { %p4786_p10 = por %p4785_p6, %p4784_p13 }
  0x84   : > { %p4787_p3 = pnand %p4786_p10, %p4780_p0 }
  0x86   : > { %4790 = shalt.err (!%p4787_p3)
}
  0x87   : > { %s4791_s14 = scalar_lea.vmem %s5126_s23, 2048  ;;  %s4890_s18 = smov [#allocation2]  }
  0x88   : > { %p4792_p4 = scmp.ne.s32.totalorder %s5126_s23, %s4791_s14  ;;  %s4796_s27 = sshll.u32 %s4890_s18, 4  ;;  %s4797_s27 = int_to_ptr.vmem [resolvable:$false] %s4796_s27 }
  0x89   : > { %s4798_s21 = scalar_lea.vmem %s4797_s27, 4096  ;;  %p4799_p12 = scmp.lt.s32.totalorder %s5126_s23, %s4797_s27 }
  0x8a   : > { %p4794_p5 = pnand %p4792_p4, %p4778_p9  ;;  %p4800_p2 = scmp.lt.s32.totalorder %s4798_s21, %s4791_s14 }
  0x8c   : > { %p4795_p7 = pneg %p4794_p5  ;;  %p4801_p1 = por %p4800_p2, %p4799_p12 }
  0x8e   : > { %p4802_p13 = pnand %p4801_p1, %p4795_p7 }
  0x90   : > { %4805 = shalt.err (!%p4802_p13)
}
  0x91   : > { %4522 = dma.hbm_to_vmem [thread:$0]  (!%p5128_p11), %s5124_s22, 2048, %s5126_s23, %s5132_s20, %s4886_s16, %s4886_s16, %s4887_s30  }
  0x92   : > { %p6815_p9 = scmp.ne.s32.totalorder %s6808_s17, 0 }
  0x94   : > { %359 = sbr.rel (%p6815_p9) target bundleno = 1306 (0x51a), region = 56 }
  0x9b   : > { %s5166_s24 = sand.u32 1, %s4872_s10   ;;  %p6816_p0 = scmp.ne.s32.totalorder %s6805_s15, 0 }
  0x9c   : > { %s3634_s19 = sshll.u32 %s5166_s24, 7  ;;  %s362_s25 = scalar_lea.sflag [#allocation3], %s5166_s24 }
  0x9d   : > { %s5172_s2 = scalar_lea.vmem [#allocation2], %s3634_s19 }
  0x9e   : > { %4851 = dma.done.wait (%p6816_p0), %s362_s25, 2048  }
  0x9f   : > { %4853 = vsyncadd (%p6816_p0), %s362_s25, 4294965248  ;;  %p6817_p11 = scmp.eq.s32.totalorder %s4966_s13, 0 }
  0xa1   : > { %4855 = dma.done.wait (%p6817_p11), [#allocation6], 16512   ;;  %p6818_p6 = pmov %p6817_p11 }
  0xa3   : > { %4857 = vsyncadd (%p6818_p6), [#allocation6], 4294950784  ;;  %p6819_p10 = pmov %p6818_p6 }
  0xa4   : > { %p6820_p3 = pmov %p6818_p6 }
  0xa5   : > { %4859 = dma.done.wait (%p6819_p10), [#allocation9], 16448  }
  0xa6   : > { %4861 = vsyncadd (%p6820_p3), [#allocation9], 4294950848  ;;  %v477_v0 = vld [vmem:[%s6792_s6 + $0x80] sm:$0xff]  ;;  %v478_v1 = vld [vmem:[%s6792_s6 + $0x88] sm:$0xff]  ;;  %s3640_s18 = sshll.u32 %s4966_s13, 4  ;;  %vm645_vm0 = vcmask 31744  }
  0xa7   : > { %v461_v2 = vld [vmem:[%s6792_s6] sm:$0xff]  ;;  %v4182_v3 = vpack.c.bf16 %v478_v1, %v477_v0  ;;  %v462_v4 = vld [vmem:[%s6792_s6 + $0x8] sm:$0xff]  ;;  %v479_v5 = vld [vmem:[%s6792_s6 + $0x90] sm:$0xff]  ;;  %p422_p4 = scmp.lt.s32.totalorder %s3640_s18, 31  ;;  %vm1824_vm1 = vcmask 1043456   ;;  %s6702_s14 = scalar_lea.vmem [#allocation11], %s3634_s19 }
  0xa8   : > { %v480_v6 = vld [vmem:[%s6792_s6 + $0x98] sm:$0xff]  ;;  %v4184_v7 = vpack.c.bf16 %v462_v4, %v461_v2  ;;  %v463_v9 = vld [vmem:[%s6792_s6 + $0x10] sm:$0xff]  ;;  %v481_v11 = vld [vmem:[%s6792_s6 + $0xa0] sm:$0xff]  ;;  %s3738_s19 = sshll.u32 %s4966_s13, 11  ;;  %s3500_s27 = sshll.u32 %s6702_s14, 4  ;;  %s6741_s27 = int_to_ptr.vmem [resolvable:$true] %s3500_s27 }
  0xa9   : > { %v4186_v8 = vpack.c.bf16 %v480_v6, %v479_v5  ;;  %v464_v10 = vld [vmem:[%s6792_s6 + $0x18] sm:$0xff]  ;;  %4183 = vmatprep.subr.bf16.mxu0 %v4182_v3  ;;  %v482_v12 = vld [vmem:[%s6792_s6 + $0xa8] sm:$0xff]  ;;  %v465_v15 = vld [vmem:[%s6792_s6 + $0x20] sm:$0xff]  ;;  %s7023_s18 = smov (!%p422_p4, %s3640_s18), 31  ;;  %s3487_s25 = scalar_lea.sflag [#allocation4], %s5166_s24 }
  0xaa   : > { %4185 = vmatpush3.bf16.msra.mxu0 %v4184_v7  ;;  %v4188_v13 = vpack.c.bf16 %v464_v10, %v463_v9  ;;  %v4190_v14 = vpack.c.bf16 %v482_v12, %v481_v11  ;;  %v466_v16 = vld [vmem:[%s6792_s6 + $0x28] sm:$0xff]  ;;  %v483_v17 = vld [vmem:[%s6792_s6 + $0xb0] sm:$0xff]  ;;  %v484_v18 = vld [vmem:[%s6792_s6 + $0xb8] sm:$0xff]  ;;  %s3641_s20 = sshll.u32 %s7023_s18, 3  ;;  %s6739_s18 = scalar_lea.hbm %s6795_s9, %s3738_s19 }
  0xab   : > { %4187 = vmatprep.subr.bf16.mxu0 %v4186_v8  ;;  %v4192_v19 = vpack.c.bf16 %v466_v16, %v465_v15  ;;  %v4194_v20 = vpack.c.bf16 %v484_v18, %v483_v17  ;;  %v467_v21 = vld [vmem:[%s6792_s6 + $0x30] sm:$0xff]  ;;  %v468_v22 = vld [vmem:[%s6792_s6 + $0x38] sm:$0xff]  ;;  %v485_v23 = vld [vmem:[%s6792_s6 + $0xc0] sm:$0xff]  ;;  %s5287_s21 = scalar_lea.vmem %s6786_s0, %s3641_s20  ;;  %s4806_s17 = scalar_lea.vmem %s6741_s27, 2048 }
  0xac   : > { %v486_v24 = vld [vmem:[%s6792_s6 + $0xc8] sm:$0xff]  ;;  %v445_v25 = vld [vmem:[%s5172_s2] sm:$0xff]  ;;  %v4196_v26 = vpack.c.bf16 %v468_v22, %v467_v21  ;;  %v487_v30 = vld [vmem:[%s6792_s6 + $0xd0] sm:$0xff]  ;;  %p4807_p5 = scmp.ne.s32.totalorder %s6741_s27, %s4806_s17  ;;  %s4892_s13 = smov [#allocation11]  }
  0xad   : > { %564 = vmatprep.mubr.f32.mxu0 %v445_v25  ;;  %v4198_v27 = vpack.c.bf16 %v486_v24, %v485_v23  ;;  %v469_v28 = vld [vmem:[%s6792_s6 + $0x40] sm:$0xff]  ;;  %v470_v29 = vld [vmem:[%s6792_s6 + $0x48] sm:$0xff]  ;;  %v488_v31 = vld [vmem:[%s6792_s6 + $0xd8] sm:$0xff]  ;;  %s4810_s16 = sshll.u32 %s4892_s13, 4  ;;  %s4811_s16 = int_to_ptr.vmem [resolvable:$false] %s4810_s16 }
  0xae   : > { %4189 = vmatpush3.bf16.msra.mxu0 %v4188_v13  ;;  %v4200_v32 = vpack.c.bf16 %v470_v29, %v469_v28  ;;  %v4202_v33 = vpack.c.bf16 %v488_v31, %v487_v30  ;;  %v471_v34 = vld [vmem:[%s6792_s6 + $0x50] sm:$0xff]  ;;  %v472_v35 = vld [vmem:[%s6792_s6 + $0x58] sm:$0xff]  ;;  %v489_v36 = vld [vmem:[%s6792_s6 + $0xe0] sm:$0xff]  ;;  %p4808_p7 = pnand %p4807_p5, %p5114_p8  ;;  %s4812_s30 = scalar_lea.vmem %s4811_s16, 4096 }
  0xaf   : > { %4191 = vmatprep.subr.bf16.mxu0 %v4190_v14  ;;  %v490_v37 = vld [vmem:[%s6792_s6 + $0xe8] sm:$0xff]  ;;  %v4204_v38 = vpack.c.bf16 %v472_v35, %v471_v34  ;;  %v473_v40 = vld [vmem:[%s6792_s6 + $0x60] sm:$0xff]  ;;  %v491_v42 = vld [vmem:[%s6792_s6 + $0xf0] sm:$0xff]  ;;  %p4813_p2 = scmp.lt.s32.totalorder %s6741_s27, %s4811_s16  ;;  %p4814_p1 = scmp.lt.s32.totalorder %s4812_s30, %s4806_s17 }
  0xb0   : > { %v4206_v39 = vpack.c.bf16 %v490_v37, %v489_v36  ;;  %v474_v41 = vld [vmem:[%s6792_s6 + $0x68] sm:$0xff]  ;;  %v492_v43 = vld [vmem:[%s6792_s6 + $0xf8] sm:$0xff]  ;;  %v475_v46 = vld [vmem:[%s6792_s6 + $0x70] sm:$0xff]  ;;  %p4809_p12 = pneg %p4808_p7 }
  0xb1   : > { %v4208_v44 = vpack.c.bf16 %v474_v41, %v473_v40  ;;  %v4210_v45 = vpack.c.bf16 %v492_v43, %v491_v42  ;;  %v476_v47 = vld [vmem:[%s6792_s6 + $0x78] sm:$0xff]  ;;  %v5290_v49 = vld [vmem:[%s5287_s21] sm:$0xff]  ;;  %v446_v50 = vld [vmem:[%s5172_s2 + $0x8] sm:$0xff]  ;;  %p4815_p13 = por %p4814_p1, %p4813_p2 }
  0xb2   : > { %4193 = vmatpush3.bf16.msra.mxu0 %v4192_v19  ;;  %v4212_v48 = vpack.c.bf16 %v476_v47, %v475_v46  ;;  %v5295_v51 = vld [vmem:[%s5287_s21 + $0x8] sm:$0xff]  ;;  %v447_v52 = vld [vmem:[%s5172_s2 + $0x10] sm:$0xff]  ;;  %v448_v54 = vld [vmem:[%s5172_s2 + $0x18] sm:$0xff] }
  0xb3   : > { %4195 = vmatprep.subr.bf16.mxu0 %v4194_v20  ;;  %v5300_v53 = vld [vmem:[%s5287_s21 + $0x10] sm:$0xff]  ;;  %v5305_v55 = vld [vmem:[%s5287_s21 + $0x18] sm:$0xff]  ;;  %v449_v56 = vld [vmem:[%s5172_s2 + $0x20] sm:$0xff]  ;;  %p4816_p9 = pnand %p4815_p13, %p4809_p12 }
  0xb4   : > { %v5310_v57 = vld [vmem:[%s5287_s21 + $0x20] sm:$0xff]  ;;  %v450_v58 = vld [vmem:[%s5172_s2 + $0x28] sm:$0xff]  ;;  %v451_v60 = vld [vmem:[%s5172_s2 + $0x30] sm:$0xff] }
  0xb5   : > { %v5315_v59 = vld [vmem:[%s5287_s21 + $0x28] sm:$0xff]  ;;  %v5320_v61 = vld [vmem:[%s5287_s21 + $0x30] sm:$0xff]  ;;  %v452_v62 = vld [vmem:[%s5172_s2 + $0x38] sm:$0xff] }
  0xb6   : > { %4197 = vmatpush3.bf16.msra.mxu0 %v4196_v26  ;;  %v5325_v63 = vld [vmem:[%s5287_s21 + $0x38] sm:$0xff]  ;;  %v453_v0 = vld [vmem:[%s5172_s2 + $0x40] sm:$0xff]  ;;  %v454_v2 = vld [vmem:[%s5172_s2 + $0x48] sm:$0xff] }
  0xb7   : > { %4199 = vmatprep.subr.bf16.mxu0 %v4198_v27  ;;  %v5330_v1 = vld [vmem:[%s5287_s21 + $0x40] sm:$0xff]  ;;  %v5335_v3 = vld [vmem:[%s5287_s21 + $0x48] sm:$0xff]  ;;  %v455_v4 = vld [vmem:[%s5172_s2 + $0x50] sm:$0xff] }
  0xb8   : > { %v5340_v5 = vld [vmem:[%s5287_s21 + $0x50] sm:$0xff]  ;;  %v456_v6 = vld [vmem:[%s5172_s2 + $0x58] sm:$0xff]  ;;  %v457_v8 = vld [vmem:[%s5172_s2 + $0x60] sm:$0xff] }
  0xb9   : > { %v5345_v7 = vld [vmem:[%s5287_s21 + $0x58] sm:$0xff]  ;;  %v5350_v9 = vld [vmem:[%s5287_s21 + $0x60] sm:$0xff]  ;;  %v458_v10 = vld [vmem:[%s5172_s2 + $0x68] sm:$0xff] }
  0xba   : > { %4201 = vmatpush3.bf16.msra.mxu0 %v4200_v32  ;;  %v5355_v11 = vld [vmem:[%s5287_s21 + $0x68] sm:$0xff]  ;;  %v459_v12 = vld [vmem:[%s5172_s2 + $0x70] sm:$0xff]  ;;  %v460_v14 = vld [vmem:[%s5172_s2 + $0x78] sm:$0xff] }
  0xbb   : > { %4203 = vmatprep.subr.bf16.mxu0 %v4202_v33  ;;  %v5360_v13 = vld [vmem:[%s5287_s21 + $0x70] sm:$0xff]  ;;  %v5365_v15 = vld [vmem:[%s5287_s21 + $0x78] sm:$0xff]  ;;  %v823_v16 = vld [vmem:[#allocation5 + $0x8] sm:$0xff] }
  0xbc   : > { %v831_v17 = vld [vmem:[#allocation5 + $0x48] sm:$0xff]  ;;  %v822_v18 = vld [vmem:[#allocation5] sm:$0xff]  ;;  %v825_v21 = vld [vmem:[#allocation5 + $0x18] sm:$0xff] }
  0xbd   : > { %v4214_v19 = vpack.c.bf16 %v831_v17, %v823_v16  ;;  %v830_v20 = vld [vmem:[#allocation5 + $0x40] sm:$0xff]  ;;  %v833_v22 = vld [vmem:[#allocation5 + $0x58] sm:$0xff]  ;;  %v824_v25 = vld [vmem:[#allocation5 + $0x10] sm:$0xff] }
  0xbe   : > { %4205 = vmatpush3.bf16.msra.mxu0 %v4204_v38  ;;  %v4216_v23 = vpack.c.bf16 %v830_v20, %v822_v18  ;;  %v4246_v24 = vpack.c.bf16 %v833_v22, %v825_v21  ;;  %v832_v26 = vld [vmem:[#allocation5 + $0x50] sm:$0xff]  ;;  %v839_v27 = vld [vmem:[#allocation5 + $0x88] sm:$0xff]  ;;  %v838_v30 = vld [vmem:[#allocation5 + $0x80] sm:$0xff] }
  0xbf   : > { %4207 = vmatprep.subr.bf16.mxu0 %v4206_v39  ;;  %4215 = vmatprep.subr.bf16.mxu1 %v4214_v19  ;;  %v4248_v28 = vpack.c.bf16 %v832_v26, %v824_v25  ;;  %v847_v29 = vld [vmem:[#allocation5 + $0xc8] sm:$0xff]  ;;  %v846_v31 = vld [vmem:[#allocation5 + $0xc0] sm:$0xff] }
  0xc0   : > { %4217 = vmatpush1.bf16.msra.mxu1 %v4216_v23  ;;  %v4218_v32 = vpack.c.bf16 %v847_v29, %v839_v27  ;;  %v4220_v33 = vpack.c.bf16 %v846_v31, %v838_v30  ;;  %v5371_v36 = vld [vmem:[%s6793_s7] ss:$0 sm:$0xff]  ;;  %v871_v23 = vld [vmem:[#allocation5 + $0x188] sm:$0xff] }
  0xc1   : > { %v854_v16 = vld [vmem:[#allocation5 + $0x100] sm:$0xff] }
  0xc2   : > { %4209 = vmatpush3.bf16.msra.mxu0 %v4208_v44  ;;  %4219 = vmatprep.subr.bf16.mxu1 %v4218_v32  ;;  %v862_v17 = vld [vmem:[#allocation5 + $0x140] sm:$0xff] }
  0xc3   : > { %4211 = vmatprep.subr.bf16.mxu0 %v4210_v45  ;;  %v4224_v20 = vpack.c.bf16 %v862_v17, %v854_v16  ;;  %v870_v27 = vld [vmem:[#allocation5 + $0x180] sm:$0xff] }
  0xc4   : > { %4221 = vmatpush1.bf16.msra.mxu1 %v4220_v33 }
  0xc6   : > { %4213 = vmatpush3.bf16.msra.mxu0 %v4212_v48 }
  0xc7   : > { %4247 = vmatprep.subr.bf16.mxu0 %v4246_v24  ;;  %v879_v24 = vld [vmem:[#allocation5 + $0x1c8] sm:$0xff] }
  0xc8   : > { %v4226_v26 = vpack.c.bf16 %v879_v24, %v871_v23  ;;  %v857_v24 = vld [vmem:[#allocation5 + $0x118] sm:$0xff] }
  0xc9   : > { %565 = vmatmul.mubr.f32.vlgmr.msra.gmra.mrb[0].mxu0 %v5290_v49 }
  0xca   : > { %569 = vmatprep.mubr.f32.mxu0 %v446_v50  ;;  %4249 = vmatpush1.bf16.msra.mxu0 %v4248_v28  ;;  %v878_v28 = vld [vmem:[#allocation5 + $0x1c0] sm:$0xff] }
  0xcb   : > { %v4228_v31 = vpack.c.bf16 %v878_v28, %v870_v27 }
  0xcd   : > { %570 = vmatmul.mubr.f32.gmra.mrb[2].mxu0 %v5295_v51 }
  0xce   : > { %574 = vmatprep.mubr.f32.mxu0 %v447_v52 }
  0xd1   : > { %575 = vmatmul.mubr.f32.gmra.mrb[4].mxu0 %v5300_v53 }
  0xd2   : > { %579 = vmatprep.mubr.f32.mxu0 %v448_v54 }
  0xd5   : > { %580 = vmatmul.mubr.f32.gmra.mrb[6].mxu0 %v5305_v55 }
  0xd6   : > { %584 = vmatprep.mubr.f32.mxu0 %v449_v56 }
  0xd9   : > { %585 = vmatmul.mubr.f32.gmra.mrb[8].mxu0 %v5310_v57 }
  0xda   : > { %589 = vmatprep.mubr.f32.mxu0 %v450_v58 }
  0xdd   : > { %590 = vmatmul.mubr.f32.gmra.mrb[10].mxu0 %v5315_v59 }
  0xde   : > { %594 = vmatprep.mubr.f32.mxu0 %v451_v60 }
  0xe1   : > { %595 = vmatmul.mubr.f32.gmra.mrb[12].mxu0 %v5320_v61 }
  0xe2   : > { %599 = vmatprep.mubr.f32.mxu0 %v452_v62 }
  0xe5   : > { %600 = vmatmul.mubr.f32.gmra.mrb[14].mxu0 %v5325_v63 }
  0xe6   : > { %604 = vmatprep.mubr.f32.mxu0 %v453_v0 }
  0xe9   : > { %605 = vmatmul.mubr.f32.gmra.mrb[16].mxu0 %v5330_v1 }
  0xea   : > { %609 = vmatprep.mubr.f32.mxu0 %v454_v2 }
  0xed   : > { %610 = vmatmul.mubr.f32.gmra.mrb[18].mxu0 %v5335_v3 }
  0xee   : > { %614 = vmatprep.mubr.f32.mxu0 %v455_v4 }
  0xf1   : > { %615 = vmatmul.mubr.f32.gmra.mrb[20].mxu0 %v5340_v5 }
  0xf2   : > { %619 = vmatprep.mubr.f32.mxu0 %v456_v6 }
  0xf5   : > { %620 = vmatmul.mubr.f32.gmra.mrb[22].mxu0 %v5345_v7 }
  0xf6   : > { %624 = vmatprep.mubr.f32.mxu0 %v457_v8  ;;  %v855_v8 = vld [vmem:[#allocation5 + $0x108] sm:$0xff] }
  0xf9   : > { %625 = vmatmul.mubr.f32.gmra.mrb[24].mxu0 %v5350_v9 }
  0xfa   : > { %629 = vmatprep.mubr.f32.mxu0 %v458_v10  ;;  %v863_v10 = vld [vmem:[#allocation5 + $0x148] sm:$0xff] }
  0xfd   : > { %630 = vmatmul.mubr.f32.gmra.mrb[26].mxu0 %v5355_v11 }
  0xfe   : > { %634 = vmatprep.mubr.f32.mxu0 %v459_v12 }
 0x101   : > { %635 = vmatmul.mubr.f32.gmra.mrb[28].mxu0 %v5360_v13 }
 0x102   : > { %639 = vmatprep.mubr.f32.mxu0 %v460_v14  ;;  %v4222_v14 = vpack.c.bf16 %v863_v10, %v855_v8  ;;  %v902_v10 = vld [vmem:[#allocation5 + $0x280] sm:$0xff] }
 0x104   : > { %4223 = vmatprep.subr.bf16.mxu1 %v4222_v14 }
 0x105   : > { %640 = vmatmul.mubr.f32.gmra.mrb[30].mxu0 %v5365_v15  ;;  %4225 = vmatpush1.bf16.msra.mxu1 %v4224_v20  ;;  %v919_v20 = vld [vmem:[#allocation5 + $0x308] sm:$0xff] }
 0x106   : > { %4227 = vmatprep.subr.bf16.mxu1 %v4226_v26  ;;  %v856_v26 = vld [vmem:[#allocation5 + $0x110] sm:$0xff] }
 0x109   : > { %4229 = vmatpush1.bf16.msra.mxu1 %v4228_v31  ;;  %v864_v31 = vld [vmem:[#allocation5 + $0x150] sm:$0xff] }
 0x19c   : > { %v3771_v34 = vpop.f32.mrb[0].mxu0 }
 0x19d   : > { %v3772_v35 = vpop.f32.mrb[1].mxu0 }
 0x19e   : > { %v3773_v37 = vadd.f32 %v3772_v35, %v3771_v34  ;;  %v887_v34 = vld [vmem:[#allocation5 + $0x208] sm:$0xff] }
 0x19f   : > { %v895_v35 = vld [vmem:[#allocation5 + $0x248] sm:$0xff] }
 0x1a0   : > { %v3774_v38 = vpop.f32.mrb[2].mxu0  ;;  %v5374_v39 = vadd.f32 %v3773_v37, %v5371_v36 }
 0x1a1   : > { %v3775_v40 = vpop.f32.mrb[3].mxu0 }
 0x1a2   : > { %v3776_v41 = vadd.f32 %v3775_v40, %v3774_v38  ;;  %v646_v42 = vsel %vm645_vm0, %v5374_v39, -inf  ;;  %v841_v38 = vld [vmem:[#allocation5 + $0x98] sm:$0xff] }
 0x1a3   : > { %647 = vmax.xlane.f32.xlu0 %v646_v42  ;;  %v849_v40 = vld [vmem:[#allocation5 + $0xd8] sm:$0xff]  ;;  %v4230_v42 = vpack.c.bf16 %v895_v35, %v887_v34  ;;  %v926_v34 = vld [vmem:[#allocation5 + $0x340] sm:$0xff]  ;;  %v4256_v35 = vpack.c.bf16 %v864_v31, %v856_v26 }
 0x1a4   : > { %v3777_v43 = vpop.f32.mrb[4].mxu0  ;;  %v5379_v44 = vadd.f32 %v3776_v41, %v5371_v36  ;;  %v840_v41 = vld [vmem:[#allocation5 + $0x90] sm:$0xff]  ;;  %v826_v26 = vld [vmem:[#allocation5 + $0x20] sm:$0xff] }
 0x1a5   : > { %v3778_v45 = vpop.f32.mrb[5].mxu0  ;;  %4231 = vmatprep.subr.bf16.mxu1 %v4230_v42  ;;  %v943_v42 = vld [vmem:[#allocation5 + $0x3c8] sm:$0xff] }
 0x1a6   : > { %v3779_v46 = vadd.f32 %v3778_v45, %v3777_v43  ;;  %v649_v47 = vsel %vm645_vm0, %v5379_v44, -inf }
 0x1a7   : > { %650 = vmax.xlane.f32.xlu0 %v649_v47  ;;  %v848_v47 = vld [vmem:[#allocation5 + $0xd0] sm:$0xff] }
 0x1a8   : > { %v3780_v48 = vpop.f32.mrb[6].mxu0  ;;  %v5384_v50 = vadd.f32 %v3779_v46, %v5371_v36  ;;  %v4250_v46 = vpack.c.bf16 %v849_v40, %v841_v38 }
 0x1a9   : > { %v3781_v52 = vpop.f32.mrb[7].mxu0 }
 0x1aa   : > { %v3782_v54 = vadd.f32 %v3781_v52, %v3780_v48  ;;  %v652_v56 = vsel %vm645_vm0, %v5384_v50, -inf  ;;  %v886_v48 = vld [vmem:[#allocation5 + $0x200] sm:$0xff]  ;;  %4251 = vmatprep.subr.bf16.mxu0 %v4250_v46 }
 0x1ab   : > { %653 = vmax.xlane.f32.xlu1 %v652_v56  ;;  %v894_v52 = vld [vmem:[#allocation5 + $0x240] sm:$0xff] }
 0x1ac   : > { %v3783_v58 = vpop.f32.mrb[8].mxu0  ;;  %v5389_v60 = vadd.f32 %v3782_v54, %v5371_v36  ;;  %v4252_v54 = vpack.c.bf16 %v848_v47, %v840_v41  ;;  %v4232_v56 = vpack.c.bf16 %v894_v52, %v886_v48  ;;  %v935_v41 = vld [vmem:[#allocation5 + $0x388] sm:$0xff]  ;;  %v934_v46 = vld [vmem:[#allocation5 + $0x380] sm:$0xff] }
 0x1ad   : > { %v3784_v62 = vpop.f32.mrb[9].mxu0  ;;  %v942_v47 = vld [vmem:[#allocation5 + $0x3c0] sm:$0xff] }
 0x1ae   : > { %v3785_v0 = vadd.f32 %v3784_v62, %v3783_v58  ;;  %v655_v2 = vsel %vm645_vm0, %v5389_v60, -inf  ;;  %4253 = vmatpush1.bf16.msra.mxu0 %v4252_v54  ;;  %4233 = vmatpush1.bf16.msra.mxu1 %v4232_v56  ;;  %v4244_v54 = vpack.c.bf16 %v942_v47, %v934_v46  ;;  %v896_v46 = vld [vmem:[#allocation5 + $0x250] sm:$0xff] }
 0x1af   : > { %656 = vmax.xlane.f32.xlu1 %v655_v2  ;;  %v911_v2 = vld [vmem:[#allocation5 + $0x2c8] sm:$0xff] }
 0x1b0   : > { %v3786_v4 = vpop.f32.mrb[10].mxu0  ;;  %v5394_v6 = vadd.f32 %v3785_v0, %v5371_v36  ;;  %v903_v0 = vld [vmem:[#allocation5 + $0x288] sm:$0xff] }
 0x1b1   : > { %v3787_v12 = vpop.f32.mrb[11].mxu0  ;;  %v4234_v8 = vpack.c.bf16 %v911_v2, %v903_v0  ;;  %v873_v2 = vld [vmem:[#allocation5 + $0x198] sm:$0xff] }
 0x1b2   : > { %v3788_v18 = vadd.f32 %v3787_v12, %v3786_v4  ;;  %v658_v19 = vsel %vm645_vm0, %v5394_v6, -inf  ;;  %v910_v12 = vld [vmem:[#allocation5 + $0x2c0] sm:$0xff] }
 0x1b3   : > { %659 = vmax.xlane.f32.xlu0 %v658_v19  ;;  %v4236_v17 = vpack.c.bf16 %v910_v12, %v902_v10  ;;  %4235 = vmatprep.subr.bf16.mxu1 %v4234_v8  ;;  %v872_v8 = vld [vmem:[#allocation5 + $0x190] sm:$0xff] }
 0x1b4   : > { %v3789_v21 = vpop.f32.mrb[12].mxu0  ;;  %v5399_v22 = vadd.f32 %v3788_v18, %v5371_v36 }
 0x1b5   : > { %v3790_v25 = vpop.f32.mrb[13].mxu0  ;;  %4237 = vmatpush1.bf16.msra.mxu1 %v4236_v17  ;;  %v6801_v17 = vmov 0.0  }
 0x1b6   : > { %v3791_v29 = vadd.f32 %v3790_v25, %v3789_v21  ;;  %v661_v30 = vsel %vm645_vm0, %v5399_v22, -inf  ;;  %v927_v21 = vld [vmem:[#allocation5 + $0x348] sm:$0xff]  ;;  %v865_v25 = vld [vmem:[#allocation5 + $0x158] sm:$0xff]  ;;  %1056 = vmatprep.mubr.f32.mxu1 %v6801_v17  ;;  %1217 = vmatprep.mubr.f32.mxu0 %v6801_v17 }
 0x1b7   : > { %662 = vmax.xlane.f32.xlu1 %v661_v30  ;;  %v4238_v27 = vpack.c.bf16 %v927_v21, %v919_v20  ;;  %v4254_v30 = vpack.c.bf16 %v865_v25, %v857_v24  ;;  %v827_v24 = vld [vmem:[#allocation5 + $0x28] sm:$0xff] }
 0x1b8   : > { %v3792_v32 = vpop.f32.mrb[14].mxu0  ;;  %v5404_v33 = vadd.f32 %v3791_v29, %v5371_v36  ;;  %v835_v25 = vld [vmem:[#allocation5 + $0x68] sm:$0xff] }
 0x1b9   : > { %v3793_v37 = vpop.f32.mrb[15].mxu0  ;;  %4239 = vmatprep.subr.bf16.mxu1 %v4238_v27  ;;  %4255 = vmatprep.subr.bf16.mxu0 %v4254_v30  ;;  %v834_v30 = vld [vmem:[#allocation5 + $0x60] sm:$0xff] }
 0x1ba   : > { %v3794_v43 = vadd.f32 %v3793_v37, %v3792_v32  ;;  %v664_v45 = vsel %vm645_vm0, %v5404_v33, -inf  ;;  %v918_v32 = vld [vmem:[#allocation5 + $0x300] sm:$0xff]  ;;  %4257 = vmatpush1.bf16.msra.mxu0 %v4256_v35  ;;  %v4280_v31 = vpack.c.bf16 %v834_v30, %v826_v26 }
 0x1bb   : > { %665 = vmax.xlane.f32.xlu0 %v664_v45  ;;  %v4240_v37 = vpack.c.bf16 %v926_v34, %v918_v32  ;;  %v4242_v45 = vpack.c.bf16 %v943_v42, %v935_v41  ;;  %v888_v41 = vld [vmem:[#allocation5 + $0x210] sm:$0xff] }
 0x1bc   : > { %v3795_v58 = vpop.f32.mrb[16].mxu0  ;;  %v5409_v62 = vadd.f32 %v3794_v43, %v5371_v36  ;;  %v4264_v47 = vpack.c.bf16 %v896_v46, %v888_v41  ;;  %v920_v46 = vld [vmem:[#allocation5 + $0x310] sm:$0xff] }
 0x1bd   : > { %v3796_v4 = vpop.f32.mrb[17].mxu0  ;;  %4241 = vmatpush1.bf16.msra.mxu1 %v4240_v37  ;;  %v889_v37 = vld [vmem:[#allocation5 + $0x218] sm:$0xff] }
 0x1be   : > { %v3797_v14 = vadd.f32 %v3796_v4, %v3795_v58  ;;  %v667_v16 = vsel %vm645_vm0, %v5409_v62, -inf  ;;  %4243 = vmatprep.subr.bf16.mxu1 %v4242_v45  ;;  %v881_v4 = vld [vmem:[#allocation5 + $0x1d8] sm:$0xff] }
 0x1bf   : > { %668 = vmax.xlane.f32.xlu1 %v667_v16  ;;  %v880_v16 = vld [vmem:[#allocation5 + $0x1d0] sm:$0xff] }
 0x1c0   : > { %v3798_v18 = vpop.f32.mrb[18].mxu0  ;;  %v5414_v19 = vadd.f32 %v3797_v14, %v5371_v36  ;;  %v4258_v14 = vpack.c.bf16 %v881_v4, %v873_v2  ;;  %v842_v2 = vld [vmem:[#allocation5 + $0xa0] sm:$0xff] }
 0x1c1   : > { %v3799_v23 = vpop.f32.mrb[19].mxu0  ;;  %4245 = vmatpush1.bf16.msra.mxu1 %v4244_v54 }
 0x1c2   : > { %v3800_v28 = vadd.f32 %v3799_v23, %v3798_v18  ;;  %v670_v29 = vsel %vm645_vm0, %v5414_v19, -inf  ;;  %v4260_v18 = vpack.c.bf16 %v880_v16, %v872_v8  ;;  %4259 = vmatprep.subr.bf16.mxu0 %v4258_v14 }
 0x1c3   : > { %671 = vmax.xlane.f32.xlu0 %v670_v29  ;;  %v4278_v29 = vpack.c.bf16 %v835_v25, %v827_v24  ;;  %v913_v24 = vld [vmem:[#allocation5 + $0x2d8] sm:$0xff]  ;;  %v904_v25 = vld [vmem:[#allocation5 + $0x290] sm:$0xff] }
 0x1c4   : > { %v3801_v38 = vpop.f32.mrb[20].mxu0  ;;  %v5419_v40 = vadd.f32 %v3800_v28, %v5371_v36  ;;  %1057 = vmatmul.mubr.f32.vlgmr.msra.gmra.mrb[0].mxu1 %v5290_v49  ;;  %4261 = vmatpush1.bf16.msra.mxu0 %v4260_v18 }
 0x1c5   : > { %v3802_v43 = vpop.f32.mrb[21].mxu0  ;;  %1062 = vmatprep.mubr.f32.mxu1 %v6801_v17  ;;  %4279 = vmatprep.subr.bf16.mxu1 %v4278_v29  ;;  %v912_v29 = vld [vmem:[#allocation5 + $0x2d0] sm:$0xff] }
 0x1c6   : > { %v3803_v48 = vadd.f32 %v3802_v43, %v3801_v38  ;;  %v673_v52 = vsel %vm645_vm0, %v5419_v40, -inf  ;;  %4281 = vmatpush1.bf16.msra.mxu1 %v4280_v31  ;;  %v897_v38 = vld [vmem:[#allocation5 + $0x258] sm:$0xff]  ;;  %v4268_v30 = vpack.c.bf16 %v912_v29, %v904_v25  ;;  %v891_v25 = vld [vmem:[#allocation5 + $0x228] sm:$0xff]  ;;  %v898_v29 = vld [vmem:[#allocation5 + $0x260] sm:$0xff] }
 0x1c7   : > { %674 = vmax.xlane.f32.xlu1 %v673_v52  ;;  %v4262_v45 = vpack.c.bf16 %v897_v38, %v889_v37  ;;  %v858_v37 = vld [vmem:[#allocation5 + $0x120] sm:$0xff] }
 0x1c8   : > { %v3804_v56 = vpop.f32.mrb[22].mxu0  ;;  %v5424_v58 = vadd.f32 %v3803_v48, %v5371_v36  ;;  %1063 = vmatmul.mubr.f32.gmra.mrb[2].mxu1 %v5295_v51 }
 0x1c9   : > { %v3805_v0 = vpop.f32.mrb[23].mxu0  ;;  %1068 = vmatprep.mubr.f32.mxu1 %v6801_v17  ;;  %4263 = vmatprep.subr.bf16.mxu0 %v4262_v45  ;;  %v929_v45 = vld [vmem:[#allocation5 + $0x358] sm:$0xff] }
 0x1ca   : > { %v3806_v10 = vadd.f32 %v3805_v0, %v3804_v56  ;;  %v676_v12 = vsel %vm645_vm0, %v5424_v58, -inf  ;;  %4265 = vmatpush1.bf16.msra.mxu0 %v4264_v47  ;;  %v843_v56 = vld [vmem:[#allocation5 + $0xa8] sm:$0xff] }
 0x1cb   : > { %677 = vmax.xlane.f32.xlu0 %v676_v12  ;;  %v851_v0 = vld [vmem:[#allocation5 + $0xe8] sm:$0xff]  ;;  %v850_v12 = vld [vmem:[#allocation5 + $0xe0] sm:$0xff] }
 0x1cc   : > { %v3807_v20 = vpop.f32.mrb[24].mxu0  ;;  %v5431_v21 = vadd.f32 %v3806_v10, %v5371_v36  ;;  %1069 = vmatmul.mubr.f32.gmra.mrb[4].mxu1 %v5300_v53  ;;  %v4282_v10 = vpack.c.bf16 %v851_v0, %v843_v56  ;;  %v4284_v14 = vpack.c.bf16 %v850_v12, %v842_v2  ;;  %v875_v56 = vld [vmem:[#allocation5 + $0x1a8] sm:$0xff]  ;;  %v874_v2 = vld [vmem:[#allocation5 + $0x1a0] sm:$0xff]  ;;  %v945_v12 = vld [vmem:[#allocation5 + $0x3d8] sm:$0xff] }
 0x1cd   : > { %v3808_v23 = vpop.f32.mrb[25].mxu0  ;;  %1074 = vmatprep.mubr.f32.mxu1 %v6801_v17  ;;  %v883_v0 = vld [vmem:[#allocation5 + $0x1e8] sm:$0xff] }
 0x1ce   : > { %v3809_v27 = vadd.f32 %v3808_v23, %v3807_v20  ;;  %v679_v28 = vsel %vm645_vm0, %v5431_v21, -inf  ;;  %4283 = vmatprep.subr.bf16.mxu1 %v4282_v10  ;;  %v905_v23 = vld [vmem:[#allocation5 + $0x298] sm:$0xff] }
 0x1cf   : > { %680 = vmax.xlane.f32.xlu1 %v679_v28  ;;  %4285 = vmatpush1.bf16.msra.mxu1 %v4284_v14  ;;  %v4266_v28 = vpack.c.bf16 %v913_v24, %v905_v23  ;;  %v937_v10 = vld [vmem:[#allocation5 + $0x398] sm:$0xff]  ;;  %v944_v23 = vld [vmem:[#allocation5 + $0x3d0] sm:$0xff] }
 0x1d0   : > { %v3810_v32 = vpop.f32.mrb[26].mxu0  ;;  %v5438_v34 = vadd.f32 %v3809_v27, %v5371_v36  ;;  %1075 = vmatmul.mubr.f32.gmra.mrb[6].mxu1 %v5305_v55 }
 0x1d1   : > { %v3811_v35 = vpop.f32.mrb[27].mxu0  ;;  %1080 = vmatprep.mubr.f32.mxu1 %v6801_v17  ;;  %4267 = vmatprep.subr.bf16.mxu0 %v4266_v28 }
 0x1d2   : > { %v3812_v42 = vadd.f32 %v3811_v35, %v3810_v32  ;;  %v682_v43 = vsel %vm645_vm0, %v5438_v34, -inf  ;;  %4269 = vmatpush1.bf16.msra.mxu0 %v4268_v30  ;;  %v859_v32 = vld [vmem:[#allocation5 + $0x128] sm:$0xff] }
 0x1d3   : > { %683 = vmax.xlane.f32.xlu0 %v682_v43  ;;  %v867_v35 = vld [vmem:[#allocation5 + $0x168] sm:$0xff] }
 0x1d4   : > { %v3813_v48 = vpop.f32.mrb[28].mxu0  ;;  %v5445_v52 = vadd.f32 %v3812_v42, %v5371_v36  ;;  %1081 = vmatmul.mubr.f32.gmra.mrb[8].mxu1 %v5310_v57  ;;  %v4286_v41 = vpack.c.bf16 %v867_v35, %v859_v32  ;;  %v866_v42 = vld [vmem:[#allocation5 + $0x160] sm:$0xff]  ;;  %v829_v32 = vld [vmem:[#allocation5 + $0x38] sm:$0xff] }
 0x1d5   : > { %v3814_v54 = vpop.f32.mrb[29].mxu0  ;;  %1086 = vmatprep.mubr.f32.mxu1 %v6801_v17  ;;  %v4288_v43 = vpack.c.bf16 %v866_v42, %v858_v37  ;;  %v837_v35 = vld [vmem:[#allocation5 + $0x78] sm:$0xff]  ;;  %v828_v37 = vld [vmem:[#allocation5 + $0x30] sm:$0xff]  ;;  %v907_v42 = vld [vmem:[#allocation5 + $0x2a8] sm:$0xff] }
 0x1d6   : > { %v3815_v4 = vadd.f32 %v3814_v54, %v3813_v48  ;;  %v685_v8 = vsel %vm645_vm0, %v5445_v52, -inf  ;;  %4287 = vmatprep.subr.bf16.mxu1 %v4286_v41  ;;  %v928_v48 = vld [vmem:[#allocation5 + $0x350] sm:$0xff] }
 0x1d7   : > { %686 = vmax.xlane.f32.xlu1 %v685_v8  ;;  %4289 = vmatpush1.bf16.msra.mxu1 %v4288_v43  ;;  %v4272_v54 = vpack.c.bf16 %v928_v48, %v920_v46  ;;  %v882_v8 = vld [vmem:[#allocation5 + $0x1e0] sm:$0xff]  ;;  %v836_v41 = vld [vmem:[#allocation5 + $0x70] sm:$0xff]  ;;  %v915_v43 = vld [vmem:[#allocation5 + $0x2e8] sm:$0xff] }
 0x1d8   : > { %v3816_v16 = vpop.f32.mrb[30].mxu0  ;;  %v5452_v18 = vadd.f32 %v3815_v4, %v5371_v36  ;;  %1087 = vmatmul.mubr.f32.gmra.mrb[10].mxu1 %v5315_v59  ;;  %v4290_v4 = vpack.c.bf16 %v883_v0, %v875_v56  ;;  %v4292_v14 = vpack.c.bf16 %v882_v8, %v874_v2  ;;  %v906_v46 = vld [vmem:[#allocation5 + $0x2a0] sm:$0xff]  ;;  %v845_v48 = vld [vmem:[#allocation5 + $0xb8] sm:$0xff]  ;;  %v844_v2 = vld [vmem:[#allocation5 + $0xb0] sm:$0xff] }
 0x1d9   : > { %v3817_v20 = vpop.f32.mrb[31].mxu0  ;;  %1092 = vmatprep.mubr.f32.mxu1 %v6801_v17  ;;  %v853_v56 = vld [vmem:[#allocation5 + $0xf8] sm:$0xff] }
 0x1da   : > { %v3818_v26 = vadd.f32 %v3817_v20, %v3816_v16  ;;  %v688_v27 = vsel %vm645_vm0, %v5452_v18, -inf  ;;  %v4274_v16 = vpack.c.bf16 %v945_v12, %v937_v10  ;;  %v936_v20 = vld [vmem:[#allocation5 + $0x390] sm:$0xff]  ;;  %4291 = vmatprep.subr.bf16.mxu1 %v4290_v4  ;;  %v5486_v0 = vpack.c.bf16 %v853_v56, %v845_v48  ;;  %v923_v10 = vld [vmem:[#allocation5 + $0x328] sm:$0xff]  ;;  %v901_v56 = vld [vmem:[#allocation5 + $0x278] sm:$0xff] }
 0x1db   : > { %689 = vmax.xlane.f32.xlu0 %v688_v27  ;;  %v4276_v24 = vpack.c.bf16 %v944_v23, %v936_v20  ;;  %4293 = vmatpush1.bf16.msra.mxu1 %v4292_v14  ;;  %v890_v27 = vld [vmem:[#allocation5 + $0x220] sm:$0xff]  ;;  %v852_v4 = vld [vmem:[#allocation5 + $0xf0] sm:$0xff]  ;;  %v931_v12 = vld [vmem:[#allocation5 + $0x368] sm:$0xff] }
 0x1dc   : > { %v5459_v31 = vadd.f32 %v3818_v26, %v5371_v36  ;;  %v921_v36 = vld [vmem:[#allocation5 + $0x318] sm:$0xff]  ;;  %1093 = vmatmul.mubr.f32.gmra.mrb[12].mxu1 %v5320_v61  ;;  %v899_v26 = vld [vmem:[#allocation5 + $0x268] sm:$0xff]  ;;  %v4296_v30 = vpack.c.bf16 %v898_v29, %v890_v27  ;;  %v5489_v8 = vpack.c.bf16 %v852_v4, %v844_v2  ;;  %v922_v14 = vld [vmem:[#allocation5 + $0x320] sm:$0xff] }
 0x1dd   : > { %v4270_v47 = vpack.c.bf16 %v929_v45, %v921_v36  ;;  %1098 = vmatprep.mubr.f32.mxu1 %v6801_v17  ;;  %v4294_v28 = vpack.c.bf16 %v899_v26, %v891_v25  ;;  %v5481_v36 = vpack.c.bf16 %v836_v41, %v828_v37  ;;  %v4298_v45 = vpack.c.bf16 %v915_v43, %v907_v42  ;;  %v930_v20 = vld [vmem:[#allocation5 + $0x360] sm:$0xff]  ;;  %v861_v23 = vld [vmem:[#allocation5 + $0x138] sm:$0xff]  ;;  %v860_v27 = vld [vmem:[#allocation5 + $0x130] sm:$0xff] }
 0x1de   : > { %v691_v38 = vsel %vm645_vm0, %v5459_v31, -inf  ;;  %v4304_v25 = vpack.c.bf16 %v930_v20, %v922_v14  ;;  %v939_v29 = vld [vmem:[#allocation5 + $0x3a8] sm:$0xff]  ;;  %v946_v37 = vld [vmem:[#allocation5 + $0x3e0] sm:$0xff]  ;;  %v877_v43 = vld [vmem:[#allocation5 + $0x1b8] sm:$0xff] }
 0x1df   : > { %692 = vmax.xlane.f32.xlu1 %v691_v38  ;;  %4271 = vmatprep.subr.bf16.mxu0 %v4270_v47  ;;  %v5477_v38 = vpack.c.bf16 %v837_v35, %v829_v32  ;;  %v914_v47 = vld [vmem:[#allocation5 + $0x2e0] sm:$0xff]  ;;  %v947_v32 = vld [vmem:[#allocation5 + $0x3e8] sm:$0xff]  ;;  %v884_v48 = vld [vmem:[#allocation5 + $0x1f0] sm:$0xff] }
 0x1e0   : > { %4273 = vmatpush1.bf16.msra.mxu0 %v4272_v54  ;;  %1099 = vmatmul.mubr.f32.gmra.mrb[14].mxu1 %v5325_v63  ;;  %v4300_v54 = vpack.c.bf16 %v914_v47, %v906_v46  ;;  %v938_v35 = vld [vmem:[#allocation5 + $0x3a0] sm:$0xff]  ;;  %v4306_v41 = vpack.c.bf16 %v947_v32, %v939_v29  ;;  %v876_v46 = vld [vmem:[#allocation5 + $0x1b0] sm:$0xff]  ;;  %v909_v14 = vld [vmem:[#allocation5 + $0x2b8] sm:$0xff] }
 0x1e1   : > { %4275 = vmatprep.subr.bf16.mxu0 %v4274_v16  ;;  %1104 = vmatprep.mubr.f32.mxu1 %v6801_v17  ;;  %v4302_v16 = vpack.c.bf16 %v931_v12, %v923_v10  ;;  %v4308_v42 = vpack.c.bf16 %v946_v37, %v938_v35  ;;  %v5513_v2 = vpack.c.bf16 %v884_v48, %v876_v46  ;;  %v892_v4 = vld [vmem:[#allocation5 + $0x230] sm:$0xff]  ;;  %v933_v29 = vld [vmem:[#allocation5 + $0x378] sm:$0xff] }
 0x1e2   : > { %4295 = vmatprep.subr.bf16.mxu1 %v4294_v28  ;;  %v868_v28 = vld [vmem:[#allocation5 + $0x170] sm:$0xff] }
 0x1e3   : > { %4297 = vmatpush1.bf16.msra.mxu1 %v4296_v30  ;;  %v5505_v30 = vpack.c.bf16 %v868_v28, %v860_v27  ;;  %v900_v10 = vld [vmem:[#allocation5 + $0x270] sm:$0xff]  ;;  %v925_v28 = vld [vmem:[#allocation5 + $0x338] sm:$0xff] }
 0x1e4   : > { %4277 = vmatpush1.bf16.msra.mxu0 %v4276_v24  ;;  %1105 = vmatmul.mubr.f32.gmra.mrb[16].mxu1 %v5330_v1  ;;  %v869_v24 = vld [vmem:[#allocation5 + $0x178] sm:$0xff]  ;;  %v4328_v20 = vpack.c.bf16 %v900_v10, %v892_v4  ;;  %v924_v32 = vld [vmem:[#allocation5 + $0x330] sm:$0xff]  ;;  %v4334_v35 = vpack.c.bf16 %v933_v29, %v925_v28 }
 0x1e5   : > { %1110 = vmatprep.mubr.f32.mxu1 %v6801_v17  ;;  %4311 = vmatprep.subr.bf16.mxu0 %v5477_v38  ;;  %v5499_v26 = vpack.c.bf16 %v869_v24, %v861_v23  ;;  %v908_v24 = vld [vmem:[#allocation5 + $0x2b0] sm:$0xff] }
 0x1e6   : > { %4299 = vmatprep.subr.bf16.mxu1 %v4298_v45  ;;  %v885_v45 = vld [vmem:[#allocation5 + $0x1f8] sm:$0xff] }
 0x1e7   : > { %1218 = vmatmul.mubr.f32.vlgmr.msra.gmra.mrb[32].mxu0 %v5290_v49  ;;  %4301 = vmatpush1.bf16.msra.mxu1 %v4300_v54  ;;  %v5510_v47 = vpack.c.bf16 %v885_v45, %v877_v43  ;;  %v893_v54 = vld [vmem:[#allocation5 + $0x238] sm:$0xff]  ;;  %v940_v43 = vld [vmem:[#allocation5 + $0x3b0] sm:$0xff] }
 0x1e8   : > { %1223 = vmatprep.mubr.f32.mxu0 %v6801_v17  ;;  %1111 = vmatmul.mubr.f32.gmra.mrb[18].mxu1 %v5335_v3  ;;  %v5516_v12 = vpack.c.bf16 %v901_v56, %v893_v54  ;;  %v948_v45 = vld [vmem:[#allocation5 + $0x3f0] sm:$0xff] }
 0x1e9   : > { %1116 = vmatprep.mubr.f32.mxu1 %v6801_v17  ;;  %4313 = vmatpush1.bf16.msra.mxu0 %v5481_v36 }
 0x1ea   : > { %4315 = vmatprep.subr.bf16.mxu0 %v5486_v0  ;;  %4303 = vmatprep.subr.bf16.mxu1 %v4302_v16  ;;  %v917_v16 = vld [vmem:[#allocation5 + $0x2f8] sm:$0xff] }
 0x1eb   : > { %1224 = vmatmul.mubr.f32.gmra.mrb[34].mxu0 %v5295_v51  ;;  %4305 = vmatpush1.bf16.msra.mxu1 %v4304_v25  ;;  %v4330_v23 = vpack.c.bf16 %v917_v16, %v909_v14  ;;  %v916_v25 = vld [vmem:[#allocation5 + $0x2f0] sm:$0xff] }
 0x1ec   : > { %1229 = vmatprep.mubr.f32.mxu0 %v6801_v17  ;;  %1117 = vmatmul.mubr.f32.gmra.mrb[20].mxu1 %v5340_v5  ;;  %v4332_v27 = vpack.c.bf16 %v916_v25, %v908_v24  ;;  %v4656_v24 = vld [vmem:[%s5287_s21 + $0x78] sm:$0xff] }
 0x1ed   : > { %1122 = vmatprep.mubr.f32.mxu1 %v6801_v17  ;;  %4317 = vmatpush1.bf16.msra.mxu0 %v5489_v8  ;;  %v4657_v25 = vld [vmem:[%s5287_s21 + $0x38] sm:$0xff] }
 0x1ee   : > { %4319 = vmatprep.subr.bf16.mxu0 %v5499_v26  ;;  %4307 = vmatprep.subr.bf16.mxu1 %v4306_v41  ;;  %v941_v41 = vld [vmem:[#allocation5 + $0x3b8] sm:$0xff] }
 0x1ef   : > { %1230 = vmatmul.mubr.f32.gmra.mrb[36].mxu0 %v5300_v53  ;;  %4309 = vmatpush1.bf16.msra.mxu1 %v4308_v42  ;;  %v949_v42 = vld [vmem:[#allocation5 + $0x3f8] sm:$0xff] }
 0x1f0   : > { %1123 = vmatmul.mubr.f32.gmra.mrb[22].mxu1 %v5345_v7  ;;  %1235 = vmatprep.mubr.f32.mxu0 %v6801_v17  ;;  %v4338_v46 = vpack.c.bf16 %v949_v42, %v941_v41 }
 0x1f1   : > { %1128 = vmatprep.mubr.f32.mxu1 %v6801_v17  ;;  %4321 = vmatpush1.bf16.msra.mxu0 %v5505_v30 }
 0x1f2   : > { %4323 = vmatprep.subr.bf16.mxu0 %v5510_v47  ;;  %4470 = vmatprep.subr.bf16.mxu1 %v5477_v38  ;;  %v932_v38 = vld [vmem:[#allocation5 + $0x370] sm:$0xff] }
 0x1f3   : > { %1236 = vmatmul.mubr.f32.gmra.mrb[38].mxu0 %v5305_v55  ;;  %v4336_v37 = vpack.c.bf16 %v932_v38, %v924_v32  ;;  %v4658_v38 = vld [vmem:[%s5287_s21 + $0x60] sm:$0xff] }
 0x1f4   : > { %1241 = vmatprep.mubr.f32.mxu0 %v6801_v17  ;;  %1129 = vmatmul.mubr.f32.gmra.mrb[24].mxu1 %v5350_v9 }
 0x1f5   : > { %1134 = vmatprep.mubr.f32.mxu1 %v6801_v17  ;;  %4325 = vmatpush1.bf16.msra.mxu0 %v5513_v2 }
 0x1f6   : > { %4327 = vmatprep.subr.bf16.mxu0 %v5516_v12 }
 0x1f7   : > { %1242 = vmatmul.mubr.f32.gmra.mrb[40].mxu0 %v5310_v57 }
 0x1f8   : > { %1247 = vmatprep.mubr.f32.mxu0 %v6801_v17  ;;  %1135 = vmatmul.mubr.f32.gmra.mrb[26].mxu1 %v5355_v11 }
 0x1f9   : > { %1140 = vmatprep.mubr.f32.mxu1 %v6801_v17  ;;  %4329 = vmatpush1.bf16.msra.mxu0 %v4328_v20 }
 0x1fa   : > { %4331 = vmatprep.subr.bf16.mxu0 %v4330_v23 }
 0x1fb   : > { %1248 = vmatmul.mubr.f32.gmra.mrb[42].mxu0 %v5315_v59 }
 0x1fc   : > { %1253 = vmatprep.mubr.f32.mxu0 %v6801_v17  ;;  %1141 = vmatmul.mubr.f32.gmra.mrb[28].mxu1 %v5360_v13 }
 0x1fd   : > { %1146 = vmatprep.mubr.f32.mxu1 %v6801_v17  ;;  %4333 = vmatpush1.bf16.msra.mxu0 %v4332_v27 }
 0x1fe   : > { %4335 = vmatprep.subr.bf16.mxu0 %v4334_v35 }
 0x1ff   : > { %1254 = vmatmul.mubr.f32.gmra.mrb[44].mxu0 %v5320_v61 }
 0x200   : > { %1259 = vmatprep.mubr.f32.mxu0 %v6801_v17  ;;  %1147 = vmatmul.mubr.f32.gmra.mrb[30].mxu1 %v5365_v15 }
 0x201   : > { %1378 = vmatprep.mubr.f32.mxu1 %v6801_v17  ;;  %4337 = vmatpush1.bf16.msra.mxu0 %v4336_v37 }
 0x202   : > { %4339 = vmatprep.subr.bf16.mxu0 %v4338_v46 }
 0x203   : > { %1260 = vmatmul.mubr.f32.gmra.mrb[46].mxu0 %v5325_v63 }
 0x204   : > { %1265 = vmatprep.mubr.f32.mxu0 %v6801_v17  ;;  %1379 = vmatmul.mubr.f32.vlgmr.msra.gmra.mrb[32].mxu1 %v5290_v49  ;;  %v4340_v49 = vpack.c.bf16 %v948_v45, %v940_v43  ;;  %v4660_v45 = vld [vmem:[%s5287_s21 + $0x68] sm:$0xff] }
 0x205   : > { %4478 = vmatpush1.bf16.msra.mxu1 %v5481_v36  ;;  %1384 = vmatprep.mubr.f32.mxu1 %v6801_v17  ;;  %v1765_v36 = vld [vmem:[%s6794_s8 + $0x8] sm:$0xff] }
 0x206   : > { %4471 = vmatprep.subr.bf16.mxu1 %v5486_v0  ;;  %v1773_v0 = vcombine.high %v1765_v36, %v1765_v36  ;;  %4341 = vmatpush1.bf16.msra.mxu0 %v4340_v49 }
 0x207   : > { %1266 = vmatmul.mubr.f32.gmra.mrb[48].mxu0 %v5330_v1 }
 0x208   : > { %1271 = vmatprep.mubr.f32.mxu0 %v6801_v17  ;;  %1385 = vmatmul.mubr.f32.gmra.mrb[34].mxu1 %v5295_v51  ;;  %v5570_v51 = vld [vmem:[%s6794_s8] sm:$0xff] }
 0x209   : > { %1390 = vmatprep.mubr.f32.mxu1 %v6801_v17  ;;  %4479 = vmatpush1.bf16.msra.mxu1 %v5489_v8 }
 0x20a   : > { %4472 = vmatprep.subr.bf16.mxu1 %v5499_v26  ;;  %3661 = vmatprep.subr.msk.mxu0 %vm1824_vm1, %v1773_v0 }
 0x20b   : > { %1272 = vmatmul.mubr.f32.gmra.mrb[50].mxu0 %v5335_v3 }
 0x20c   : > { %1277 = vmatprep.mubr.f32.mxu0 %v6801_v17  ;;  %1391 = vmatmul.mubr.f32.gmra.mrb[36].mxu1 %v5300_v53  ;;  %v1772_v53 = vcombine.high %v5570_v51, %v5570_v51 }
 0x20d   : > { %1396 = vmatprep.mubr.f32.mxu1 %v6801_v17  ;;  %4480 = vmatpush1.bf16.msra.mxu1 %v5505_v30 }
 0x20e   : > { %4473 = vmatprep.subr.bf16.mxu1 %v5510_v47 }
 0x20f   : > { %1278 = vmatmul.mubr.f32.gmra.mrb[52].mxu0 %v5340_v5 }
 0x210   : > { %1283 = vmatprep.mubr.f32.mxu0 %v6801_v17  ;;  %1397 = vmatmul.mubr.f32.gmra.mrb[38].mxu1 %v5305_v55  ;;  %v4648_v55 = vld [vmem:[%s5287_s21] sm:$0xff] }
 0x211   : > { %1402 = vmatprep.mubr.f32.mxu1 %v6801_v17  ;;  %4481 = vmatpush1.bf16.msra.mxu1 %v5513_v2 }
 0x212   : > { %4474 = vmatprep.subr.bf16.mxu1 %v5516_v12  ;;  %v4655_v12 = vld [vmem:[%s5287_s21 + $0x30] sm:$0xff] }
 0x213   : > { %1284 = vmatmul.mubr.f32.gmra.mrb[54].mxu0 %v5345_v7 }
 0x214   : > { %1289 = vmatprep.mubr.f32.mxu0 %v6801_v17  ;;  %1403 = vmatmul.mubr.f32.gmra.mrb[40].mxu1 %v5310_v57 }
 0x215   : > { %1408 = vmatprep.mubr.f32.mxu1 %v6801_v17  ;;  %4482 = vmatpush1.bf16.msra.mxu1 %v4328_v20 }
 0x216   : > { %4475 = vmatprep.subr.bf16.mxu1 %v4330_v23 }
 0x217   : > { %1290 = vmatmul.mubr.f32.gmra.mrb[56].mxu0 %v5350_v9 }
 0x218   : > { %1295 = vmatprep.mubr.f32.mxu0 %v6801_v17  ;;  %1409 = vmatmul.mubr.f32.gmra.mrb[42].mxu1 %v5315_v59 }
 0x219   : > { %1414 = vmatprep.mubr.f32.mxu1 %v6801_v17  ;;  %4483 = vmatpush1.bf16.msra.mxu1 %v4332_v27 }
 0x21a   : > { %4476 = vmatprep.subr.bf16.mxu1 %v4334_v35  ;;  %v4659_v35 = vld [vmem:[%s5287_s21 + $0x40] sm:$0xff] }
 0x21b   : > { %1296 = vmatmul.mubr.f32.gmra.mrb[58].mxu0 %v5355_v11 }
 0x21c   : > { %1301 = vmatprep.mubr.f32.mxu0 %v6801_v17  ;;  %1415 = vmatmul.mubr.f32.gmra.mrb[44].mxu1 %v5320_v61  ;;  %v4649_v61 = vld [vmem:[%s5287_s21 + $0x8] sm:$0xff] }
 0x21d   : > { %1420 = vmatprep.mubr.f32.mxu1 %v6801_v17  ;;  %4484 = vmatpush1.bf16.msra.mxu1 %v4336_v37 }
 0x21e   : > { %4477 = vmatprep.subr.bf16.mxu1 %v4338_v46  ;;  %v4661_v46 = vld [vmem:[%s5287_s21 + $0x48] sm:$0xff] }
 0x21f   : > { %1302 = vmatmul.mubr.f32.gmra.mrb[60].mxu0 %v5360_v13 }
 0x220   : > { %1307 = vmatprep.mubr.f32.mxu0 %v6801_v17  ;;  %1421 = vmatmul.mubr.f32.gmra.mrb[46].mxu1 %v5325_v63 }
 0x221   : > { %1426 = vmatprep.mubr.f32.mxu1 %v6801_v17  ;;  %4485 = vmatpush1.bf16.msra.mxu1 %v4340_v49 }
 0x222   : > { %3643 = vmatprep.subr.msk.mxu1 %vm1824_vm1, %v1772_v53 }
 0x223   : > { %1308 = vmatmul.mubr.f32.gmra.mrb[62].mxu0 %v5365_v15  ;;  %v4650_v15 = vld [vmem:[%s5287_s21 + $0x10] sm:$0xff] }
 0x224   : > { %1539 = vmatprep.mubr.f32.mxu0 %v6801_v17  ;;  %1427 = vmatmul.mubr.f32.gmra.mrb[48].mxu1 %v5330_v1 }
 0x225   : > { %1432 = vmatprep.mubr.f32.mxu1 %v6801_v17 }
 0x227   : > { %1540 = vmatmul.mubr.f32.vlgmr.msra.gmra.mrb[64].mxu0 %v4648_v55 }
 0x228   : > { %3662 = vmatpush1.msk.msra.mxu0 %vm1824_vm1, %v1765_v36  ;;  %1545 = vmatprep.mubr.f32.mxu0 %v6801_v17 }
 0x229   : > { %1433 = vmatmul.mubr.f32.gmra.mrb[50].mxu1 %v5335_v3 }
 0x22a   : > { %1438 = vmatprep.mubr.f32.mxu1 %v6801_v17 }
 0x22b   : > { %1546 = vmatmul.mubr.f32.gmra.mrb[66].mxu0 %v4649_v61 }
 0x22c   : > { %1551 = vmatprep.mubr.f32.mxu0 %v6801_v17 }
 0x22d   : > { %1439 = vmatmul.mubr.f32.gmra.mrb[52].mxu1 %v5340_v5  ;;  %v4651_v5 = vld [vmem:[%s5287_s21 + $0x18] sm:$0xff] }
 0x22e   : > { %1444 = vmatprep.mubr.f32.mxu1 %v6801_v17 }
 0x22f   : > { %1552 = vmatmul.mubr.f32.gmra.mrb[68].mxu0 %v4650_v15 }
 0x230   : > { %v648_v57 = vpop.xlane.xlu0 %647  ;;  %1557 = vmatprep.mubr.f32.mxu0 %v6801_v17 }
 0x231   : > { %v694_v59 = vsub.f32 %v5374_v39, %v648_v57  ;;  %1445 = vmatmul.mubr.f32.gmra.mrb[54].mxu1 %v5345_v7  ;;  %v4652_v7 = vld [vmem:[%s5287_s21 + $0x20] sm:$0xff] }
 0x232   : > { %1450 = vmatprep.mubr.f32.mxu1 %v6801_v17 }
 0x233   : > { %v710_v63 = vmul.f32 1.442695, %v694_v59  ;;  %1558 = vmatmul.mubr.f32.gmra.mrb[70].mxu0 %v4651_v5 }
 0x234   : > { %v651_v1 = vpop.xlane.xlu0 %650  ;;  %1563 = vmatprep.mubr.f32.mxu0 %v6801_v17 }
 0x235   : > { %4584 = vpow2.f32 %v710_v63  ;;  %v695_v13 = vsub.f32 %v5379_v44, %v651_v1  ;;  %1451 = vmatmul.mubr.f32.gmra.mrb[56].mxu1 %v5350_v9 }
 0x236   : > { %1456 = vmatprep.mubr.f32.mxu1 %v6801_v17 }
 0x237   : > { %v712_v3 = vmul.f32 1.442695, %v695_v13  ;;  %1564 = vmatmul.mubr.f32.gmra.mrb[72].mxu0 %v4652_v7 }
 0x238   : > { %v654_v39 = vpop.xlane.xlu1 %653  ;;  %1569 = vmatprep.mubr.f32.mxu0 %v6801_v17 }
 0x239   : > { %4586 = vpow2.f32 %v712_v3  ;;  %v696_v8 = vsub.f32 %v5384_v50, %v654_v39  ;;  %1457 = vmatmul.mubr.f32.gmra.mrb[58].mxu1 %v5355_v11  ;;  %v4654_v11 = vld [vmem:[%s5287_s21 + $0x70] sm:$0xff] }
 0x23a   : > { %1462 = vmatprep.mubr.f32.mxu1 %v6801_v17 }
 0x23b   : > { %v714_v26 = vmul.f32 1.442695, %v696_v8 }
 0x23c   : > { %v657_v44 = vpop.xlane.xlu1 %656 }
 0x23d   : > { %4588 = vpow2.f32 %v714_v26  ;;  %v697_v30 = vsub.f32 %v5389_v60, %v657_v44  ;;  %v4653_v60 = vld [vmem:[%s5287_s21 + $0x28] sm:$0xff]  ;;  %1463 = vmatmul.mubr.f32.gmra.mrb[60].mxu1 %v4654_v11 }
 0x23e   : > { %1570 = vmatmul.mubr.f32.gmra.mrb[74].mxu0 %v4653_v60  ;;  %1468 = vmatprep.mubr.f32.mxu1 %v6801_v17 }
 0x23f   : > { %v5607_v47 = vpop.eup %4584  ;;  %v716_v50 = vmul.f32 1.442695, %v697_v30  ;;  %1575 = vmatprep.mubr.f32.mxu0 %v6801_v17 }
 0x240   : > { %v660_v48 = vpop.xlane.xlu0 %659  ;;  %v742_v54 = vsel %vm645_vm0, %v5607_v47, 0.0 }
 0x241   : > { %4590 = vpow2.f32 %v716_v50  ;;  %v698_v9 = vsub.f32 %v5394_v6, %v660_v48  ;;  %743 = vadd.xlane.f32.xlu0 %v742_v54  ;;  %1469 = vmatmul.mubr.f32.gmra.mrb[62].mxu1 %v4656_v24  ;;  %v5689_v54 = vld [vmem:[%s6794_s8 + $0x10] sm:$0xff] }
 0x242   : > { %1576 = vmatmul.mubr.f32.gmra.mrb[76].mxu0 %v4655_v12  ;;  %1611 = vmatprep.mubr.f32.mxu1 %v6801_v17 }
 0x243   : > { %v5616_v56 = vpop.eup %4586  ;;  %v718_v2 = vmul.f32 1.442695, %v698_v9  ;;  %1581 = vmatprep.mubr.f32.mxu0 %v6801_v17 }
 0x244   : > { %v663_v4 = vpop.xlane.xlu1 %662  ;;  %v745_v10 = vsel %vm645_vm0, %v5616_v56, 0.0 }
 0x245   : > { %4592 = vpow2.f32 %v718_v2  ;;  %v699_v6 = vsub.f32 %v5399_v22, %v663_v4  ;;  %746 = vadd.xlane.f32.xlu1 %v745_v10  ;;  %1612 = vmatmul.mubr.f32.vlgmr.msra.gmra.mrb[64].mxu1 %v4658_v38  ;;  %v1774_v2 = vcombine.high %v5689_v54, %v5689_v54 }
 0x246   : > { %1582 = vmatmul.mubr.f32.gmra.mrb[78].mxu0 %v4657_v25  ;;  %3644 = vmatpush1.msk.msra.mxu1 %vm1824_vm1, %v5570_v51 }
 0x247   : > { %v5625_v14 = vpop.eup %4588  ;;  %v720_v16 = vmul.f32 1.442695, %v699_v6  ;;  %1587 = vmatprep.mubr.f32.mxu0 %v6801_v17  ;;  %1617 = vmatprep.mubr.f32.mxu1 %v6801_v17 }
 0x248   : > { %v666_v20 = vpop.xlane.xlu0 %665  ;;  %v748_v23 = vsel %vm645_vm0, %v5625_v14, 0.0  ;;  %3679 = vmatprep.subr.msk.mxu1 %vm1824_vm1, %v1774_v2 }
 0x249   : > { %4594 = vpow2.f32 %v720_v16  ;;  %v700_v22 = vsub.f32 %v5404_v33, %v666_v20  ;;  %749 = vadd.xlane.f32.xlu0 %v748_v23  ;;  %1618 = vmatmul.mubr.f32.gmra.mrb[66].mxu1 %v4660_v45 }
 0x24a   : > { %1588 = vmatmul.mubr.f32.gmra.mrb[80].mxu0 %v4659_v35  ;;  %1623 = vmatprep.mubr.f32.mxu1 %v6801_v17 }
 0x24b   : > { %v5634_v27 = vpop.eup %4590  ;;  %v722_v28 = vmul.f32 1.442695, %v700_v22  ;;  %1593 = vmatprep.mubr.f32.mxu0 %v6801_v17 }
 0x24c   : > { %v669_v29 = vpop.xlane.xlu1 %668  ;;  %v751_v32 = vsel %vm645_vm0, %v5634_v27, 0.0 }
 0x24d   : > { %4596 = vpow2.f32 %v722_v28  ;;  %v701_v33 = vsub.f32 %v5409_v62, %v669_v29  ;;  %752 = vadd.xlane.f32.xlu1 %v751_v32  ;;  %1624 = vmatmul.mubr.f32.gmra.mrb[68].mxu1 %v4654_v11 }
 0x24e   : > { %1594 = vmatmul.mubr.f32.gmra.mrb[82].mxu0 %v4661_v46  ;;  %1629 = vmatprep.mubr.f32.mxu1 %v6801_v17 }
 0x24f   : > { %v5645_v37 = vpop.eup %4592  ;;  %v724_v41 = vmul.f32 1.442695, %v701_v33  ;;  %1599 = vmatprep.mubr.f32.mxu0 %v6801_v17 }
 0x250   : > { %v672_v42 = vpop.xlane.xlu0 %671  ;;  %v754_v43 = vsel %vm645_vm0, %v5645_v37, 0.0 }
 0x251   : > { %4598 = vpow2.f32 %v724_v41  ;;  %v702_v62 = vsub.f32 %v5414_v19, %v672_v42  ;;  %755 = vadd.xlane.f32.xlu0 %v754_v43  ;;  %v4662_v19 = vld [vmem:[%s5287_s21 + $0x50] sm:$0xff]  ;;  %1630 = vmatmul.mubr.f32.gmra.mrb[70].mxu1 %v4656_v24 }
 0x252   : > { %1600 = vmatmul.mubr.f32.gmra.mrb[84].mxu0 %v4662_v19  ;;  %1905 = vmatprep.mubr.f32.mxu1 %v6801_v17 }
 0x253   : > { %v5654_v49 = vpop.eup %4594  ;;  %v726_v36 = vmul.f32 1.442695, %v702_v62  ;;  %1605 = vmatprep.mubr.f32.mxu0 %v6801_v17 }
 0x254   : > { %v675_v0 = vpop.xlane.xlu1 %674  ;;  %v757_v51 = vsel %vm645_vm0, %v5654_v49, 0.0 }
 0x255   : > { %4600 = vpow2.f32 %v726_v36  ;;  %v703_v53 = vsub.f32 %v5419_v40, %v675_v0  ;;  %758 = vadd.xlane.f32.xlu1 %v757_v51  ;;  %v4663_v40 = vld [vmem:[%s5287_s21 + $0x58] sm:$0xff] }
 0x256   : > { %1606 = vmatmul.mubr.f32.gmra.mrb[86].mxu0 %v4663_v40 }
 0x257   : > { %v5662_v55 = vpop.eup %4596  ;;  %v728_v57 = vmul.f32 1.442695, %v703_v53  ;;  %2066 = vmatprep.mubr.f32.mxu0 %v6801_v17 }
 0x258   : > { %v678_v59 = vpop.xlane.xlu0 %677  ;;  %v760_v61 = vsel %vm645_vm0, %v5662_v55, 0.0 }
 0x259   : > { %4602 = vpow2.f32 %v728_v57  ;;  %v704_v63 = vsub.f32 %v5424_v58, %v678_v59  ;;  %761 = vadd.xlane.f32.xlu0 %v760_v61 }
 0x25b   : > { %v5670_v1 = vpop.eup %4598  ;;  %v730_v13 = vmul.f32 1.442695, %v704_v63 }
 0x25c   : > { %v681_v15 = vpop.xlane.xlu1 %680  ;;  %v763_v3 = vsel %vm645_vm0, %v5670_v1, 0.0 }
 0x25d   : > { %4604 = vpow2.f32 %v730_v13  ;;  %v705_v39 = vsub.f32 %v5431_v21, %v681_v15  ;;  %764 = vadd.xlane.f32.xlu1 %v763_v3 }
 0x25f   : > { %v5676_v8 = vpop.eup %4600  ;;  %v732_v58 = vmul.f32 1.442695, %v705_v39 }
 0x260   : > { %v684_v5 = vpop.xlane.xlu0 %683  ;;  %v766_v26 = vsel %vm645_vm0, %v5676_v8, 0.0 }
 0x261   : > { %4606 = vpow2.f32 %v732_v58  ;;  %v706_v44 = vsub.f32 %v5438_v34, %v684_v5  ;;  %767 = vadd.xlane.f32.xlu0 %v766_v26  ;;  %v5694_v34 = vld [vmem:[%s6794_s8 + $0x18] sm:$0xff] }
 0x263   : > { %v5681_v30 = vpop.eup %4602  ;;  %v734_v7 = vmul.f32 1.442695, %v706_v44 }
 0x264   : > { %v687_v50 = vpop.xlane.xlu1 %686  ;;  %v769_v48 = vsel %vm645_vm0, %v5681_v30, 0.0 }
 0x265   : > { %4608 = vpow2.f32 %v734_v7  ;;  %v707_v21 = vsub.f32 %v5445_v52, %v687_v50  ;;  %770 = vadd.xlane.f32.xlu1 %v769_v48  ;;  %v1775_v52 = vcombine.high %v5694_v34, %v5694_v34 }
 0x267   : > { %v5696_v9 = vpop.eup %4604  ;;  %v736_v60 = vmul.f32 1.442695, %v707_v21  ;;  %3697 = vmatprep.subr.msk.mxu0 %vm1824_vm1, %v1775_v52 }
 0x268   : > { %v690_v4 = vpop.xlane.xlu0 %689  ;;  %v772_v10 = vsel %vm645_vm0, %v5696_v9, 0.0 }
 0x269   : > { %4610 = vpow2.f32 %v736_v60  ;;  %v708_v11 = vsub.f32 %v5452_v18, %v690_v4  ;;  %773 = vadd.xlane.f32.xlu0 %v772_v10 }
 0x26b   : > { %v5707_v6 = vpop.eup %4606  ;;  %v738_v12 = vmul.f32 1.442695, %v708_v11 }
 0x26c   : > { %v693_v16 = vpop.xlane.xlu1 %692  ;;  %v775_v20 = vsel %vm645_vm0, %v5707_v6, 0.0 }
 0x26d   : > { %4612 = vpow2.f32 %v738_v12  ;;  %v709_v23 = vsub.f32 %v5459_v31, %v693_v16  ;;  %776 = vadd.xlane.f32.xlu1 %v775_v20 }
 0x26f   : > { %v5712_v24 = vpop.eup %4608  ;;  %v740_v22 = vmul.f32 1.442695, %v709_v23 }
 0x270   : > { %v778_v18 = vsel %vm645_vm0, %v5712_v24, 0.0 }
 0x271   : > { %4614 = vpow2.f32 %v740_v22  ;;  %779 = vadd.xlane.f32.xlu0 %v778_v18 }
 0x273   : > { %v5716_v25 = vpop.eup %4610 }
 0x274   : > { %v781_v28 = vsel %vm645_vm0, %v5716_v25, 0.0 }
 0x275   : > { %782 = vadd.xlane.f32.xlu1 %v781_v28 }
 0x277   : > { %v5720_v29 = vpop.eup %4612 }
 0x278   : > { %v784_v31 = vsel %vm645_vm0, %v5720_v29, 0.0 }
 0x279   : > { %785 = vadd.xlane.f32.xlu0 %v784_v31 }
 0x27b   : > { %v5724_v32 = vpop.eup %4614 }
 0x27c   : > { %v787_v38 = vsel %vm645_vm0, %v5724_v32, 0.0 }
 0x27d   : > { %788 = vadd.xlane.f32.xlu1 %v787_v38 }
 0x297   : > { %v5728_v33 = vpop.f32.mrb[0].mxu1 }
 0x298   : > { %v5730_v35 = vpop.f32.mrb[1].mxu1 }
 0x29b   : > { %v5732_v41 = vpop.f32.mrb[2].mxu1 }
 0x29c   : > { %v5734_v42 = vpop.f32.mrb[3].mxu1 }
 0x29f   : > { %v5736_v43 = vpop.f32.mrb[4].mxu1 }
 0x2a0   : > { %v5738_v45 = vpop.f32.mrb[5].mxu1 }
 0x2a3   : > { %v5740_v62 = vpop.f32.mrb[6].mxu1 }
 0x2a4   : > { %v5742_v46 = vpop.f32.mrb[7].mxu1 }
 0x2a7   : > { %v5744_v36 = vpop.f32.mrb[8].mxu1 }
 0x2a8   : > { %v5746_v0 = vpop.f32.mrb[9].mxu1 }
 0x2ab   : > { %v5748_v51 = vpop.f32.mrb[10].mxu1 }
 0x2ac   : > { %v5750_v53 = vpop.f32.mrb[11].mxu1 }
 0x2af   : > { %v5752_v19 = vpop.f32.mrb[12].mxu1 }
 0x2b0   : > { %v5754_v57 = vpop.f32.mrb[13].mxu1 }
 0x2b3   : > { %v5756_v59 = vpop.f32.mrb[14].mxu1 }
 0x2b4   : > { %v5758_v61 = vpop.f32.mrb[15].mxu1 }
 0x2b5   : > { %6821 = vst [vmem:[#allocation18_spill] sm:$0xff] %v5758_v61  ;;  %v2666_v61 = vld [vmem:[#allocation8 + $0x1a8] sm:$0xff] }
 0x2b7   : > { %v5760_v63 = vpop.f32.mrb[16].mxu1 }
 0x2b8   : > { %6822 = vst [vmem:[#allocation19_spill] sm:$0xff] %v5760_v63  ;;  %v5762_v40 = vpop.f32.mrb[17].mxu1 }
 0x2b9   : > { %6823 = vst [vmem:[#allocation20_spill] sm:$0xff] %v5762_v40  ;;  %v2647_v40 = vld [vmem:[#allocation8 + $0x110] sm:$0xff] }
 0x2ba   : > { %v5764_v13 = vpop.f32.mrb[32].mxu0 }
 0x2bb   : > { %v5766_v15 = vpop.f32.mrb[33].mxu0  ;;  %v5768_v3 = vpop.f32.mrb[18].mxu1 }
 0x2bc   : > { %6824 = vst [vmem:[#allocation21_spill] sm:$0xff] %v5768_v3  ;;  %v5770_v39 = vpop.f32.mrb[19].mxu1 }
 0x2bd   : > { %6825 = vst [vmem:[#allocation22_spill] sm:$0xff] %v5770_v39 }
 0x2be   : > { %v5772_v58 = vpop.f32.mrb[34].mxu0 }
 0x2bf   : > { %v5774_v5 = vpop.f32.mrb[35].mxu0  ;;  %v5776_v26 = vpop.f32.mrb[20].mxu1 }
 0x2c0   : > { %6826 = vst [vmem:[#allocation23_spill] sm:$0xff] %v5776_v26  ;;  %v5778_v44 = vpop.f32.mrb[21].mxu1 }
 0x2c1   : > { %6827 = vst [vmem:[#allocation24_spill] sm:$0xff] %v5778_v44 }
 0x2c2   : > { %v5780_v7 = vpop.f32.mrb[36].mxu0 }
 0x2c3   : > { %v5782_v50 = vpop.f32.mrb[37].mxu0  ;;  %v5784_v48 = vpop.f32.mrb[22].mxu1 }
 0x2c4   : > { %6828 = vst [vmem:[#allocation25_spill] sm:$0xff] %v5784_v48  ;;  %v5786_v21 = vpop.f32.mrb[23].mxu1 }
 0x2c5   : > { %6829 = vst [vmem:[#allocation26_spill] sm:$0xff] %v5786_v21 }
 0x2c6   : > { %v5788_v60 = vpop.f32.mrb[38].mxu0 }
 0x2c7   : > { %v5790_v52 = vpop.f32.mrb[39].mxu0  ;;  %v5792_v4 = vpop.f32.mrb[24].mxu1 }
 0x2c8   : > { %6830 = vst [vmem:[#allocation27_spill] sm:$0xff] %v5792_v4  ;;  %v5794_v10 = vpop.f32.mrb[25].mxu1 }
 0x2c9   : > { %6831 = vst [vmem:[#allocation28_spill] sm:$0xff] %v5794_v10 }
 0x2ca   : > { %v5796_v11 = vpop.f32.mrb[40].mxu0 }
 0x2cb   : > { %v5798_v16 = vpop.f32.mrb[41].mxu0  ;;  %v5800_v20 = vpop.f32.mrb[26].mxu1 }
 0x2cc   : > { %6832 = vst [vmem:[#allocation29_spill] sm:$0xff] %v5800_v20  ;;  %v5802_v23 = vpop.f32.mrb[27].mxu1 }
 0x2cd   : > { %6833 = vst [vmem:[#allocation30_spill] sm:$0xff] %v5802_v23 }
 0x2ce   : > { %v744_v2 = vpop.xlane.xlu0 %743  ;;  %v5804_v22 = vpop.f32.mrb[42].mxu0 }
 0x2cf   : > { %4616 = vrcp.f32 %v744_v2  ;;  %v5806_v28 = vpop.f32.mrb[43].mxu0  ;;  %v5808_v31 = vpop.f32.mrb[28].mxu1 }
 0x2d0   : > { %6834 = vst [vmem:[#allocation31_spill] sm:$0xff] %v5808_v31  ;;  %v5810_v38 = vpop.f32.mrb[29].mxu1 }
 0x2d1   : > { %6835 = vst [vmem:[#allocation32_spill] sm:$0xff] %v5810_v38 }
 0x2d2   : > { %v747_v12 = vpop.xlane.xlu1 %746  ;;  %v5812_v17 = vpop.f32.mrb[44].mxu0 }
 0x2d3   : > { %4618 = vrcp.f32 %v747_v12  ;;  %v5817_v20 = vpop.f32.mrb[45].mxu0  ;;  %v5819_v23 = vpop.f32.mrb[30].mxu1 }
 0x2d4   : > { %6836 = vst [vmem:[#allocation33_spill] sm:$0xff] %v5819_v23  ;;  %v5827_v38 = vpop.f32.mrb[31].mxu1  ;;  %v6839_v23 = vmov 0.0  }
 0x2d5   : > { %6837 = vst [vmem:[#allocation34_spill] sm:$0xff] %v5827_v38 }
 0x2d6   : > { %v750_v18 = vpop.xlane.xlu0 %749 }
 0x2d7   : > { %4620 = vrcp.f32 %v750_v18  ;;  %v5825_v18 = vld [vmem:[#allocation10] sm:$0xf] }
 0x2d9   : > { %v4617_v2 = vpop.eup %4616 }
 0x2da   : > { %v5815_v10 = vmul.f32 %v4617_v2, %v5607_v47  ;;  %v753_v12 = vpop.xlane.xlu1 %752  ;;  %v5833_v47 = vpop.f32.mrb[46].mxu0 }
 0x2db   : > { %4622 = vrcp.f32 %v753_v12  ;;  %6838 = vst [vmem:[#allocation35_spill] sm:$0xff] %v5833_v47  ;;  %v5840_v4 = vpop.f32.mrb[47].mxu0 }
 0x2dc   : > { %3645 = vmatmul.mubr.msk.f32.vlgmr.msra.gmra.mrb[72].mxu1 %vm645_vm0, %v5815_v10  ;;  %3663 = vmatmul.mubr.msk.f32.vlgmr.msra.gmra.mrb[88].mxu0 %vm645_vm0, %v5815_v10  ;;  %6840 = vst [vmem:[#allocation36_spill] sm:$0xff] %v5840_v4 }
 0x2dd   : > { %v4619_v31 = vpop.eup %4618  ;;  %3680 = vmatpush1.msk.msra.mxu1 %vm1824_vm1, %v5689_v54  ;;  %3698 = vmatpush1.msk.msra.mxu0 %vm1824_vm1, %v5694_v34  ;;  %v5844_v54 = vpop.f32.mrb[32].mxu1 }
 0x2de   : > { %v5836_v2 = vmul.f32 %v4619_v31, %v5616_v56  ;;  %v756_v12 = vpop.xlane.xlu0 %755  ;;  %1911 = vmatprep.mubr.f32.mxu1 %v6839_v23  ;;  %2072 = vmatprep.mubr.f32.mxu0 %v6839_v23  ;;  %6841 = vst [vmem:[#allocation37_spill] sm:$0xff] %v5844_v54  ;;  %v5850_v56 = vpop.f32.mrb[33].mxu1 }
 0x2df   : > { %4624 = vrcp.f32 %v756_v12  ;;  %4156 = vmatprep.subr.msk.mxu1 %vm1824_vm1, %v5825_v18  ;;  %6842 = vst [vmem:[#allocation38_spill] sm:$0xff] %v5850_v56  ;;  %v5854_v31 = vpop.f32.mrb[48].mxu0  ;;  %v5861_v21 = vpop.f32.mrb[34].mxu1 }
 0x2e0   : > { %3646 = vmatmul.mubr.msk.f32.gmra.mrb[74].mxu1 %vm645_vm0, %v5836_v2  ;;  %3664 = vmatmul.mubr.msk.f32.gmra.mrb[90].mxu0 %vm645_vm0, %v5836_v2  ;;  %6843 = vst [vmem:[#allocation39_spill] sm:$0xff] %v5854_v31  ;;  %v5859_v54 = vpop.f32.mrb[49].mxu0  ;;  %6845 = vst [vmem:[#allocation41_spill] sm:$0xff] %v5861_v21  ;;  %v5867_v56 = vpop.f32.mrb[35].mxu1  ;;  %v2648_v31 = vld [vmem:[#allocation8 + $0x118] sm:$0xff] }
 0x2e1   : > { %v4621_v34 = vpop.eup %4620  ;;  %1917 = vmatprep.mubr.f32.mxu1 %v6839_v23  ;;  %2078 = vmatprep.mubr.f32.mxu0 %v6839_v23  ;;  %6844 = vst [vmem:[#allocation40_spill] sm:$0xff] %v5859_v54  ;;  %6846 = vst [vmem:[#allocation42_spill] sm:$0xff] %v5867_v56  ;;  %v5878_v44 = vpop.f32.mrb[36].mxu1  ;;  %v2630_v54 = vld [vmem:[#allocation8 + $0x88] sm:$0xff] }
 0x2e2   : > { %v5857_v12 = vmul.f32 %v4621_v34, %v5625_v14  ;;  %v759_v38 = vpop.xlane.xlu1 %758  ;;  %v5871_v14 = vpop.f32.mrb[50].mxu0  ;;  %6849 = vst [vmem:[#allocation45_spill] sm:$0xff] %v5878_v44 }
 0x2e3   : > { %4626 = vrcp.f32 %v759_v38  ;;  %6847 = vst [vmem:[#allocation43_spill] sm:$0xff] %v5871_v14  ;;  %v5876_v21 = vpop.f32.mrb[51].mxu0  ;;  %v5884_v56 = vpop.f32.mrb[37].mxu1 }
 0x2e4   : > { %3647 = vmatmul.mubr.msk.f32.gmra.mrb[76].mxu1 %vm645_vm0, %v5857_v12  ;;  %3665 = vmatmul.mubr.msk.f32.gmra.mrb[92].mxu0 %vm645_vm0, %v5857_v12  ;;  %6848 = vst [vmem:[#allocation44_spill] sm:$0xff] %v5876_v21  ;;  %6850 = vst [vmem:[#allocation46_spill] sm:$0xff] %v5884_v56  ;;  %v5895_v21 = vpop.f32.mrb[38].mxu1 }
 0x2e5   : > { %v4623_v48 = vpop.eup %4622  ;;  %1923 = vmatprep.mubr.f32.mxu1 %v6839_v23  ;;  %2084 = vmatprep.mubr.f32.mxu0 %v6839_v23  ;;  %6853 = vst [vmem:[#allocation49_spill] sm:$0xff] %v5895_v21  ;;  %v5901_v56 = vpop.f32.mrb[39].mxu1 }
 0x2e6   : > { %v5874_v34 = vmul.f32 %v4623_v48, %v5634_v27  ;;  %v762_v38 = vpop.xlane.xlu0 %761  ;;  %v5888_v27 = vpop.f32.mrb[52].mxu0  ;;  %6854 = vst [vmem:[#allocation50_spill] sm:$0xff] %v5901_v56 }
 0x2e7   : > { %4628 = vrcp.f32 %v762_v38  ;;  %6851 = vst [vmem:[#allocation47_spill] sm:$0xff] %v5888_v27  ;;  %v5893_v44 = vpop.f32.mrb[53].mxu0 }
 0x2e8   : > { %3648 = vmatmul.mubr.msk.f32.gmra.mrb[78].mxu1 %vm645_vm0, %v5874_v34  ;;  %3666 = vmatmul.mubr.msk.f32.gmra.mrb[94].mxu0 %vm645_vm0, %v5874_v34  ;;  %6852 = vst [vmem:[#allocation48_spill] sm:$0xff] %v5893_v44  ;;  %v5912_v44 = vpop.f32.mrb[40].mxu1 }
 0x2e9   : > { %v4625_v26 = vpop.eup %4624  ;;  %1929 = vmatprep.mubr.f32.mxu1 %v6839_v23  ;;  %2090 = vmatprep.mubr.f32.mxu0 %v6839_v23  ;;  %6857 = vst [vmem:[#allocation53_spill] sm:$0xff] %v5912_v44  ;;  %v5918_v56 = vpop.f32.mrb[41].mxu1 }
 0x2ea   : > { %v5891_v48 = vmul.f32 %v4625_v26, %v5645_v37  ;;  %v765_v38 = vpop.xlane.xlu1 %764  ;;  %v5905_v37 = vpop.f32.mrb[54].mxu0  ;;  %6858 = vst [vmem:[#allocation54_spill] sm:$0xff] %v5918_v56 }
 0x2eb   : > { %4630 = vrcp.f32 %v765_v38  ;;  %6855 = vst [vmem:[#allocation51_spill] sm:$0xff] %v5905_v37  ;;  %v5910_v21 = vpop.f32.mrb[55].mxu0 }
 0x2ec   : > { %3649 = vmatmul.mubr.msk.f32.gmra.mrb[80].mxu1 %vm645_vm0, %v5891_v48  ;;  %3667 = vmatmul.mubr.msk.f32.gmra.mrb[96].mxu0 %vm645_vm0, %v5891_v48  ;;  %6856 = vst [vmem:[#allocation52_spill] sm:$0xff] %v5910_v21  ;;  %v5929_v21 = vpop.f32.mrb[42].mxu1 }
 0x2ed   : > { %v4627_v39 = vpop.eup %4626  ;;  %1935 = vmatprep.mubr.f32.mxu1 %v6839_v23  ;;  %2096 = vmatprep.mubr.f32.mxu0 %v6839_v23  ;;  %6861 = vst [vmem:[#allocation57_spill] sm:$0xff] %v5929_v21  ;;  %v5935_v56 = vpop.f32.mrb[43].mxu1 }
 0x2ee   : > { %v5908_v26 = vmul.f32 %v4627_v39, %v5654_v49  ;;  %v768_v38 = vpop.xlane.xlu0 %767  ;;  %v5922_v49 = vpop.f32.mrb[56].mxu0  ;;  %6862 = vst [vmem:[#allocation58_spill] sm:$0xff] %v5935_v56 }
 0x2ef   : > { %4632 = vrcp.f32 %v768_v38  ;;  %6859 = vst [vmem:[#allocation55_spill] sm:$0xff] %v5922_v49  ;;  %v5927_v44 = vpop.f32.mrb[57].mxu0  ;;  %v5946_v3 = vpop.f32.mrb[44].mxu1 }
 0x2f0   : > { %3650 = vmatmul.mubr.msk.f32.gmra.mrb[82].mxu1 %vm645_vm0, %v5908_v26  ;;  %3668 = vmatmul.mubr.msk.f32.gmra.mrb[98].mxu0 %vm645_vm0, %v5908_v26  ;;  %6860 = vst [vmem:[#allocation56_spill] sm:$0xff] %v5927_v44  ;;  %v2662_v44 = vld [vmem:[#allocation8 + $0x188] sm:$0xff]  ;;  %6865 = vst [vmem:[#allocation61_spill] sm:$0xff] %v5946_v3  ;;  %v5952_v56 = vpop.f32.mrb[45].mxu1 }
 0x2f1   : > { %v4629_v27 = vpop.eup %4628  ;;  %1941 = vmatprep.mubr.f32.mxu1 %v6839_v23  ;;  %2102 = vmatprep.mubr.f32.mxu0 %v6839_v23  ;;  %6866 = vst [vmem:[#allocation62_spill] sm:$0xff] %v5952_v56 }
 0x2f2   : > { %v5925_v39 = vmul.f32 %v4629_v27, %v5662_v55  ;;  %v771_v38 = vpop.xlane.xlu1 %770  ;;  %v5939_v55 = vpop.f32.mrb[58].mxu0  ;;  %v2661_v27 = vld [vmem:[#allocation8 + $0x180] sm:$0xff] }
 0x2f3   : > { %4634 = vrcp.f32 %v771_v38  ;;  %6863 = vst [vmem:[#allocation59_spill] sm:$0xff] %v5939_v55  ;;  %v5944_v49 = vpop.f32.mrb[59].mxu0  ;;  %v4374_v14 = vpack.c.bf16 %v2662_v44, %v2661_v27  ;;  %v5963_v27 = vpop.f32.mrb[46].mxu1 }
 0x2f4   : > { %3651 = vmatmul.mubr.msk.f32.gmra.mrb[84].mxu1 %vm645_vm0, %v5925_v39  ;;  %3669 = vmatmul.mubr.msk.f32.gmra.mrb[100].mxu0 %vm645_vm0, %v5925_v39  ;;  %6864 = vst [vmem:[#allocation60_spill] sm:$0xff] %v5944_v49  ;;  %6869 = vst [vmem:[#allocation65_spill] sm:$0xff] %v5963_v27  ;;  %v5969_v56 = vpop.f32.mrb[47].mxu1  ;;  %v2629_v49 = vld [vmem:[#allocation8 + $0x80] sm:$0xff] }
 0x2f5   : > { %v4631_v37 = vpop.eup %4630  ;;  %1947 = vmatprep.mubr.f32.mxu1 %v6839_v23  ;;  %2108 = vmatprep.mubr.f32.mxu0 %v6839_v23  ;;  %6870 = vst [vmem:[#allocation66_spill] sm:$0xff] %v5969_v56  ;;  %v4342_v4 = vpack.c.bf16 %v2630_v54, %v2629_v49  ;;  %v4380_v54 = vpack.c.bf16 %v2648_v31, %v2647_v40 }
 0x2f6   : > { %v5942_v38 = vmul.f32 %v4631_v37, %v5670_v1  ;;  %v774_v21 = vpop.xlane.xlu0 %773  ;;  %v5956_v1 = vpop.f32.mrb[60].mxu0  ;;  %4375 = vmatprep.subr.bf16.mxu0 %v4374_v14 }
 0x2f7   : > { %4636 = vrcp.f32 %v774_v21  ;;  %6867 = vst [vmem:[#allocation63_spill] sm:$0xff] %v5956_v1  ;;  %v5961_v37 = vpop.f32.mrb[61].mxu0  ;;  %v5980_v27 = vpop.f32.mrb[48].mxu1 }
 0x2f8   : > { %3652 = vmatmul.mubr.msk.f32.gmra.mrb[86].mxu1 %vm645_vm0, %v5942_v38  ;;  %3670 = vmatmul.mubr.msk.f32.gmra.mrb[102].mxu0 %vm645_vm0, %v5942_v38  ;;  %6868 = vst [vmem:[#allocation64_spill] sm:$0xff] %v5961_v37  ;;  %6873 = vst [vmem:[#allocation69_spill] sm:$0xff] %v5980_v27  ;;  %v5986_v56 = vpop.f32.mrb[49].mxu1 }
 0x2f9   : > { %v4633_v55 = vpop.eup %4632  ;;  %1953 = vmatprep.mubr.f32.mxu1 %v6839_v23  ;;  %2114 = vmatprep.mubr.f32.mxu0 %v6839_v23  ;;  %6874 = vst [vmem:[#allocation70_spill] sm:$0xff] %v5986_v56 }
 0x2fa   : > { %v5959_v44 = vmul.f32 %v4633_v55, %v5676_v8  ;;  %v777_v21 = vpop.xlane.xlu1 %776  ;;  %v5973_v8 = vpop.f32.mrb[62].mxu0 }
 0x2fb   : > { %4638 = vrcp.f32 %v777_v21  ;;  %6871 = vst [vmem:[#allocation67_spill] sm:$0xff] %v5973_v8  ;;  %v5978_v21 = vpop.f32.mrb[63].mxu0 }
 0x2fc   : > { %3653 = vmatmul.mubr.msk.f32.gmra.mrb[88].mxu1 %vm645_vm0, %v5959_v44  ;;  %3671 = vmatmul.mubr.msk.f32.gmra.mrb[104].mxu0 %vm645_vm0, %v5959_v44  ;;  %6872 = vst [vmem:[#allocation68_spill] sm:$0xff] %v5978_v21  ;;  %v5997_v21 = vpop.f32.mrb[50].mxu1 }
 0x2fd   : > { %v4635_v3 = vpop.eup %4634  ;;  %1959 = vmatprep.mubr.f32.mxu1 %v6839_v23  ;;  %2120 = vmatprep.mubr.f32.mxu0 %v6839_v23  ;;  %6877 = vst [vmem:[#allocation73_spill] sm:$0xff] %v5997_v21  ;;  %v6003_v56 = vpop.f32.mrb[51].mxu1 }
 0x2fe   : > { %v5976_v14 = vmul.f32 %v4635_v3, %v5681_v30  ;;  %v780_v55 = vpop.xlane.xlu0 %779  ;;  %v5990_v30 = vpop.f32.mrb[64].mxu0  ;;  %6878 = vst [vmem:[#allocation74_spill] sm:$0xff] %v6003_v56 }
 0x2ff   : > { %4640 = vrcp.f32 %v780_v55  ;;  %6875 = vst [vmem:[#allocation71_spill] sm:$0xff] %v5990_v30  ;;  %v5995_v27 = vpop.f32.mrb[65].mxu0 }
 0x300   : > { %3654 = vmatmul.mubr.msk.f32.gmra.mrb[90].mxu1 %vm645_vm0, %v5976_v14  ;;  %3672 = vmatmul.mubr.msk.f32.gmra.mrb[106].mxu0 %vm645_vm0, %v5976_v14  ;;  %6876 = vst [vmem:[#allocation72_spill] sm:$0xff] %v5995_v27  ;;  %v6014_v27 = vpop.f32.mrb[52].mxu1 }
 0x301   : > { %v4637_v37 = vpop.eup %4636  ;;  %1965 = vmatprep.mubr.f32.mxu1 %v6839_v23  ;;  %2126 = vmatprep.mubr.f32.mxu0 %v6839_v23  ;;  %6881 = vst [vmem:[#allocation77_spill] sm:$0xff] %v6014_v27  ;;  %v6020_v56 = vpop.f32.mrb[53].mxu1 }
 0x302   : > { %v5993_v3 = vmul.f32 %v4637_v37, %v5696_v9  ;;  %v783_v55 = vpop.xlane.xlu1 %782  ;;  %v6007_v9 = vpop.f32.mrb[66].mxu0  ;;  %6882 = vst [vmem:[#allocation78_spill] sm:$0xff] %v6020_v56 }
 0x303   : > { %4642 = vrcp.f32 %v783_v55  ;;  %6879 = vst [vmem:[#allocation75_spill] sm:$0xff] %v6007_v9  ;;  %v6012_v21 = vpop.f32.mrb[67].mxu0 }
 0x304   : > { %3655 = vmatmul.mubr.msk.f32.gmra.mrb[92].mxu1 %vm645_vm0, %v5993_v3  ;;  %3673 = vmatmul.mubr.msk.f32.gmra.mrb[108].mxu0 %vm645_vm0, %v5993_v3  ;;  %6880 = vst [vmem:[#allocation76_spill] sm:$0xff] %v6012_v21  ;;  %v6031_v21 = vpop.f32.mrb[54].mxu1 }
 0x305   : > { %v4639_v8 = vpop.eup %4638  ;;  %1971 = vmatprep.mubr.f32.mxu1 %v6839_v23  ;;  %2132 = vmatprep.mubr.f32.mxu0 %v6839_v23  ;;  %6885 = vst [vmem:[#allocation81_spill] sm:$0xff] %v6031_v21  ;;  %v6037_v56 = vpop.f32.mrb[55].mxu1 }
 0x306   : > { %v6010_v37 = vmul.f32 %v4639_v8, %v5707_v6  ;;  %v786_v55 = vpop.xlane.xlu0 %785  ;;  %v6024_v6 = vpop.f32.mrb[68].mxu0  ;;  %6886 = vst [vmem:[#allocation82_spill] sm:$0xff] %v6037_v56 }
 0x307   : > { %4644 = vrcp.f32 %v786_v55  ;;  %6883 = vst [vmem:[#allocation79_spill] sm:$0xff] %v6024_v6  ;;  %v6029_v27 = vpop.f32.mrb[69].mxu0  ;;  %v2663_v6 = vld [vmem:[#allocation8 + $0x190] sm:$0xff] }
 0x308   : > { %3656 = vmatmul.mubr.msk.f32.gmra.mrb[94].mxu1 %vm645_vm0, %v6010_v37  ;;  %3674 = vmatmul.mubr.msk.f32.gmra.mrb[110].mxu0 %vm645_vm0, %v6010_v37  ;;  %6884 = vst [vmem:[#allocation80_spill] sm:$0xff] %v6029_v27  ;;  %v6048_v21 = vpop.f32.mrb[56].mxu1 }
 0x309   : > { %v4641_v30 = vpop.eup %4640  ;;  %1977 = vmatprep.mubr.f32.mxu1 %v6839_v23  ;;  %2138 = vmatprep.mubr.f32.mxu0 %v6839_v23  ;;  %6889 = vst [vmem:[#allocation85_spill] sm:$0xff] %v6048_v21  ;;  %v6054_v56 = vpop.f32.mrb[57].mxu1 }
 0x30a   : > { %v6027_v8 = vmul.f32 %v4641_v30, %v5712_v24  ;;  %v789_v55 = vpop.xlane.xlu1 %788  ;;  %v6041_v24 = vpop.f32.mrb[70].mxu0  ;;  %6890 = vst [vmem:[#allocation86_spill] sm:$0xff] %v6054_v56 }
 0x30b   : > { %4646 = vrcp.f32 %v789_v55  ;;  %6887 = vst [vmem:[#allocation83_spill] sm:$0xff] %v6041_v24  ;;  %v6046_v55 = vpop.f32.mrb[71].mxu0 }
 0x30c   : > { %3657 = vmatmul.mubr.msk.f32.gmra.mrb[96].mxu1 %vm645_vm0, %v6027_v8  ;;  %3675 = vmatmul.mubr.msk.f32.gmra.mrb[112].mxu0 %vm645_vm0, %v6027_v8  ;;  %6888 = vst [vmem:[#allocation84_spill] sm:$0xff] %v6046_v55  ;;  %v6058_v24 = vpop.f32.mrb[72].mxu0  ;;  %v6065_v21 = vpop.f32.mrb[58].mxu1 }
 0x30d   : > { %v4643_v9 = vpop.eup %4642  ;;  %1983 = vmatprep.mubr.f32.mxu1 %v6839_v23  ;;  %2144 = vmatprep.mubr.f32.mxu0 %v6839_v23  ;;  %6891 = vst [vmem:[#allocation87_spill] sm:$0xff] %v6058_v24  ;;  %6893 = vst [vmem:[#allocation89_spill] sm:$0xff] %v6065_v21  ;;  %v6071_v56 = vpop.f32.mrb[59].mxu1  ;;  %v2645_v21 = vld [vmem:[#allocation8 + $0x100] sm:$0xff] }
 0x30e   : > { %v6044_v30 = vmul.f32 %v4643_v9, %v5716_v25  ;;  %v6063_v9 = vpop.f32.mrb[73].mxu0  ;;  %6894 = vst [vmem:[#allocation90_spill] sm:$0xff] %v6071_v56  ;;  %v2664_v56 = vld [vmem:[#allocation8 + $0x198] sm:$0xff] }
 0x30f   : > { %6892 = vst [vmem:[#allocation88_spill] sm:$0xff] %v6063_v9  ;;  %v2646_v9 = vld [vmem:[#allocation8 + $0x108] sm:$0xff] }
 0x310   : > { %3658 = vmatmul.mubr.msk.f32.gmra.mrb[98].mxu1 %vm645_vm0, %v6044_v30  ;;  %3676 = vmatmul.mubr.msk.f32.gmra.mrb[114].mxu0 %vm645_vm0, %v6044_v30  ;;  %v6082_v1 = vpop.f32.mrb[60].mxu1 }
 0x311   : > { %v4645_v27 = vpop.eup %4644  ;;  %1989 = vmatprep.mubr.f32.mxu1 %v6839_v23  ;;  %2150 = vmatprep.mubr.f32.mxu0 %v6839_v23  ;;  %v6075_v24 = vpop.f32.mrb[74].mxu0  ;;  %6897 = vst [vmem:[#allocation93_spill] sm:$0xff] %v6082_v1  ;;  %v4378_v1 = vpack.c.bf16 %v2664_v56, %v2663_v6  ;;  %v2649_v6 = vld [vmem:[#allocation8 + $0x120] sm:$0xff] }
 0x312   : > { %v6061_v25 = vmul.f32 %v4645_v27, %v5720_v29  ;;  %6895 = vst [vmem:[#allocation91_spill] sm:$0xff] %v6075_v24  ;;  %v6080_v27 = vpop.f32.mrb[75].mxu0  ;;  %v6088_v24 = vpop.f32.mrb[61].mxu1 }
 0x313   : > { %6896 = vst [vmem:[#allocation92_spill] sm:$0xff] %v6080_v27  ;;  %6898 = vst [vmem:[#allocation94_spill] sm:$0xff] %v6088_v24  ;;  %v2665_v24 = vld [vmem:[#allocation8 + $0x1a0] sm:$0xff] }
 0x314   : > { %3659 = vmatmul.mubr.msk.f32.gmra.mrb[100].mxu1 %vm645_vm0, %v6061_v25  ;;  %3677 = vmatmul.mubr.msk.f32.gmra.mrb[116].mxu0 %vm645_vm0, %v6061_v25  ;;  %v6096_v63 = vpop.f32.mrb[62].mxu1 }
 0x315   : > { %v4647_v55 = vpop.eup %4646  ;;  %1995 = vmatprep.mubr.f32.mxu1 %v6839_v23  ;;  %2156 = vmatprep.mubr.f32.mxu0 %v6839_v23  ;;  %6899 = vst [vmem:[#allocation95_spill] sm:$0xff] %v6096_v63  ;;  %v6102_v47 = vpop.f32.mrb[63].mxu1 }
 0x316   : > { %v6078_v29 = vmul.f32 %v4647_v55, %v5724_v32  ;;  %v6092_v32 = vpop.f32.mrb[76].mxu0  ;;  %v4376_v55 = vpack.c.bf16 %v2646_v9, %v2645_v21  ;;  %6900 = vst [vmem:[#allocation96_spill] sm:$0xff] %v6102_v47  ;;  %v4382_v21 = vpack.c.bf16 %v2666_v61, %v2665_v24  ;;  %v2650_v9 = vld [vmem:[#allocation8 + $0x128] sm:$0xff]  ;;  %v2667_v47 = vld [vmem:[#allocation8 + $0x1b0] sm:$0xff]  ;;  %v2652_v24 = vld [vmem:[#allocation8 + $0x138] sm:$0xff] }
 0x317   : > { %v6094_v27 = vpop.f32.mrb[77].mxu0  ;;  %v4384_v40 = vpack.c.bf16 %v2650_v9, %v2649_v6  ;;  %v2653_v6 = vld [vmem:[#allocation8 + $0x140] sm:$0xff]  ;;  %v2654_v9 = vld [vmem:[#allocation8 + $0x148] sm:$0xff] }
 0x318   : > { %3660 = vmatmul.mubr.msk.f32.gmra.mrb[102].mxu1 %vm645_vm0, %v6078_v29  ;;  %3678 = vmatmul.mubr.msk.f32.gmra.mrb[118].mxu0 %vm645_vm0, %v6078_v29  ;;  %v6112_v63 = vpop.f32.mrb[64].mxu1 }
 0x319   : > { %2227 = vmatprep.mubr.f32.mxu1 %v6839_v23  ;;  %2388 = vmatprep.mubr.f32.mxu0 %v6839_v23  ;;  %v6106_v56 = vpop.f32.mrb[78].mxu0  ;;  %6903 = vst [vmem:[#allocation99_spill] sm:$0xff] %v6112_v63  ;;  %v2670_v63 = vld [vmem:[#allocation8 + $0x1c8] sm:$0xff] }
 0x31a   : > { %6901 = vst [vmem:[#allocation97_spill] sm:$0xff] %v6106_v56  ;;  %v6110_v49 = vpop.f32.mrb[79].mxu0  ;;  %v2668_v56 = vld [vmem:[#allocation8 + $0x1b8] sm:$0xff] }
 0x31b   : > { %6902 = vst [vmem:[#allocation98_spill] sm:$0xff] %v6110_v49  ;;  %v4386_v31 = vpack.c.bf16 %v2668_v56, %v2667_v47 }
 0x31c   : > { %3681 = vmatmul.mubr.msk.f32.vlgmr.msra.gmra.mrb[104].mxu1 %vm645_vm0, %v5815_v10  ;;  %3699 = vmatmul.mubr.msk.f32.vlgmr.msra.gmra.mrb[120].mxu0 %vm645_vm0, %v5815_v10 }
 0x31d   : > { %2233 = vmatprep.mubr.f32.mxu1 %v6839_v23  ;;  %2394 = vmatprep.mubr.f32.mxu0 %v6839_v23  ;;  %v6122_v61 = vpop.f32.mrb[80].mxu0 }
 0x31e   : > { %4157 = vmatpush3.msk.msra.mxu1 %vm1824_vm1, %v5825_v18  ;;  %4377 = vmatpush3.bf16.msra.mxu0 %v4376_v55  ;;  %v6118_v18 = vpop.f32.mrb[65].mxu1  ;;  %6905 = vst [vmem:[#allocation101_spill] sm:$0xff] %v6122_v61 }
 0x31f   : > { %4379 = vmatprep.subr.bf16.mxu0 %v4378_v1  ;;  %4343 = vmatprep.subr.bf16.mxu1 %v4342_v4  ;;  %6904 = vst [vmem:[#allocation100_spill] sm:$0xff] %v6118_v18  ;;  %v6124_v4 = vpop.f32.mrb[81].mxu0  ;;  %v2651_v1 = vld [vmem:[#allocation8 + $0x130] sm:$0xff]  ;;  %v6126_v55 = vpop.f32.mrb[66].mxu1  ;;  %v2669_v18 = vld [vmem:[#allocation8 + $0x1c0] sm:$0xff] }
 0x320   : > { %3682 = vmatmul.mubr.msk.f32.gmra.mrb[106].mxu1 %vm645_vm0, %v5836_v2  ;;  %3700 = vmatmul.mubr.msk.f32.gmra.mrb[122].mxu0 %vm645_vm0, %v5836_v2  ;;  %6906 = vst [vmem:[#allocation102_spill] sm:$0xff] %v6124_v4  ;;  %6907 = vst [vmem:[#allocation103_spill] sm:$0xff] %v6126_v55  ;;  %v6132_v49 = vpop.f32.mrb[67].mxu1  ;;  %v4388_v47 = vpack.c.bf16 %v2652_v24, %v2651_v1  ;;  %v2672_v4 = vld [vmem:[#allocation8 + $0x1d8] sm:$0xff]  ;;  %v2655_v1 = vld [vmem:[#allocation8 + $0x150] sm:$0xff] }
 0x321   : > { %2239 = vmatprep.mubr.f32.mxu1 %v6839_v23  ;;  %2400 = vmatprep.mubr.f32.mxu0 %v6839_v23  ;;  %6908 = vst [vmem:[#allocation104_spill] sm:$0xff] %v6132_v49  ;;  %v6140_v55 = vpop.f32.mrb[68].mxu1  ;;  %v2671_v49 = vld [vmem:[#allocation8 + $0x1d0] sm:$0xff]  ;;  %v2656_v24 = vld [vmem:[#allocation8 + $0x158] sm:$0xff] }
 0x322   : > { %4381 = vmatpush3.bf16.msra.mxu0 %v4380_v54  ;;  %v6136_v54 = vpop.f32.mrb[82].mxu0  ;;  %6911 = vst [vmem:[#allocation107_spill] sm:$0xff] %v6140_v55  ;;  %v6146_v61 = vpop.f32.mrb[69].mxu1 }
 0x323   : > { %4383 = vmatprep.subr.bf16.mxu0 %v4382_v21  ;;  %6909 = vst [vmem:[#allocation105_spill] sm:$0xff] %v6136_v54  ;;  %v6138_v56 = vpop.f32.mrb[83].mxu0  ;;  %v4390_v21 = vpack.c.bf16 %v2670_v63, %v2669_v18  ;;  %6912 = vst [vmem:[#allocation108_spill] sm:$0xff] %v6146_v61  ;;  %v4392_v63 = vpack.c.bf16 %v2654_v9, %v2653_v6  ;;  %v2673_v61 = vld [vmem:[#allocation8 + $0x1e0] sm:$0xff]  ;;  %v2658_v9 = vld [vmem:[#allocation8 + $0x168] sm:$0xff] }
 0x324   : > { %3683 = vmatmul.mubr.msk.f32.gmra.mrb[108].mxu1 %vm645_vm0, %v5857_v12  ;;  %3701 = vmatmul.mubr.msk.f32.gmra.mrb[124].mxu0 %vm645_vm0, %v5857_v12  ;;  %6910 = vst [vmem:[#allocation106_spill] sm:$0xff] %v6138_v56  ;;  %v6154_v55 = vpop.f32.mrb[70].mxu1  ;;  %v2674_v56 = vld [vmem:[#allocation8 + $0x1e8] sm:$0xff]  ;;  %v2657_v6 = vld [vmem:[#allocation8 + $0x160] sm:$0xff] }
 0x325   : > { %2245 = vmatprep.mubr.f32.mxu1 %v6839_v23  ;;  %2406 = vmatprep.mubr.f32.mxu0 %v6839_v23  ;;  %6914 = vst [vmem:[#allocation110_spill] sm:$0xff] %v6154_v55  ;;  %v6160_v54 = vpop.f32.mrb[71].mxu1  ;;  %v2676_v55 = vld [vmem:[#allocation8 + $0x1f8] sm:$0xff] }
 0x326   : > { %4385 = vmatpush3.bf16.msra.mxu0 %v4384_v40  ;;  %v6150_v40 = vpop.f32.mrb[84].mxu0  ;;  %6915 = vst [vmem:[#allocation111_spill] sm:$0xff] %v6160_v54  ;;  %v2675_v54 = vld [vmem:[#allocation8 + $0x1f0] sm:$0xff] }
 0x327   : > { %4387 = vmatprep.subr.bf16.mxu0 %v4386_v31  ;;  %v6152_v18 = vpop.f32.mrb[85].mxu0  ;;  %v4394_v31 = vpack.c.bf16 %v2672_v4, %v2671_v49  ;;  %v4396_v49 = vpack.c.bf16 %v2656_v24, %v2655_v1  ;;  %v4402_v1 = vpack.c.bf16 %v2676_v55, %v2675_v54  ;;  %v2613_v55 = vld [vmem:[#allocation8] sm:$0xff]  ;;  %v2614_v54 = vld [vmem:[#allocation8 + $0x8] sm:$0xff] }
 0x328   : > { %3684 = vmatmul.mubr.msk.f32.gmra.mrb[110].mxu1 %vm645_vm0, %v5874_v34  ;;  %3702 = vmatmul.mubr.msk.f32.gmra.mrb[126].mxu0 %vm645_vm0, %v5874_v34  ;;  %6913 = vst [vmem:[#allocation109_spill] sm:$0xff] %v6152_v18  ;;  %v2712_v18 = vld [vmem:[#allocation8 + $0x318] sm:$0xff] }
 0x329   : > { %2251 = vmatprep.mubr.f32.mxu1 %v6839_v23  ;;  %2412 = vmatprep.mubr.f32.mxu0 %v6839_v23 }
 0x32a   : > { %4389 = vmatpush3.bf16.msra.mxu0 %v4388_v47  ;;  %v6164_v47 = vpop.f32.mrb[86].mxu0 }
 0x32b   : > { %4391 = vmatprep.subr.bf16.mxu0 %v4390_v21  ;;  %6916 = vst [vmem:[#allocation112_spill] sm:$0xff] %v6164_v47  ;;  %v6166_v4 = vpop.f32.mrb[87].mxu0  ;;  %v4398_v21 = vpack.c.bf16 %v2674_v56, %v2673_v61  ;;  %v2660_v61 = vld [vmem:[#allocation8 + $0x178] sm:$0xff]  ;;  %v2725_v56 = vld [vmem:[#allocation8 + $0x380] sm:$0xff]  ;;  %v2635_v47 = vld [vmem:[#allocation8 + $0xb0] sm:$0xff] }
 0x32c   : > { %3685 = vmatmul.mubr.msk.f32.gmra.mrb[112].mxu1 %vm645_vm0, %v5891_v48  ;;  %3703 = vmatmul.mubr.msk.f32.gmra.mrb[128].mxu0 %vm645_vm0, %v5891_v48  ;;  %6917 = vst [vmem:[#allocation113_spill] sm:$0xff] %v6166_v4  ;;  %v2726_v4 = vld [vmem:[#allocation8 + $0x388] sm:$0xff] }
 0x32d   : > { %2257 = vmatprep.mubr.f32.mxu1 %v6839_v23  ;;  %2418 = vmatprep.mubr.f32.mxu0 %v6839_v23 }
 0x32e   : > { %4393 = vmatpush3.bf16.msra.mxu0 %v4392_v63  ;;  %v4400_v63 = vpack.c.bf16 %v2658_v9, %v2657_v6  ;;  %v4344_v6 = vpack.c.bf16 %v2614_v54, %v2613_v55  ;;  %v2619_v54 = vld [vmem:[#allocation8 + $0x30] sm:$0xff] }
 0x32f   : > { %4395 = vmatprep.subr.bf16.mxu0 %v4394_v31  ;;  %v2659_v31 = vld [vmem:[#allocation8 + $0x170] sm:$0xff] }
 0x330   : > { %3686 = vmatmul.mubr.msk.f32.gmra.mrb[114].mxu1 %vm645_vm0, %v5908_v26  ;;  %3704 = vmatmul.mubr.msk.f32.gmra.mrb[130].mxu0 %vm645_vm0, %v5908_v26  ;;  %v4404_v24 = vpack.c.bf16 %v2660_v61, %v2659_v31  ;;  %v2633_v31 = vld [vmem:[#allocation8 + $0xa0] sm:$0xff]  ;;  %v2634_v61 = vld [vmem:[#allocation8 + $0xa8] sm:$0xff] }
 0x331   : > { %2263 = vmatprep.mubr.f32.mxu1 %v6839_v23  ;;  %2424 = vmatprep.mubr.f32.mxu0 %v6839_v23 }
 0x332   : > { %4397 = vmatpush3.bf16.msra.mxu0 %v4396_v49  ;;  %v4438_v49 = vpack.c.bf16 %v2726_v4, %v2725_v56  ;;  %v2631_v4 = vld [vmem:[#allocation8 + $0x90] sm:$0xff]  ;;  %v4350_v56 = vpack.c.bf16 %v2634_v61, %v2633_v31  ;;  %v2641_v61 = vld [vmem:[#allocation8 + $0xe0] sm:$0xff] }
 0x333   : > { %4399 = vmatprep.subr.bf16.mxu0 %v4398_v21  ;;  %v2632_v21 = vld [vmem:[#allocation8 + $0x98] sm:$0xff]  ;;  %v2623_v31 = vld [vmem:[#allocation8 + $0x50] sm:$0xff] }
 0x334   : > { %3687 = vmatmul.mubr.msk.f32.gmra.mrb[116].mxu1 %vm645_vm0, %v5925_v39  ;;  %3705 = vmatmul.mubr.msk.f32.gmra.mrb[132].mxu0 %vm645_vm0, %v5925_v39  ;;  %v4346_v9 = vpack.c.bf16 %v2632_v21, %v2631_v4  ;;  %v2637_v4 = vld [vmem:[#allocation8 + $0xc0] sm:$0xff]  ;;  %v2638_v21 = vld [vmem:[#allocation8 + $0xc8] sm:$0xff] }
 0x335   : > { %2269 = vmatprep.mubr.f32.mxu1 %v6839_v23  ;;  %2430 = vmatprep.mubr.f32.mxu0 %v6839_v23 }
 0x336   : > { %4401 = vmatpush3.bf16.msra.mxu0 %v4400_v63  ;;  %v2615_v63 = vld [vmem:[#allocation8 + $0x10] sm:$0xff] }
 0x337   : > { %4403 = vmatprep.subr.bf16.mxu0 %v4402_v1  ;;  %v2616_v1 = vld [vmem:[#allocation8 + $0x18] sm:$0xff] }
 0x338   : > { %3688 = vmatmul.mubr.msk.f32.gmra.mrb[118].mxu1 %vm645_vm0, %v5942_v38  ;;  %3706 = vmatmul.mubr.msk.f32.gmra.mrb[134].mxu0 %vm645_vm0, %v5942_v38 }
 0x339   : > { %2275 = vmatprep.mubr.f32.mxu1 %v6839_v23  ;;  %2436 = vmatprep.mubr.f32.mxu0 %v6839_v23 }
 0x33a   : > { %4405 = vmatpush3.bf16.msra.mxu0 %v4404_v24  ;;  %v2617_v24 = vld [vmem:[#allocation8 + $0x20] sm:$0xff] }
 0x33b   : > { %4439 = vmatprep.subr.bf16.mxu0 %v4438_v49  ;;  %v2618_v49 = vld [vmem:[#allocation8 + $0x28] sm:$0xff] }
 0x33c   : > { %3689 = vmatmul.mubr.msk.f32.gmra.mrb[120].mxu1 %vm645_vm0, %v5959_v44  ;;  %3707 = vmatmul.mubr.msk.f32.gmra.mrb[136].mxu0 %vm645_vm0, %v5959_v44  ;;  %v4352_v55 = vpack.c.bf16 %v2618_v49, %v2617_v24  ;;  %v2625_v24 = vld [vmem:[#allocation8 + $0x60] sm:$0xff]  ;;  %v2643_v49 = vld [vmem:[#allocation8 + $0xf0] sm:$0xff] }
 0x33d   : > { %2281 = vmatprep.mubr.f32.mxu1 %v6839_v23  ;;  %2442 = vmatprep.mubr.f32.mxu0 %v6839_v23 }
 0x340   : > { %3690 = vmatmul.mubr.msk.f32.gmra.mrb[122].mxu1 %vm645_vm0, %v5976_v14  ;;  %3708 = vmatmul.mubr.msk.f32.gmra.mrb[138].mxu0 %vm645_vm0, %v5976_v14 }
 0x341   : > { %2287 = vmatprep.mubr.f32.mxu1 %v6839_v23  ;;  %2448 = vmatprep.mubr.f32.mxu0 %v6839_v23 }
 0x344   : > { %3691 = vmatmul.mubr.msk.f32.gmra.mrb[124].mxu1 %vm645_vm0, %v5993_v3  ;;  %3709 = vmatmul.mubr.msk.f32.gmra.mrb[140].mxu0 %vm645_vm0, %v5993_v3 }
 0x345   : > { %2293 = vmatprep.mubr.f32.mxu1 %v6839_v23  ;;  %2454 = vmatprep.mubr.f32.mxu0 %v6839_v23 }
 0x348   : > { %3692 = vmatmul.mubr.msk.f32.gmra.mrb[126].mxu1 %vm645_vm0, %v6010_v37  ;;  %3710 = vmatmul.mubr.msk.f32.gmra.mrb[142].mxu0 %vm645_vm0, %v6010_v37 }
 0x349   : > { %2299 = vmatprep.mubr.f32.mxu1 %v6839_v23  ;;  %2460 = vmatprep.mubr.f32.mxu0 %v6839_v23 }
 0x34c   : > { %3693 = vmatmul.mubr.msk.f32.gmra.mrb[128].mxu1 %vm645_vm0, %v6027_v8  ;;  %3711 = vmatmul.mubr.msk.f32.gmra.mrb[144].mxu0 %vm645_vm0, %v6027_v8 }
 0x34d   : > { %2305 = vmatprep.mubr.f32.mxu1 %v6839_v23  ;;  %2466 = vmatprep.mubr.f32.mxu0 %v6839_v23 }
 0x350   : > { %3694 = vmatmul.mubr.msk.f32.gmra.mrb[130].mxu1 %vm645_vm0, %v6044_v30  ;;  %3712 = vmatmul.mubr.msk.f32.gmra.mrb[146].mxu0 %vm645_vm0, %v6044_v30 }
 0x351   : > { %2311 = vmatprep.mubr.f32.mxu1 %v6839_v23  ;;  %2472 = vmatprep.mubr.f32.mxu0 %v6839_v23 }
 0x354   : > { %3695 = vmatmul.mubr.msk.f32.gmra.mrb[132].mxu1 %vm645_vm0, %v6061_v25  ;;  %3713 = vmatmul.mubr.msk.f32.gmra.mrb[148].mxu0 %vm645_vm0, %v6061_v25 }
 0x355   : > { %2317 = vmatprep.mubr.f32.mxu1 %v6839_v23  ;;  %2478 = vmatprep.mubr.f32.mxu0 %v6839_v23  ;;  %v4348_v23 = vpack.c.bf16 %v2616_v1, %v2615_v63  ;;  %v2639_v63 = vld [vmem:[#allocation8 + $0xd0] sm:$0xff]  ;;  %v2640_v1 = vld [vmem:[#allocation8 + $0xd8] sm:$0xff] }
 0x358   : > { %3696 = vmatmul.mubr.msk.f32.gmra.mrb[134].mxu1 %vm645_vm0, %v6078_v29  ;;  %3714 = vmatmul.mubr.msk.f32.gmra.mrb[150].mxu0 %vm645_vm0, %v6078_v29 }
 0x359   : > { %4158 = vmatprep.mubr.msk.f32.mxu1 %vm645_vm0, %v5815_v10  ;;  %v2636_v10 = vld [vmem:[#allocation8 + $0xb8] sm:$0xff] }
 0x35c   : > { %4159 = vmatmul.mubr.msk.f32.vlgmr.msra.gmra.mrb[136].mxu1 %vm645_vm0, %v5836_v2  ;;  %v4354_v2 = vpack.c.bf16 %v2636_v10, %v2635_v47  ;;  %v2644_v10 = vld [vmem:[#allocation8 + $0xf8] sm:$0xff] }
 0x35d   : > { %4161 = vmatprep.mubr.msk.f32.mxu1 %vm645_vm0, %v5857_v12  ;;  %4345 = vmatpush3.bf16.msra.mxu1 %v4344_v6  ;;  %v2620_v12 = vld [vmem:[#allocation8 + $0x38] sm:$0xff] }
 0x35e   : > { %4347 = vmatprep.subr.bf16.mxu1 %v4346_v9  ;;  %v4356_v6 = vpack.c.bf16 %v2620_v12, %v2619_v54  ;;  %v2621_v9 = vld [vmem:[#allocation8 + $0x40] sm:$0xff]  ;;  %v2694_v12 = vld [vmem:[#allocation8 + $0x288] sm:$0xff] }
 0x35f   : > { %v2693_v54 = vld [vmem:[#allocation8 + $0x280] sm:$0xff] }
 0x360   : > { %4162 = vmatmul.mubr.msk.f32.gmra.mrb[138].mxu1 %vm645_vm0, %v5874_v34  ;;  %v4358_v34 = vpack.c.bf16 %v2638_v21, %v2637_v4 }
 0x361   : > { %4164 = vmatprep.mubr.msk.f32.mxu1 %vm645_vm0, %v5891_v48  ;;  %4349 = vmatpush3.bf16.msra.mxu1 %v4348_v23  ;;  %v2622_v48 = vld [vmem:[#allocation8 + $0x48] sm:$0xff] }
 0x362   : > { %4351 = vmatprep.subr.bf16.mxu1 %v4350_v56  ;;  %v4360_v47 = vpack.c.bf16 %v2622_v48, %v2621_v9  ;;  %v2642_v23 = vld [vmem:[#allocation8 + $0xe8] sm:$0xff] }
 0x364   : > { %4165 = vmatmul.mubr.msk.f32.gmra.mrb[140].mxu1 %vm645_vm0, %v5908_v26  ;;  %v4362_v26 = vpack.c.bf16 %v2640_v1, %v2639_v63 }
 0x365   : > { %4167 = vmatprep.mubr.msk.f32.mxu1 %vm645_vm0, %v5925_v39  ;;  %4353 = vmatpush3.bf16.msra.mxu1 %v4352_v55  ;;  %v2624_v39 = vld [vmem:[#allocation8 + $0x58] sm:$0xff] }
 0x366   : > { %4355 = vmatprep.subr.bf16.mxu1 %v4354_v2  ;;  %v4364_v56 = vpack.c.bf16 %v2624_v39, %v2623_v31  ;;  %v2627_v2 = vld [vmem:[#allocation8 + $0x70] sm:$0xff] }
 0x368   : > { %4168 = vmatmul.mubr.msk.f32.gmra.mrb[142].mxu1 %vm645_vm0, %v5942_v38  ;;  %v4366_v38 = vpack.c.bf16 %v2642_v23, %v2641_v61 }
 0x369   : > { %4170 = vmatprep.mubr.msk.f32.mxu1 %vm645_vm0, %v5959_v44  ;;  %4357 = vmatpush3.bf16.msra.mxu1 %v4356_v6  ;;  %v2626_v44 = vld [vmem:[#allocation8 + $0x68] sm:$0xff] }
 0x36a   : > { %4359 = vmatprep.subr.bf16.mxu1 %v4358_v34  ;;  %v4368_v55 = vpack.c.bf16 %v2626_v44, %v2625_v24  ;;  %v2677_v24 = vld [vmem:[#allocation8 + $0x200] sm:$0xff]  ;;  %v2678_v44 = vld [vmem:[#allocation8 + $0x208] sm:$0xff] }
 0x36c   : > { %4171 = vmatmul.mubr.msk.f32.gmra.mrb[144].mxu1 %vm645_vm0, %v5976_v14  ;;  %v4370_v14 = vpack.c.bf16 %v2644_v10, %v2643_v49 }
 0x36d   : > { %4173 = vmatprep.mubr.msk.f32.mxu1 %vm645_vm0, %v5993_v3  ;;  %4361 = vmatpush3.bf16.msra.mxu1 %v4360_v47  ;;  %v2628_v3 = vld [vmem:[#allocation8 + $0x78] sm:$0xff] }
 0x36e   : > { %4363 = vmatprep.subr.bf16.mxu1 %v4362_v26  ;;  %v4372_v4 = vpack.c.bf16 %v2628_v3, %v2627_v2 }
 0x370   : > { %4174 = vmatmul.mubr.msk.f32.gmra.mrb[146].mxu1 %vm645_vm0, %v6010_v37  ;;  %v4406_v37 = vpack.c.bf16 %v2694_v12, %v2693_v54  ;;  %v2727_v54 = vld [vmem:[#allocation8 + $0x390] sm:$0xff]  ;;  %v2728_v12 = vld [vmem:[#allocation8 + $0x398] sm:$0xff] }
 0x371   : > { %4176 = vmatprep.mubr.msk.f32.mxu1 %vm645_vm0, %v6027_v8  ;;  %4365 = vmatpush3.bf16.msra.mxu1 %v4364_v56  ;;  %v952_v8 = vlaneseq }
 0x372   : > { %4367 = vmatprep.subr.bf16.mxu1 %v4366_v38 }
 0x373   : > { %v6264_v21 = vshrl.u32 %v952_v8, 7 }
 0x374   : > { %4177 = vmatmul.mubr.msk.f32.gmra.mrb[148].mxu1 %vm645_vm0, %v6044_v30  ;;  %v6268_v30 = vld [vmem:[#allocation7] sm:$0xff] }
 0x375   : > { %4179 = vmatprep.mubr.msk.f32.mxu1 %vm645_vm0, %v6061_v25  ;;  %4369 = vmatpush3.bf16.msra.mxu1 %v4368_v55  ;;  %v954_v6 = vsub.s32 0, %v6264_v21  ;;  %v958_v34 = vsub.s32 1, %v6264_v21  ;;  %v962_v25 = vsub.s32 2, %v6264_v21  ;;  %v966_v9 = vsub.s32 3, %v6264_v21  ;;  %v2710_v55 = vld [vmem:[#allocation8 + $0x308] sm:$0xff] }
 0x376   : > { %4371 = vmatprep.subr.bf16.mxu1 %v4370_v14  ;;  %v2695_v14 = vld [vmem:[#allocation8 + $0x290] sm:$0xff] }
 0x377   : > { %v6273_v48 = vrot.slane %v6268_v30, %v954_v6  ;;  %v6279_v63 = vrot.slane %v6268_v30, %v962_v25  ;;  %v6282_v1 = vrot.slane %v6268_v30, %v966_v9 }
 0x378   : > { %4180 = vmatmul.mubr.msk.f32.gmra.mrb[150].mxu1 %vm645_vm0, %v6078_v29  ;;  %v6276_v29 = vrot.slane %v6268_v30, %v958_v34 }
 0x379   : > { %4373 = vmatpush3.bf16.msra.mxu1 %v4372_v4  ;;  %v1059_v47 = vadd.f32 %v5728_v33, %v6273_v48  ;;  %v1065_v31 = vadd.f32 %v5732_v41, %v6273_v48  ;;  %v1220_v61 = vadd.f32 %v5764_v13, %v6279_v63  ;;  %v1222_v23 = vadd.f32 %v5766_v15, %v6282_v1  ;;  %v2709_v41 = vld [vmem:[#allocation8 + $0x300] sm:$0xff]  ;;  %v2696_v15 = vld [vmem:[#allocation8 + $0x298] sm:$0xff] }
 0x37a   : > { %4407 = vmatprep.subr.bf16.mxu1 %v4406_v37  ;;  %v1061_v26 = vadd.f32 %v5730_v35, %v6276_v29  ;;  %v1067_v39 = vadd.f32 %v5734_v42, %v6276_v29  ;;  %v1226_v35 = vadd.f32 %v5772_v58, %v6279_v63  ;;  %v1228_v13 = vadd.f32 %v5774_v5, %v6282_v1 }
 0x37b   : > { %v1636_v56 = vmax.f32 %v1059_v47, 0.0  ;;  %v1644_v33 = vmax.f32 %v1065_v31, 0.0  ;;  %v1638_v10 = vmax.f32 %v1220_v61, 0.0  ;;  %v1639_v42 = vmax.f32 %v1222_v23, 0.0  ;;  %v6310_v31 = vld [vmem:[#allocation8 + $0x218] sm:$0xff] }
 0x37c   : > { %v1637_v38 = vmax.f32 %v1061_v26, 0.0  ;;  %v1645_v49 = vmax.f32 %v1067_v39, 0.0  ;;  %v6302_v4 = vadd.f32 %v5736_v43, %v6273_v48  ;;  %v6306_v37 = vadd.f32 %v5738_v45, %v6276_v29  ;;  %v6308_v26 = vld [vmem:[#allocation8 + $0x210] sm:$0xff] }
 0x37d   : > { %v4408_v5 = vpack.c.bf16 %v2678_v44, %v2677_v24  ;;  %v4440_v47 = vpack.c.bf16 %v2710_v55, %v2709_v41  ;;  %v1646_v39 = vmax.f32 %v1226_v35, 0.0  ;;  %v1232_v43 = vadd.f32 %v5780_v7, %v6279_v63  ;;  %v2711_v45 = vld [vmem:[#allocation8 + $0x310] sm:$0xff]  ;;  %v2698_v41 = vld [vmem:[#allocation8 + $0x2a8] sm:$0xff]  ;;  %v2729_v55 = vld [vmem:[#allocation8 + $0x3a0] sm:$0xff] }
 0x37e   : > { %v4410_v61 = vpack.c.bf16 %v2696_v15, %v2695_v14  ;;  %v4442_v23 = vpack.c.bf16 %v2728_v12, %v2727_v54  ;;  %v6322_v24 = vadd.f32 %v5742_v46, %v6276_v29  ;;  %v1647_v44 = vmax.f32 %v1228_v13, 0.0  ;;  %v2730_v14 = vld [vmem:[#allocation8 + $0x3a8] sm:$0xff] }
 0x37f   : > { %v4412_v46 = vpack.c.bf16 %v6310_v31, %v6308_v26  ;;  %v4444_v12 = vpack.c.bf16 %v2712_v18, %v2711_v45  ;;  %v6341_v18 = vadd.f32 %v5744_v36, %v6273_v48  ;;  %v2700_v31 = vld [vmem:[#allocation8 + $0x2b8] sm:$0xff] }
 0x3af   : > { %v1907_v2 = vpop.f32.mrb[72].mxu1  ;;  %v2068_v3 = vpop.f32.mrb[88].mxu0 }
 0x3b0   : > { %v2485_v58 = vmul.f32 %v1907_v2, %v1636_v56  ;;  %v2487_v8 = vmul.f32 %v2068_v3, %v1638_v10  ;;  %v1909_v6 = vpop.f32.mrb[73].mxu1  ;;  %v2070_v34 = vpop.f32.mrb[89].mxu0  ;;  %v6314_v56 = vld [vmem:[#allocation8 + $0x2a0] sm:$0xff]  ;;  %v1234_v10 = vadd.f32 %v5782_v50, %v6282_v1  ;;  %v1653_v50 = vmax.f32 %v6306_v37, 0.0  ;;  %v2714_v37 = vld [vmem:[#allocation8 + $0x328] sm:$0xff] }
 0x3b1   : > { %v2486_v25 = vmul.f32 %v1909_v6, %v1637_v38  ;;  %v2488_v9 = vmul.f32 %v2070_v34, %v1639_v42  ;;  %v6318_v38 = vadd.f32 %v5740_v62, %v6273_v48  ;;  %v1652_v42 = vmax.f32 %v6302_v4, 0.0  ;;  %v6330_v6 = vld [vmem:[#allocation8 + $0x220] sm:$0xff]  ;;  %v6332_v34 = vld [vmem:[#allocation8 + $0x228] sm:$0xff] }
 0x3b2   : > { %v1238_v4 = vadd.f32 %v5788_v60, %v6279_v63  ;;  %v1240_v60 = vadd.f32 %v5790_v52, %v6282_v1  ;;  %v1661_v52 = vmax.f32 %v6322_v24, 0.0  ;;  %v2716_v24 = vld [vmem:[#allocation8 + $0x338] sm:$0xff] }
 0x3b3   : > { %v1913_v35 = vpop.f32.mrb[74].mxu1  ;;  %v2074_v7 = vpop.f32.mrb[90].mxu0  ;;  %2954 = vmatprep.mubr.f32.mxu1 %v2486_v25  ;;  %3099 = vmatprep.mubr.f32.mxu0 %v2488_v9  ;;  %v2713_v25 = vld [vmem:[#allocation8 + $0x320] sm:$0xff]  ;;  %v6345_v9 = vadd.f32 %v5746_v0, %v6276_v29  ;;  %v4416_v0 = vpack.c.bf16 %v6332_v34, %v6330_v6  ;;  %v2734_v6 = vld [vmem:[#allocation8 + $0x3c8] sm:$0xff]  ;;  %v1668_v34 = vmax.f32 %v6341_v18, 0.0 }
 0x3b4   : > { %v2493_v2 = vmul.f32 %v1913_v35, %v1644_v33  ;;  %v2495_v62 = vmul.f32 %v2074_v7, %v1646_v39  ;;  %v1915_v3 = vpop.f32.mrb[75].mxu1  ;;  %v2076_v15 = vpop.f32.mrb[91].mxu0  ;;  %2955 = vmatmul.mubr.f32.vlgmr.msra.gmra.mrb[152].mxu1 %v2485_v58  ;;  %3100 = vmatmul.mubr.f32.vlgmr.msra.gmra.mrb[152].mxu0 %v2487_v8  ;;  %v1654_v33 = vmax.f32 %v1232_v43, 0.0  ;;  %v4414_v58 = vpack.c.bf16 %v2698_v41, %v6314_v56  ;;  %v2731_v39 = vld [vmem:[#allocation8 + $0x3b0] sm:$0xff]  ;;  %v2732_v43 = vld [vmem:[#allocation8 + $0x3b8] sm:$0xff] }
 0x3b5   : > { %v2494_v13 = vmul.f32 %v1915_v3, %v1645_v49  ;;  %v2496_v54 = vmul.f32 %v2076_v15, %v1647_v44  ;;  %4409 = vmatpush3.bf16.msra.mxu1 %v4408_v5  ;;  %4441 = vmatpush3.bf16.msra.mxu0 %v4440_v47  ;;  %v4446_v8 = vpack.c.bf16 %v2730_v14, %v2729_v55  ;;  %v6337_v49 = vld [vmem:[#allocation8 + $0x2b0] sm:$0xff]  ;;  %v1655_v5 = vmax.f32 %v1234_v10, 0.0  ;;  %v6355_v41 = vld [vmem:[#allocation8 + $0x238] sm:$0xff] }
 0x3b6   : > { %4411 = vmatprep.subr.bf16.mxu1 %v4410_v61  ;;  %4443 = vmatprep.subr.bf16.mxu0 %v4442_v23  ;;  %v1660_v61 = vmax.f32 %v6318_v38, 0.0  ;;  %v4448_v35 = vpack.c.bf16 %v2714_v37, %v2713_v25  ;;  %v6353_v7 = vld [vmem:[#allocation8 + $0x230] sm:$0xff]  ;;  %v1662_v38 = vmax.f32 %v1238_v4, 0.0  ;;  %v1244_v55 = vadd.f32 %v5796_v11, %v6279_v63 }
 0x3b7   : > { %v1919_v47 = vpop.f32.mrb[76].mxu1  ;;  %v2080_v26 = vpop.f32.mrb[92].mxu0  ;;  %2959 = vmatprep.mubr.f32.mxu1 %v2494_v13  ;;  %3104 = vmatprep.mubr.f32.mxu0 %v2496_v54  ;;  %v4418_v14 = vpack.c.bf16 %v2700_v31, %v6337_v49  ;;  %v6364_v3 = vadd.f32 %v5748_v51, %v6273_v48  ;;  %v6368_v15 = vadd.f32 %v5750_v53, %v6276_v29  ;;  %v2702_v54 = vld [vmem:[#allocation8 + $0x2c8] sm:$0xff]  ;;  %v6376_v49 = vld [vmem:[#allocation8 + $0x240] sm:$0xff] }
 0x3b8   : > { %v2501_v23 = vmul.f32 %v1919_v47, %v1652_v42  ;;  %v2503_v36 = vmul.f32 %v2080_v26, %v1654_v33  ;;  %v1921_v45 = vpop.f32.mrb[77].mxu1  ;;  %v2082_v56 = vpop.f32.mrb[93].mxu0  ;;  %2960 = vmatmul.mubr.f32.gmra.mrb[154].mxu1 %v2493_v2  ;;  %3105 = vmatmul.mubr.f32.gmra.mrb[154].mxu0 %v2495_v62  ;;  %v4450_v42 = vpack.c.bf16 %v2732_v43, %v2731_v39  ;;  %v2715_v2 = vld [vmem:[#allocation8 + $0x330] sm:$0xff]  ;;  %v6360_v62 = vld [vmem:[#allocation8 + $0x2c0] sm:$0xff]  ;;  %v1670_v18 = vmax.f32 %v1244_v55, 0.0 }
 0x3b9   : > { %v2502_v44 = vmul.f32 %v1921_v45, %v1653_v50  ;;  %v2504_v10 = vmul.f32 %v2082_v56, %v1655_v5  ;;  %4413 = vmatpush3.bf16.msra.mxu1 %v4412_v46  ;;  %4445 = vmatpush3.bf16.msra.mxu0 %v4444_v12  ;;  %v1663_v46 = vmax.f32 %v1240_v60, 0.0  ;;  %v1246_v11 = vadd.f32 %v5798_v16, %v6282_v1  ;;  %v2733_v12 = vld [vmem:[#allocation8 + $0x3c0] sm:$0xff]  ;;  %v6378_v5 = vld [vmem:[#allocation8 + $0x248] sm:$0xff]  ;;  %v6383_v39 = vld [vmem:[#allocation8 + $0x2d0] sm:$0xff] }
 0x3ba   : > { %4415 = vmatprep.subr.bf16.mxu1 %v4414_v58  ;;  %4447 = vmatprep.subr.bf16.mxu0 %v4446_v8  ;;  %v4420_v53 = vpack.c.bf16 %v6355_v41, %v6353_v7  ;;  %v1669_v16 = vmax.f32 %v6345_v9, 0.0  ;;  %v4452_v37 = vpack.c.bf16 %v2716_v24, %v2715_v2  ;;  %v1250_v60 = vadd.f32 %v5804_v22, %v6279_v63  ;;  %v2717_v31 = vld [vmem:[#allocation8 + $0x340] sm:$0xff]  ;;  %v2718_v9 = vld [vmem:[#allocation8 + $0x348] sm:$0xff]  ;;  %v2704_v56 = vld [vmem:[#allocation8 + $0x2d8] sm:$0xff] }
 0x3bb   : > { %v1925_v50 = vpop.f32.mrb[78].mxu1  ;;  %v2086_v13 = vpop.f32.mrb[94].mxu0  ;;  %2964 = vmatprep.mubr.f32.mxu1 %v2502_v44  ;;  %3109 = vmatprep.mubr.f32.mxu0 %v2504_v10  ;;  %v4422_v47 = vpack.c.bf16 %v2702_v54, %v6360_v62  ;;  %v4454_v26 = vpack.c.bf16 %v2734_v6, %v2733_v12  ;;  %v6387_v43 = vadd.f32 %v5752_v19, %v6273_v48  ;;  %v1676_v44 = vmax.f32 %v6364_v3, 0.0 }
 0x3bc   : > { %v2509_v33 = vmul.f32 %v1925_v50, %v1660_v61  ;;  %v2511_v51 = vmul.f32 %v2086_v13, %v1662_v38  ;;  %v1927_v4 = vpop.f32.mrb[79].mxu1  ;;  %v2088_v58 = vpop.f32.mrb[95].mxu0  ;;  %2965 = vmatmul.mubr.f32.gmra.mrb[156].mxu1 %v2501_v23  ;;  %3110 = vmatmul.mubr.f32.gmra.mrb[156].mxu0 %v2503_v36  ;;  %v6391_v61 = vadd.f32 %v5754_v57, %v6276_v29  ;;  %v1671_v23 = vmax.f32 %v1246_v11, 0.0  ;;  %v6406_v11 = vld [vmem:[#allocation8 + $0x2e0] sm:$0xff] }
 0x3bd   : > { %v2510_v8 = vmul.f32 %v1927_v4, %v1661_v52  ;;  %v2512_v25 = vmul.f32 %v2088_v58, %v1663_v46  ;;  %4417 = vmatpush3.bf16.msra.mxu1 %v4416_v0  ;;  %4449 = vmatpush3.bf16.msra.mxu0 %v4448_v35  ;;  %v1252_v22 = vadd.f32 %v5806_v28, %v6282_v1  ;;  %v2735_v0 = vld [vmem:[#allocation8 + $0x3d0] sm:$0xff]  ;;  %v2736_v52 = vld [vmem:[#allocation8 + $0x3d8] sm:$0xff]  ;;  %v1677_v28 = vmax.f32 %v6368_v15, 0.0 }
 0x3be   : > { %4419 = vmatprep.subr.bf16.mxu1 %v4418_v14  ;;  %4451 = vmatprep.subr.bf16.mxu0 %v4450_v42  ;;  %v4424_v57 = vpack.c.bf16 %v6378_v5, %v6376_v49  ;;  %v4456_v55 = vpack.c.bf16 %v2718_v9, %v2717_v31  ;;  %v6399_v14 = vld [vmem:[#allocation8 + $0x250] sm:$0xff]  ;;  %v6401_v42 = vld [vmem:[#allocation8 + $0x258] sm:$0xff]  ;;  %v1678_v2 = vmax.f32 %v1250_v60, 0.0  ;;  %v1256_v24 = vadd.f32 %v5812_v17, %v6279_v63  ;;  %v2706_v17 = vld [vmem:[#allocation8 + $0x2e8] sm:$0xff] }
 0x3bf   : > { %v1931_v36 = vpop.f32.mrb[80].mxu1  ;;  %v2092_v45 = vpop.f32.mrb[96].mxu0  ;;  %2969 = vmatprep.mubr.f32.mxu1 %v2510_v8  ;;  %3114 = vmatprep.mubr.f32.mxu0 %v2512_v25  ;;  %v4426_v62 = vpack.c.bf16 %v2704_v56, %v6383_v39  ;;  %v4458_v3 = vpack.c.bf16 %v2736_v52, %v2735_v0  ;;  %v2719_v46 = vld [vmem:[#allocation8 + $0x350] sm:$0xff]  ;;  %v2720_v15 = vld [vmem:[#allocation8 + $0x358] sm:$0xff]  ;;  %v6410_v50 = vadd.f32 %v5756_v59, %v6273_v48  ;;  %v1679_v13 = vmax.f32 %v1252_v22, 0.0  ;;  %v2689_v49 = vld [vmem:[#allocation8 + $0x260] sm:$0xff] }
 0x3c0   : > { %v2517_v10 = vmul.f32 %v1931_v36, %v1668_v34  ;;  %v2519_v19 = vmul.f32 %v2092_v45, %v1670_v18  ;;  %v1933_v35 = vpop.f32.mrb[81].mxu1  ;;  %v2094_v7 = vpop.f32.mrb[97].mxu0  ;;  %2970 = vmatmul.mubr.f32.gmra.mrb[158].mxu1 %v2509_v33  ;;  %3115 = vmatmul.mubr.f32.gmra.mrb[158].mxu0 %v2511_v51  ;;  %v1258_v54 = vadd.f32 %v5817_v20, %v6282_v1  ;;  %v2737_v34 = vld [vmem:[#allocation8 + $0x3e0] sm:$0xff]  ;;  %v2738_v33 = vld [vmem:[#allocation8 + $0x3e8] sm:$0xff]  ;;  %v1684_v51 = vmax.f32 %v6387_v43, 0.0  ;;  %v2707_v43 = vld [vmem:[#allocation8 + $0x2f0] sm:$0xff] }
 0x3c1   : > { %v2518_v41 = vmul.f32 %v1933_v35, %v1669_v16  ;;  %v2520_v38 = vmul.f32 %v2094_v7, %v1671_v23  ;;  %4421 = vmatpush3.bf16.msra.mxu1 %v4420_v53  ;;  %4453 = vmatpush3.bf16.msra.mxu0 %v4452_v37  ;;  %v4428_v59 = vpack.c.bf16 %v6401_v42, %v6399_v14  ;;  %v1685_v20 = vmax.f32 %v6391_v61, 0.0  ;;  %v2690_v5 = vld [vmem:[#allocation8 + $0x268] sm:$0xff]  ;;  %v2721_v9 = vld [vmem:[#allocation8 + $0x360] sm:$0xff]  ;;  %v6921_v56 = vld [vmem:[#allocation36_spill] sm:$0xff] }
 0x3c2   : > { %4423 = vmatprep.subr.bf16.mxu1 %v4422_v47  ;;  %4455 = vmatprep.subr.bf16.mxu0 %v4454_v26  ;;  %v4460_v37 = vpack.c.bf16 %v2720_v15, %v2719_v46  ;;  %v1686_v18 = vmax.f32 %v1256_v24, 0.0  ;;  %v6918_v60 = vld [vmem:[#allocation35_spill] sm:$0xff]  ;;  %v4430_v26 = vpack.c.bf16 %v2706_v17, %v6406_v11  ;;  %v4462_v31 = vpack.c.bf16 %v2738_v33, %v2737_v34  ;;  %v6919_v61 = vld [vmem:[#allocation18_spill] sm:$0xff]  ;;  %v2740_v35 = vld [vmem:[#allocation8 + $0x3f8] sm:$0xff] }
 0x3c3   : > { %v1937_v12 = vpop.f32.mrb[82].mxu1  ;;  %v2098_v6 = vpop.f32.mrb[98].mxu0  ;;  %2974 = vmatprep.mubr.f32.mxu1 %v2518_v41  ;;  %3119 = vmatprep.mubr.f32.mxu0 %v2520_v38  ;;  %v1262_v47 = vadd.f32 %v6918_v60, %v6279_v63  ;;  %v2722_v39 = vld [vmem:[#allocation8 + $0x368] sm:$0xff]  ;;  %v1103_v23 = vadd.f32 %v6919_v61, %v6276_v29  ;;  %v1687_v45 = vmax.f32 %v1258_v54, 0.0  ;;  %v1264_v0 = vadd.f32 %v6921_v56, %v6282_v1  ;;  %v2691_v24 = vld [vmem:[#allocation8 + $0x270] sm:$0xff] }
 0x3c4   : > { %v2525_v4 = vmul.f32 %v1937_v12, %v1676_v44  ;;  %v2527_v58 = vmul.f32 %v2098_v6, %v1678_v2  ;;  %v1939_v53 = vpop.f32.mrb[83].mxu1  ;;  %v2100_v16 = vpop.f32.mrb[99].mxu0  ;;  %2975 = vmatmul.mubr.f32.gmra.mrb[160].mxu1 %v2517_v10  ;;  %3120 = vmatmul.mubr.f32.gmra.mrb[160].mxu0 %v2519_v19  ;;  %v6920_v22 = vld [vmem:[#allocation19_spill] sm:$0xff]  ;;  %v2708_v10 = vld [vmem:[#allocation8 + $0x2f8] sm:$0xff]  ;;  %v4432_v38 = vpack.c.bf16 %v2690_v5, %v2689_v49 }
 0x3c5   : > { %v2526_v8 = vmul.f32 %v1939_v53, %v1677_v28  ;;  %v2528_v25 = vmul.f32 %v2100_v16, %v1679_v13  ;;  %4425 = vmatpush3.bf16.msra.mxu1 %v4424_v57  ;;  %4457 = vmatpush3.bf16.msra.mxu0 %v4456_v55  ;;  %v6425_v36 = vadd.f32 %v6920_v22, %v6273_v48  ;;  %v2739_v19 = vld [vmem:[#allocation8 + $0x3f0] sm:$0xff]  ;;  %v1692_v55 = vmax.f32 %v6410_v50, 0.0  ;;  %v2724_v12 = vld [vmem:[#allocation8 + $0x378] sm:$0xff] }
 0x3c6   : > { %4427 = vmatprep.subr.bf16.mxu1 %v4426_v62  ;;  %4459 = vmatprep.subr.bf16.mxu0 %v4458_v3  ;;  %v4464_v2 = vpack.c.bf16 %v2722_v39, %v2721_v9  ;;  %v2692_v62 = vld [vmem:[#allocation8 + $0x278] sm:$0xff]  ;;  %v1694_v3 = vmax.f32 %v1262_v47, 0.0  ;;  %v6922_v46 = vld [vmem:[#allocation39_spill] sm:$0xff]  ;;  %v4434_v11 = vpack.c.bf16 %v2708_v10, %v2707_v43  ;;  %v4466_v13 = vpack.c.bf16 %v2740_v35, %v2739_v19  ;;  %v6927_v39 = vld [vmem:[#allocation22_spill] sm:$0xff] }
 0x3c7   : > { %v1943_v52 = vpop.f32.mrb[84].mxu1  ;;  %v2104_v44 = vpop.f32.mrb[100].mxu0  ;;  %2979 = vmatprep.mubr.f32.mxu1 %v2526_v8  ;;  %3124 = vmatprep.mubr.f32.mxu0 %v2528_v25  ;;  %v1268_v15 = vadd.f32 %v6922_v46, %v6279_v63  ;;  %v2723_v54 = vld [vmem:[#allocation8 + $0x370] sm:$0xff]  ;;  %v1693_v6 = vmax.f32 %v1103_v23, 0.0  ;;  %v1695_v34 = vmax.f32 %v1264_v0, 0.0  ;;  %v4436_v8 = vpack.c.bf16 %v2692_v62, %v2691_v24 }
 0x3c8   : > { %v2533_v7 = vmul.f32 %v1943_v52, %v1684_v51  ;;  %v2535_v57 = vmul.f32 %v2104_v44, %v1686_v18  ;;  %v1945_v28 = vpop.f32.mrb[85].mxu1  ;;  %v2106_v41 = vpop.f32.mrb[101].mxu0  ;;  %2980 = vmatmul.mubr.f32.gmra.mrb[162].mxu1 %v2525_v4  ;;  %3125 = vmatmul.mubr.f32.gmra.mrb[162].mxu0 %v2527_v58  ;;  %v6923_v50 = vld [vmem:[#allocation20_spill] sm:$0xff]  ;;  %v4468_v49 = vpack.c.bf16 %v2724_v12, %v2723_v54  ;;  %v1700_v5 = vmax.f32 %v6425_v36, 0.0  ;;  %v6925_v18 = vld [vmem:[#allocation21_spill] sm:$0xff] }
 0x3c9   : > { %v2534_v14 = vmul.f32 %v1945_v28, %v1685_v20  ;;  %v2536_v42 = vmul.f32 %v2106_v41, %v1687_v45  ;;  %4429 = vmatpush3.bf16.msra.mxu1 %v4428_v59  ;;  %4461 = vmatpush3.bf16.msra.mxu0 %v4460_v37  ;;  %v1109_v17 = vadd.f32 %v6923_v50, %v6276_v29  ;;  %v6924_v33 = vld [vmem:[#allocation40_spill] sm:$0xff]  ;;  %v1702_v47 = vmax.f32 %v1268_v15, 0.0  ;;  %v6930_v41 = vld [vmem:[#allocation47_spill] sm:$0xff] }
 0x3ca   : > { %4431 = vmatprep.subr.bf16.mxu1 %v4430_v26  ;;  %4463 = vmatprep.subr.bf16.mxu0 %v4462_v31  ;;  %v1270_v51 = vadd.f32 %v6924_v33, %v6282_v1  ;;  %v1113_v60 = vadd.f32 %v6925_v18, %v6273_v48  ;;  %v6926_v26 = vld [vmem:[#allocation43_spill] sm:$0xff]  ;;  %v1115_v43 = vadd.f32 %v6927_v39, %v6276_v29  ;;  %v6928_v23 = vld [vmem:[#allocation44_spill] sm:$0xff] }
 0x3cb   : > { %v1949_v4 = vpop.f32.mrb[86].mxu1  ;;  %v2110_v58 = vpop.f32.mrb[102].mxu0  ;;  %2984 = vmatprep.mubr.f32.mxu1 %v2534_v14  ;;  %3129 = vmatprep.mubr.f32.mxu0 %v2536_v42  ;;  %v1274_v31 = vadd.f32 %v6926_v26, %v6279_v63  ;;  %v1701_v9 = vmax.f32 %v1109_v17, 0.0  ;;  %v1276_v22 = vadd.f32 %v6928_v23, %v6282_v1  ;;  %v6931_v14 = vld [vmem:[#allocation24_spill] sm:$0xff]  ;;  %v6933_v17 = vld [vmem:[#allocation25_spill] sm:$0xff] }
 0x3cc   : > { %v2541_v53 = vmul.f32 %v1949_v4, %v1692_v55  ;;  %v2543_v16 = vmul.f32 %v2110_v58, %v1694_v3  ;;  %v1951_v59 = vpop.f32.mrb[87].mxu1  ;;  %v2112_v20 = vpop.f32.mrb[103].mxu0  ;;  %2985 = vmatmul.mubr.f32.gmra.mrb[164].mxu1 %v2533_v7  ;;  %3130 = vmatmul.mubr.f32.gmra.mrb[164].mxu0 %v2535_v57  ;;  %v1703_v61 = vmax.f32 %v1270_v51, 0.0  ;;  %v1708_v35 = vmax.f32 %v1113_v60, 0.0  ;;  %v6929_v7 = vld [vmem:[#allocation23_spill] sm:$0xff]  ;;  %v6932_v24 = vld [vmem:[#allocation48_spill] sm:$0xff] }
 0x3cd   : > { %v2542_v25 = vmul.f32 %v1951_v59, %v1693_v6  ;;  %v2544_v37 = vmul.f32 %v2112_v20, %v1695_v34  ;;  %4433 = vmatpush3.bf16.msra.mxu1 %v4432_v38  ;;  %4465 = vmatpush3.bf16.msra.mxu0 %v4464_v2  ;;  %v1119_v57 = vadd.f32 %v6929_v7, %v6273_v48  ;;  %v1710_v28 = vmax.f32 %v1274_v31, 0.0  ;;  %v6934_v51 = vld [vmem:[#allocation51_spill] sm:$0xff]  ;;  %v6936_v20 = vld [vmem:[#allocation52_spill] sm:$0xff] }
 0x3ce   : > { %4435 = vmatprep.subr.bf16.mxu1 %v4434_v11  ;;  %4467 = vmatprep.subr.bf16.mxu0 %v4466_v13  ;;  %v1280_v38 = vadd.f32 %v6930_v41, %v6279_v63  ;;  %v1709_v55 = vmax.f32 %v1115_v43, 0.0  ;;  %v1121_v42 = vadd.f32 %v6931_v14, %v6276_v29  ;;  %v1711_v2 = vmax.f32 %v1276_v22, 0.0 }
 0x3cf   : > { %v1955_v45 = vpop.f32.mrb[88].mxu1  ;;  %v2116_v56 = vpop.f32.mrb[104].mxu0  ;;  %2989 = vmatprep.mubr.f32.mxu1 %v2542_v25  ;;  %3134 = vmatprep.mubr.f32.mxu0 %v2544_v37  ;;  %v1282_v62 = vadd.f32 %v6932_v24, %v6282_v1  ;;  %v1716_v50 = vmax.f32 %v1119_v57, 0.0  ;;  %v1125_v34 = vadd.f32 %v6933_v17, %v6273_v48  ;;  %v1286_v4 = vadd.f32 %v6934_v51, %v6279_v63  ;;  %v6946_v17 = vld [vmem:[#allocation32_spill] sm:$0xff] }
 0x3d0   : > { %v2549_v36 = vmul.f32 %v1955_v45, %v1700_v5  ;;  %v2551_v0 = vmul.f32 %v2116_v56, %v1702_v47  ;;  %v1957_v52 = vpop.f32.mrb[89].mxu1  ;;  %v2118_v44 = vpop.f32.mrb[105].mxu0  ;;  %2990 = vmatmul.mubr.f32.gmra.mrb[166].mxu1 %v2541_v53  ;;  %3135 = vmatmul.mubr.f32.gmra.mrb[166].mxu0 %v2543_v16  ;;  %v1718_v33 = vmax.f32 %v1280_v38, 0.0  ;;  %v1717_v58 = vmax.f32 %v1121_v42, 0.0  ;;  %v6935_v53 = vld [vmem:[#allocation26_spill] sm:$0xff]  ;;  %v6939_v45 = vld [vmem:[#allocation28_spill] sm:$0xff] }
 0x3d1   : > { %v2550_v10 = vmul.f32 %v1957_v52, %v1701_v9  ;;  %v2552_v19 = vmul.f32 %v2118_v44, %v1703_v61  ;;  %4437 = vmatpush3.bf16.msra.mxu1 %v4436_v8  ;;  %4469 = vmatpush3.bf16.msra.mxu0 %v4468_v49  ;;  %v1127_v16 = vadd.f32 %v6935_v53, %v6276_v29  ;;  %v1719_v59 = vmax.f32 %v1282_v62, 0.0  ;;  %v6937_v9 = vld [vmem:[#allocation27_spill] sm:$0xff]  ;;  %v6942_v38 = vld [vmem:[#allocation30_spill] sm:$0xff] }
 0x3d2   : > { %v1288_v8 = vadd.f32 %v6936_v20, %v6282_v1  ;;  %v1724_v31 = vmax.f32 %v1125_v34, 0.0  ;;  %v1131_v39 = vadd.f32 %v6937_v9, %v6273_v48  ;;  %v1726_v43 = vmax.f32 %v1286_v4, 0.0  ;;  %v6938_v61 = vld [vmem:[#allocation55_spill] sm:$0xff] }
 0x3d3   : > { %v1961_v3 = vpop.f32.mrb[90].mxu1  ;;  %v2122_v46 = vpop.f32.mrb[106].mxu0  ;;  %2994 = vmatprep.mubr.f32.mxu1 %v2550_v10  ;;  %3139 = vmatprep.mubr.f32.mxu0 %v2552_v19  ;;  %v1292_v23 = vadd.f32 %v6938_v61, %v6279_v63  ;;  %v1725_v22 = vmax.f32 %v1127_v16, 0.0  ;;  %v1133_v56 = vadd.f32 %v6939_v45, %v6276_v29  ;;  %v6943_v62 = vld [vmem:[#allocation59_spill] sm:$0xff]  ;;  %v1145_v34 = vadd.f32 %v6946_v17, %v6276_v29 }
 0x3d4   : > { %v2557_v15 = vmul.f32 %v1961_v3, %v1708_v35  ;;  %v2559_v11 = vmul.f32 %v2122_v46, %v1710_v28  ;;  %v1963_v13 = vpop.f32.mrb[91].mxu1  ;;  %v2124_v54 = vpop.f32.mrb[107].mxu0  ;;  %2995 = vmatmul.mubr.f32.gmra.mrb[168].mxu1 %v2549_v36  ;;  %3140 = vmatmul.mubr.f32.gmra.mrb[168].mxu0 %v2551_v0  ;;  %v1727_v36 = vmax.f32 %v1288_v8, 0.0  ;;  %v6940_v0 = vld [vmem:[#allocation56_spill] sm:$0xff]  ;;  %v6941_v28 = vld [vmem:[#allocation29_spill] sm:$0xff]  ;;  %v1298_v3 = vadd.f32 %v6943_v62, %v6279_v63 }
 0x3d5   : > { %v2558_v12 = vmul.f32 %v1963_v13, %v1709_v55  ;;  %v2560_v6 = vmul.f32 %v2124_v54, %v1711_v2  ;;  %v1294_v52 = vadd.f32 %v6940_v0, %v6282_v1  ;;  %v1137_v41 = vadd.f32 %v6941_v28, %v6273_v48  ;;  %v6945_v54 = vld [vmem:[#allocation60_spill] sm:$0xff] }
 0x3d6   : > { %v1139_v55 = vadd.f32 %v6942_v38, %v6276_v29  ;;  %v1732_v2 = vmax.f32 %v1131_v39, 0.0  ;;  %v1734_v24 = vmax.f32 %v1292_v23, 0.0  ;;  %v1733_v46 = vmax.f32 %v1133_v56, 0.0 }
 0x3d7   : > { %v1967_v25 = vpop.f32.mrb[92].mxu1  ;;  %v2128_v37 = vpop.f32.mrb[108].mxu0  ;;  %2999 = vmatprep.mubr.f32.mxu1 %v2558_v12  ;;  %3144 = vmatprep.mubr.f32.mxu0 %v2560_v6  ;;  %v1735_v13 = vmax.f32 %v1294_v52, 0.0  ;;  %v1300_v12 = vadd.f32 %v6945_v54, %v6282_v1  ;;  %v1740_v53 = vmax.f32 %v1137_v41, 0.0  ;;  %v970_v8 = vsub.s32 4, %v6264_v21  ;;  %v6950_v52 = vld [vmem:[#allocation34_spill] sm:$0xff] }
 0x3d8   : > { %v2565_v49 = vmul.f32 %v1967_v25, %v1716_v50  ;;  %v2567_v5 = vmul.f32 %v2128_v37, %v1718_v33  ;;  %v1969_v18 = vpop.f32.mrb[93].mxu1  ;;  %v2130_v60 = vpop.f32.mrb[109].mxu0  ;;  %3000 = vmatmul.mubr.f32.gmra.mrb[170].mxu1 %v2557_v15  ;;  %3145 = vmatmul.mubr.f32.gmra.mrb[170].mxu0 %v2559_v11  ;;  %v6944_v15 = vld [vmem:[#allocation31_spill] sm:$0xff]  ;;  %v1741_v16 = vmax.f32 %v1139_v55, 0.0  ;;  %v1742_v25 = vmax.f32 %v1298_v3, 0.0 }
 0x3d9   : > { %v2566_v47 = vmul.f32 %v1969_v18, %v1717_v58  ;;  %v2568_v26 = vmul.f32 %v2130_v60, %v1719_v59  ;;  %v1143_v11 = vadd.f32 %v6944_v15, %v6273_v48  ;;  %v6947_v37 = vld [vmem:[#allocation63_spill] sm:$0xff]  ;;  %v974_v18 = vsub.s32 5, %v6264_v21 }
 0x3da   : > { %v1743_v60 = vmax.f32 %v1300_v12, 0.0  ;;  %v1749_v61 = vmax.f32 %v1145_v34, 0.0  ;;  %v6956_v34 = vld [vmem:[#allocation72_spill] sm:$0xff] }
 0x3db   : > { %v1973_v44 = vpop.f32.mrb[94].mxu1  ;;  %v2134_v10 = vpop.f32.mrb[110].mxu0  ;;  %3004 = vmatprep.mubr.f32.mxu1 %v2566_v47  ;;  %3149 = vmatprep.mubr.f32.mxu0 %v2568_v26  ;;  %v6948_v47 = vld [vmem:[#allocation64_spill] sm:$0xff]  ;;  %v6502_v41 = vrot.slane %v6268_v30, %v974_v18  ;;  %v6958_v18 = vld [vmem:[#allocation75_spill] sm:$0xff] }
 0x3dc   : > { %v2573_v19 = vmul.f32 %v1973_v44, %v1724_v31  ;;  %v2575_v35 = vmul.f32 %v2134_v10, %v1726_v43  ;;  %v1975_v7 = vpop.f32.mrb[95].mxu1  ;;  %v2136_v57 = vpop.f32.mrb[111].mxu0  ;;  %3005 = vmatmul.mubr.f32.gmra.mrb[172].mxu1 %v2565_v49  ;;  %3150 = vmatmul.mubr.f32.gmra.mrb[172].mxu0 %v2567_v5  ;;  %v1304_v49 = vadd.f32 %v6947_v37, %v6279_v63  ;;  %v978_v5 = vsub.s32 6, %v6264_v21  ;;  %v6957_v37 = vld [vmem:[#allocation41_spill] sm:$0xff] }
 0x3dd   : > { %v2574_v14 = vmul.f32 %v1975_v7, %v1725_v22  ;;  %v2576_v42 = vmul.f32 %v2136_v57, %v1727_v36  ;;  %v1306_v26 = vadd.f32 %v6948_v47, %v6282_v1  ;;  %v982_v31 = vsub.s32 7, %v6264_v21  ;;  %v6949_v36 = vld [vmem:[#allocation33_spill] sm:$0xff]  ;;  %v6951_v7 = vld [vmem:[#allocation67_spill] sm:$0xff] }
 0x3de   : > { %v1748_v43 = vmax.f32 %v1143_v11, 0.0  ;;  %v1149_v0 = vadd.f32 %v6949_v36, %v6273_v48  ;;  %v1151_v44 = vadd.f32 %v6950_v52, %v6276_v29  ;;  %v1310_v57 = vadd.f32 %v6951_v7, %v6279_v63  ;;  %v6952_v48 = vld [vmem:[#allocation68_spill] sm:$0xff]  ;;  %v6953_v11 = vld [vmem:[#allocation37_spill] sm:$0xff]  ;;  %v6962_v7 = vld [vmem:[#allocation79_spill] sm:$0xff] }
 0x3df   : > { %v1979_v6 = vpop.f32.mrb[96].mxu1  ;;  %v2140_v50 = vpop.f32.mrb[112].mxu0  ;;  %3009 = vmatprep.mubr.f32.mxu1 %v2574_v14  ;;  %3154 = vmatprep.mubr.f32.mxu0 %v2576_v42  ;;  %v6499_v28 = vrot.slane %v6268_v30, %v978_v5  ;;  %v1751_v38 = vmax.f32 %v1306_v26, 0.0  ;;  %v1312_v55 = vadd.f32 %v6952_v48, %v6282_v1  ;;  %v6507_v29 = vrot.slane %v6268_v30, %v982_v31  ;;  %v6959_v26 = vld [vmem:[#allocation42_spill] sm:$0xff] }
 0x3e0   : > { %v2581_v33 = vmul.f32 %v1979_v6, %v1732_v2  ;;  %v2583_v51 = vmul.f32 %v2140_v50, %v1734_v24  ;;  %v1981_v4 = vpop.f32.mrb[97].mxu1  ;;  %v2142_v58 = vpop.f32.mrb[113].mxu0  ;;  %3010 = vmatmul.mubr.f32.gmra.mrb[174].mxu1 %v2573_v19  ;;  %3155 = vmatmul.mubr.f32.gmra.mrb[174].mxu0 %v2575_v35  ;;  %v6494_v19 = vrot.slane %v6268_v30, %v970_v8  ;;  %v1750_v35 = vmax.f32 %v1304_v49, 0.0  ;;  %v6954_v30 = vld [vmem:[#allocation71_spill] sm:$0xff]  ;;  %v6955_v6 = vld [vmem:[#allocation38_spill] sm:$0xff] }
 0x3e1   : > { %v2582_v59 = vmul.f32 %v1981_v4, %v1733_v46  ;;  %v2584_v20 = vmul.f32 %v2142_v58, %v1735_v13  ;;  %v1756_v15 = vmax.f32 %v1149_v0, 0.0  ;;  %v1758_v1 = vmax.f32 %v1310_v57, 0.0  ;;  %v6963_v48 = vld [vmem:[#allocation46_spill] sm:$0xff] }
 0x3e2   : > { %v1381_v13 = vadd.f32 %v6953_v11, %v6494_v19  ;;  %v1542_v54 = vadd.f32 %v6954_v30, %v6499_v28  ;;  %v1757_v12 = vmax.f32 %v1151_v44, 0.0  ;;  %v1383_v50 = vadd.f32 %v6955_v6, %v6502_v41  ;;  %v6965_v30 = vld [vmem:[#allocation49_spill] sm:$0xff]  ;;  %v6966_v6 = vld [vmem:[#allocation83_spill] sm:$0xff] }
 0x3e3   : > { %v1985_v9 = vpop.f32.mrb[98].mxu1  ;;  %v2146_v39 = vpop.f32.mrb[114].mxu0  ;;  %3014 = vmatprep.mubr.f32.mxu1 %v2582_v59  ;;  %3159 = vmatprep.mubr.f32.mxu0 %v2584_v20  ;;  %v1759_v17 = vmax.f32 %v1312_v55, 0.0  ;;  %v1387_v49 = vadd.f32 %v6957_v37, %v6494_v19  ;;  %v1389_v31 = vadd.f32 %v6959_v26, %v6502_v41  ;;  %v1554_v57 = vadd.f32 %v6962_v7, %v6499_v28  ;;  %v6970_v26 = vld [vmem:[#allocation87_spill] sm:$0xff]  ;;  %v6973_v7 = vld [vmem:[#allocation57_spill] sm:$0xff] }
 0x3e4   : > { %v2589_v23 = vmul.f32 %v1985_v9, %v1740_v53  ;;  %v2591_v22 = vmul.f32 %v2146_v39, %v1742_v25  ;;  %v1987_v45 = vpop.f32.mrb[99].mxu1  ;;  %v2148_v56 = vpop.f32.mrb[115].mxu0  ;;  %3015 = vmatmul.mubr.f32.gmra.mrb[176].mxu1 %v2581_v33  ;;  %3160 = vmatmul.mubr.f32.gmra.mrb[176].mxu0 %v2583_v51  ;;  %v1544_v33 = vadd.f32 %v6956_v34, %v6507_v29  ;;  %v1640_v25 = vmax.f32 %v1381_v13, 0.0  ;;  %v6960_v39 = vld [vmem:[#allocation76_spill] sm:$0xff]  ;;  %v6967_v34 = vld [vmem:[#allocation50_spill] sm:$0xff] }
 0x3e5   : > { %v2590_v10 = vmul.f32 %v1987_v45, %v1741_v16  ;;  %v2592_v21 = vmul.f32 %v2148_v56, %v1743_v60  ;;  %v1642_v5 = vmax.f32 %v1542_v54, 0.0  ;;  %v1548_v60 = vadd.f32 %v6958_v18, %v6499_v28  ;;  %v6969_v18 = vld [vmem:[#allocation53_spill] sm:$0xff] }
 0x3e6   : > { %v1641_v47 = vmax.f32 %v1383_v50, 0.0  ;;  %v1643_v9 = vmax.f32 %v1544_v33, 0.0  ;;  %v1648_v44 = vmax.f32 %v1387_v49, 0.0  ;;  %v1395_v55 = vadd.f32 %v6963_v48, %v6502_v41  ;;  %v6974_v48 = vld [vmem:[#allocation91_spill] sm:$0xff] }
 0x3e7   : > { %v1991_v14 = vpop.f32.mrb[100].mxu1  ;;  %v2152_v42 = vpop.f32.mrb[116].mxu0  ;;  %3019 = vmatprep.mubr.f32.mxu1 %v2590_v10  ;;  %3164 = vmatprep.mubr.f32.mxu0 %v2592_v21  ;;  %v6961_v10 = vld [vmem:[#allocation45_spill] sm:$0xff]  ;;  %v1399_v54 = vadd.f32 %v6965_v30, %v6494_v19  ;;  %v1560_v50 = vadd.f32 %v6966_v6, %v6499_v28  ;;  %v1401_v33 = vadd.f32 %v6967_v34, %v6502_v41 }
 0x3e8   : > { %v2597_v2 = vmul.f32 %v1991_v14, %v1748_v43  ;;  %v2599_v24 = vmul.f32 %v2152_v42, %v1750_v35  ;;  %v1993_v63 = vpop.f32.mrb[101].mxu1  ;;  %v2154_v62 = vpop.f32.mrb[117].mxu0  ;;  %3020 = vmatmul.mubr.f32.gmra.mrb[178].mxu1 %v2589_v23  ;;  %3165 = vmatmul.mubr.f32.gmra.mrb[178].mxu0 %v2591_v22  ;;  %v1550_v43 = vadd.f32 %v6960_v39, %v6507_v29  ;;  %v1650_v35 = vmax.f32 %v1548_v60, 0.0  ;;  %v6964_v42 = vld [vmem:[#allocation80_spill] sm:$0xff]  ;;  %v6971_v39 = vld [vmem:[#allocation54_spill] sm:$0xff]  ;;  %v6977_v6 = vld [vmem:[#allocation61_spill] sm:$0xff] }
 0x3e9   : > { %v2598_v3 = vmul.f32 %v1993_v63, %v1749_v61  ;;  %v2600_v46 = vmul.f32 %v2154_v62, %v1751_v38  ;;  %v1393_v21 = vadd.f32 %v6961_v10, %v6494_v19  ;;  %v1649_v38 = vmax.f32 %v1389_v31, 0.0 }
 0x3ea   : > { %v1651_v14 = vmax.f32 %v1550_v43, 0.0  ;;  %v1405_v60 = vadd.f32 %v6969_v18, %v6494_v19  ;;  %v1566_v31 = vadd.f32 %v6970_v26, %v6499_v28  ;;  %v1407_v43 = vadd.f32 %v6971_v39, %v6502_v41  ;;  %v6979_v18 = vld [vmem:[#allocation65_spill] sm:$0xff] }
 0x3eb   : > { %v1997_v51 = vpop.f32.mrb[102].mxu1  ;;  %v2158_v4 = vpop.f32.mrb[118].mxu0  ;;  %3024 = vmatprep.mubr.f32.mxu1 %v2598_v3  ;;  %3169 = vmatprep.mubr.f32.mxu0 %v2600_v46  ;;  %v1578_v34 = vadd.f32 %v6092_v32, %v6499_v28  ;;  %v6980_v26 = vld [vmem:[#allocation97_spill] sm:$0xff] }
 0x3ec   : > { %v2605_v58 = vmul.f32 %v1997_v51, %v1756_v15  ;;  %v2607_v53 = vmul.f32 %v2158_v4, %v1758_v1  ;;  %v1999_v16 = vpop.f32.mrb[103].mxu1  ;;  %v2160_v59 = vpop.f32.mrb[119].mxu0  ;;  %3025 = vmatmul.mubr.f32.gmra.mrb[180].mxu1 %v2597_v2  ;;  %3170 = vmatmul.mubr.f32.gmra.mrb[180].mxu0 %v2599_v24  ;;  %v1556_v2 = vadd.f32 %v6964_v42, %v6507_v29  ;;  %v1656_v1 = vmax.f32 %v1393_v21, 0.0  ;;  %v6968_v4 = vld [vmem:[#allocation84_spill] sm:$0xff]  ;;  %v6975_v42 = vld [vmem:[#allocation58_spill] sm:$0xff] }
 0x3ed   : > { %v2606_v20 = vmul.f32 %v1999_v16, %v1757_v12  ;;  %v2608_v8 = vmul.f32 %v2160_v59, %v1759_v17  ;;  %v1658_v12 = vmax.f32 %v1554_v57, 0.0  ;;  %v1657_v17 = vmax.f32 %v1395_v55, 0.0 }
 0x3ee   : > { %v1659_v51 = vmax.f32 %v1556_v2, 0.0  ;;  %v1411_v57 = vadd.f32 %v6973_v7, %v6494_v19  ;;  %v1572_v55 = vadd.f32 %v6974_v48, %v6499_v28  ;;  %v1413_v2 = vadd.f32 %v6975_v42, %v6502_v41 }
 0x3ef   : > { %v2229_v61 = vpop.f32.mrb[104].mxu1  ;;  %v2390_v23 = vpop.f32.mrb[120].mxu0  ;;  %3029 = vmatprep.mubr.f32.mxu1 %v2606_v20  ;;  %3174 = vmatprep.mubr.f32.mxu0 %v2608_v8 }
 0x3f0   : > { %v2489_v22 = vmul.f32 %v2229_v61, %v1640_v25  ;;  %v2491_v45 = vmul.f32 %v2390_v23, %v1642_v5  ;;  %v2231_v56 = vpop.f32.mrb[105].mxu1  ;;  %v2392_v36 = vpop.f32.mrb[121].mxu0  ;;  %3030 = vmatmul.mubr.f32.gmra.mrb[182].mxu1 %v2605_v58  ;;  %3175 = vmatmul.mubr.f32.gmra.mrb[182].mxu0 %v2607_v53  ;;  %v1562_v58 = vadd.f32 %v6968_v4, %v6507_v29  ;;  %v1664_v5 = vmax.f32 %v1399_v54, 0.0  ;;  %v6972_v23 = vld [vmem:[#allocation88_spill] sm:$0xff] }
 0x3f1   : > { %v2490_v0 = vmul.f32 %v2231_v56, %v1641_v47  ;;  %v2492_v52 = vmul.f32 %v2392_v36, %v1643_v9  ;;  %v1666_v47 = vmax.f32 %v1560_v50, 0.0  ;;  %v1665_v9 = vmax.f32 %v1401_v33, 0.0 }
 0x3f2   : > { %v1667_v61 = vmax.f32 %v1562_v58, 0.0  ;;  %v1417_v50 = vadd.f32 %v6977_v6, %v6494_v19  ;;  %v1681_v33 = vmax.f32 %v1413_v2, 0.0 }
 0x3f3   : > { %v2235_v24 = vpop.f32.mrb[106].mxu1  ;;  %v2396_v63 = vpop.f32.mrb[122].mxu0  ;;  %3244 = vmatprep.mubr.f32.mxu1 %v2490_v0  ;;  %3389 = vmatprep.mubr.f32.mxu0 %v2492_v52 }
 0x3f4   : > { %v2497_v62 = vmul.f32 %v2235_v24, %v1648_v44  ;;  %v2499_v3 = vmul.f32 %v2396_v63, %v1650_v35  ;;  %v2237_v46 = vpop.f32.mrb[107].mxu1  ;;  %v2398_v15 = vpop.f32.mrb[123].mxu0  ;;  %3245 = vmatmul.mubr.f32.vlgmr.msra.gmra.mrb[184].mxu1 %v2489_v22  ;;  %3390 = vmatmul.mubr.f32.vlgmr.msra.gmra.mrb[184].mxu0 %v2491_v45  ;;  %v1568_v22 = vadd.f32 %v6972_v23, %v6507_v29  ;;  %v1672_v35 = vmax.f32 %v1405_v60, 0.0  ;;  %v6976_v63 = vld [vmem:[#allocation92_spill] sm:$0xff] }
 0x3f5   : > { %v2498_v11 = vmul.f32 %v2237_v46, %v1649_v38  ;;  %v2500_v13 = vmul.f32 %v2398_v15, %v1651_v14  ;;  %v1674_v38 = vmax.f32 %v1566_v31, 0.0  ;;  %v1673_v14 = vmax.f32 %v1407_v43, 0.0 }
 0x3f6   : > { %v1675_v24 = vmax.f32 %v1568_v22, 0.0  ;;  %v1423_v60 = vadd.f32 %v6979_v18, %v6494_v19 }
 0x3f7   : > { %v2241_v53 = vpop.f32.mrb[108].mxu1  ;;  %v2402_v16 = vpop.f32.mrb[124].mxu0  ;;  %3249 = vmatprep.mubr.f32.mxu1 %v2498_v11  ;;  %3394 = vmatprep.mubr.f32.mxu0 %v2500_v13 }
 0x3f8   : > { %v2505_v59 = vmul.f32 %v2241_v53, %v1656_v1  ;;  %v2507_v20 = vmul.f32 %v2402_v16, %v1658_v12  ;;  %v2243_v8 = vpop.f32.mrb[109].mxu1  ;;  %v2404_v25 = vpop.f32.mrb[125].mxu0  ;;  %3250 = vmatmul.mubr.f32.gmra.mrb[186].mxu1 %v2497_v62  ;;  %3395 = vmatmul.mubr.f32.gmra.mrb[186].mxu0 %v2499_v3  ;;  %v1574_v62 = vadd.f32 %v6976_v63, %v6507_v29  ;;  %v1680_v12 = vmax.f32 %v1411_v57, 0.0 }
 0x3f9   : > { %v2506_v37 = vmul.f32 %v2243_v8, %v1657_v17  ;;  %v2508_v49 = vmul.f32 %v2404_v25, %v1659_v51  ;;  %v1682_v17 = vmax.f32 %v1572_v55, 0.0  ;;  %v6978_v51 = vld [vmem:[#allocation62_spill] sm:$0xff]  ;;  %v1580_v53 = vadd.f32 %v6094_v27, %v6507_v29 }
 0x3fa   : > { %v1419_v4 = vadd.f32 %v6978_v51, %v6502_v41  ;;  %v1683_v58 = vmax.f32 %v1574_v62, 0.0  ;;  %v1584_v27 = vadd.f32 %v6980_v26, %v6499_v28  ;;  %v6989_v51 = vld [vmem:[#allocation74_spill] sm:$0xff] }
 0x3fb   : > { %v2247_v45 = vpop.f32.mrb[110].mxu1  ;;  %v2408_v56 = vpop.f32.mrb[126].mxu0  ;;  %3254 = vmatprep.mubr.f32.mxu1 %v2506_v37  ;;  %3399 = vmatprep.mubr.f32.mxu0 %v2508_v49  ;;  %v1691_v43 = vmax.f32 %v1580_v53, 0.0  ;;  %v6990_v53 = vld [vmem:[#allocation106_spill] sm:$0xff] }
 0x3fc   : > { %v2513_v36 = vmul.f32 %v2247_v45, %v1664_v5  ;;  %v2515_v0 = vmul.f32 %v2408_v56, %v1666_v47  ;;  %v2249_v52 = vpop.f32.mrb[111].mxu1  ;;  %v2410_v44 = vpop.f32.mrb[127].mxu0  ;;  %3255 = vmatmul.mubr.f32.gmra.mrb[188].mxu1 %v2505_v59  ;;  %3400 = vmatmul.mubr.f32.gmra.mrb[188].mxu0 %v2507_v20  ;;  %v1688_v5 = vmax.f32 %v1417_v50, 0.0  ;;  %v1690_v47 = vmax.f32 %v1578_v34, 0.0 }
 0x3fd   : > { %v2514_v10 = vmul.f32 %v2249_v52, %v1665_v9  ;;  %v2516_v21 = vmul.f32 %v2410_v44, %v1667_v61  ;;  %v1689_v31 = vmax.f32 %v1419_v4, 0.0  ;;  %v6981_v9 = vld [vmem:[#allocation66_spill] sm:$0xff]  ;;  %v1698_v57 = vmax.f32 %v1584_v27, 0.0 }
 0x3fe   : > { %v1425_v39 = vadd.f32 %v6981_v9, %v6502_v41  ;;  %v6982_v61 = vld [vmem:[#allocation98_spill] sm:$0xff]  ;;  %v1437_v4 = vadd.f32 %v6989_v51, %v6502_v41  ;;  %v1602_v27 = vadd.f32 %v6150_v40, %v6499_v28 }
 0x3ff   : > { %v2253_v3 = vpop.f32.mrb[112].mxu1  ;;  %v2414_v46 = vpop.f32.mrb[128].mxu0  ;;  %3259 = vmatprep.mubr.f32.mxu1 %v2514_v10  ;;  %3404 = vmatprep.mubr.f32.mxu0 %v2516_v21  ;;  %v1586_v23 = vadd.f32 %v6982_v61, %v6507_v29  ;;  %v1696_v21 = vmax.f32 %v1423_v60, 0.0  ;;  %v6991_v60 = vld [vmem:[#allocation77_spill] sm:$0xff]  ;;  %v6992_v9 = vld [vmem:[#allocation78_spill] sm:$0xff] }
 0x400   : > { %v2521_v15 = vmul.f32 %v2253_v3, %v1672_v35  ;;  %v2523_v11 = vmul.f32 %v2414_v46, %v1674_v38  ;;  %v2255_v13 = vpop.f32.mrb[113].mxu1  ;;  %v2416_v1 = vpop.f32.mrb[129].mxu0  ;;  %3260 = vmatmul.mubr.f32.gmra.mrb[190].mxu1 %v2513_v36  ;;  %3405 = vmatmul.mubr.f32.gmra.mrb[190].mxu0 %v2515_v0  ;;  %v6983_v35 = vld [vmem:[#allocation69_spill] sm:$0xff]  ;;  %v1697_v55 = vmax.f32 %v1425_v39, 0.0  ;;  %v1443_v39 = vadd.f32 %v6992_v9, %v6502_v41  ;;  %v7004_v9 = vld [vmem:[#allocation90_spill] sm:$0xff] }
 0x401   : > { %v2522_v30 = vmul.f32 %v2255_v13, %v1673_v14  ;;  %v2524_v54 = vmul.f32 %v2416_v1, %v1675_v24  ;;  %v1429_v7 = vadd.f32 %v6983_v35, %v6494_v19  ;;  %v6984_v38 = vld [vmem:[#allocation101_spill] sm:$0xff]  ;;  %v6985_v14 = vld [vmem:[#allocation70_spill] sm:$0xff]  ;;  %v1699_v2 = vmax.f32 %v1586_v23, 0.0 }
 0x402   : > { %v1590_v48 = vadd.f32 %v6984_v38, %v6499_v28  ;;  %v1431_v42 = vadd.f32 %v6985_v14, %v6502_v41  ;;  %v6986_v24 = vld [vmem:[#allocation102_spill] sm:$0xff]  ;;  %v6993_v61 = vld [vmem:[#allocation109_spill] sm:$0xff] }
 0x403   : > { %v2259_v16 = vpop.f32.mrb[114].mxu1  ;;  %v2420_v59 = vpop.f32.mrb[130].mxu0  ;;  %3264 = vmatprep.mubr.f32.mxu1 %v2522_v30  ;;  %3409 = vmatprep.mubr.f32.mxu0 %v2524_v54  ;;  %v1592_v63 = vadd.f32 %v6986_v24, %v6507_v29  ;;  %v1704_v54 = vmax.f32 %v1429_v7, 0.0  ;;  %v1604_v23 = vadd.f32 %v6993_v61, %v6507_v29  ;;  %v1722_v7 = vmax.f32 %v1602_v27, 0.0  ;;  %v7005_v61 = vld [vmem:[#allocation104_spill] sm:$0xff] }
 0x404   : > { %v2529_v20 = vmul.f32 %v2259_v16, %v1680_v12  ;;  %v2531_v8 = vmul.f32 %v2420_v59, %v1682_v17  ;;  %v2261_v25 = vpop.f32.mrb[115].mxu1  ;;  %v2422_v37 = vpop.f32.mrb[131].mxu0  ;;  %3265 = vmatmul.mubr.f32.gmra.mrb[192].mxu1 %v2521_v15  ;;  %3410 = vmatmul.mubr.f32.gmra.mrb[192].mxu0 %v2523_v11  ;;  %v6987_v12 = vld [vmem:[#allocation73_spill] sm:$0xff]  ;;  %v1706_v50 = vmax.f32 %v1590_v48, 0.0  ;;  %v1598_v16 = vadd.f32 %v6990_v53, %v6507_v29 }
 0x405   : > { %v2530_v49 = vmul.f32 %v2261_v25, %v1681_v33  ;;  %v2532_v32 = vmul.f32 %v2422_v37, %v1683_v58  ;;  %v1435_v6 = vadd.f32 %v6987_v12, %v6494_v19  ;;  %v6988_v17 = vld [vmem:[#allocation105_spill] sm:$0xff]  ;;  %v1705_v33 = vmax.f32 %v1431_v42, 0.0 }
 0x406   : > { %v1596_v34 = vadd.f32 %v6988_v17, %v6499_v28  ;;  %v1707_v58 = vmax.f32 %v1592_v63, 0.0  ;;  %v1721_v48 = vmax.f32 %v1443_v39, 0.0  ;;  %v1723_v42 = vmax.f32 %v1604_v23, 0.0 }
 0x407   : > { %v2265_v22 = vpop.f32.mrb[116].mxu1  ;;  %v2426_v45 = vpop.f32.mrb[132].mxu0  ;;  %3269 = vmatprep.mubr.f32.mxu1 %v2530_v49  ;;  %3414 = vmatprep.mubr.f32.mxu0 %v2532_v32  ;;  %v1712_v18 = vmax.f32 %v1435_v6, 0.0  ;;  %v6999_v6 = vld [vmem:[#allocation99_spill] sm:$0xff]  ;;  %v1461_v39 = vadd.f32 %v7004_v9, %v6502_v41  ;;  %v1622_v23 = vadd.f32 %v7005_v61, %v6507_v29 }
 0x408   : > { %v2537_v56 = vmul.f32 %v2265_v22, %v1688_v5  ;;  %v2539_v36 = vmul.f32 %v2426_v45, %v1690_v47  ;;  %v2267_v0 = vpop.f32.mrb[117].mxu1  ;;  %v2428_v52 = vpop.f32.mrb[133].mxu0  ;;  %3270 = vmatmul.mubr.f32.gmra.mrb[194].mxu1 %v2529_v20  ;;  %3415 = vmatmul.mubr.f32.gmra.mrb[194].mxu0 %v2531_v8  ;;  %v1441_v47 = vadd.f32 %v6991_v60, %v6494_v19  ;;  %v1714_v26 = vmax.f32 %v1596_v34, 0.0 }
 0x409   : > { %v2538_v44 = vmul.f32 %v2267_v0, %v1689_v31  ;;  %v2540_v10 = vmul.f32 %v2428_v52, %v1691_v43  ;;  %v1713_v31 = vmax.f32 %v1437_v4, 0.0  ;;  %v1715_v43 = vmax.f32 %v1598_v16, 0.0  ;;  %v7001_v4 = vld [vmem:[#allocation100_spill] sm:$0xff] }
 0x40b   : > { %v2271_v62 = vpop.f32.mrb[118].mxu1  ;;  %v2432_v3 = vpop.f32.mrb[134].mxu0  ;;  %3274 = vmatprep.mubr.f32.mxu1 %v2538_v44  ;;  %3419 = vmatprep.mubr.f32.mxu0 %v2540_v10  ;;  %v1720_v10 = vmax.f32 %v1441_v47, 0.0 }
 0x40c   : > { %v2545_v46 = vmul.f32 %v2271_v62, %v1696_v21  ;;  %v2547_v15 = vmul.f32 %v2432_v3, %v1698_v57  ;;  %v2273_v11 = vpop.f32.mrb[119].mxu1  ;;  %v2434_v13 = vpop.f32.mrb[135].mxu0  ;;  %3275 = vmatmul.mubr.f32.gmra.mrb[196].mxu1 %v2537_v56  ;;  %3420 = vmatmul.mubr.f32.gmra.mrb[196].mxu0 %v2539_v36  ;;  %v6994_v21 = vld [vmem:[#allocation81_spill] sm:$0xff]  ;;  %v6995_v57 = vld [vmem:[#allocation112_spill] sm:$0xff] }
 0x40d   : > { %v2546_v1 = vmul.f32 %v2273_v11, %v1697_v55  ;;  %v2548_v30 = vmul.f32 %v2434_v13, %v1699_v2  ;;  %v1447_v35 = vadd.f32 %v6994_v21, %v6494_v19  ;;  %v1608_v38 = vadd.f32 %v6995_v57, %v6499_v28  ;;  %v6996_v55 = vld [vmem:[#allocation82_spill] sm:$0xff]  ;;  %v6997_v2 = vld [vmem:[#allocation113_spill] sm:$0xff]  ;;  %v7007_v57 = vld [vmem:[#allocation107_spill] sm:$0xff] }
 0x40e   : > { %v1449_v14 = vadd.f32 %v6996_v55, %v6502_v41  ;;  %v1610_v24 = vadd.f32 %v6997_v2, %v6507_v29  ;;  %v7006_v21 = vld [vmem:[#allocation93_spill] sm:$0xff]  ;;  %v7008_v55 = vld [vmem:[#allocation94_spill] sm:$0xff]  ;;  %v7009_v2 = vld [vmem:[#allocation108_spill] sm:$0xff] }
 0x40f   : > { %v2277_v59 = vpop.f32.mrb[120].mxu1  ;;  %v2438_v20 = vpop.f32.mrb[136].mxu0  ;;  %3279 = vmatprep.mubr.f32.mxu1 %v2546_v1  ;;  %3424 = vmatprep.mubr.f32.mxu0 %v2548_v30  ;;  %v1728_v30 = vmax.f32 %v1447_v35, 0.0  ;;  %v1730_v17 = vmax.f32 %v1608_v38, 0.0  ;;  %v1465_v35 = vadd.f32 %v7006_v21, %v6494_v19  ;;  %v1626_v38 = vadd.f32 %v7007_v57, %v6499_v28 }
 0x410   : > { %v2553_v8 = vmul.f32 %v2277_v59, %v1704_v54  ;;  %v2555_v25 = vmul.f32 %v2438_v20, %v1706_v50  ;;  %v2279_v37 = vpop.f32.mrb[121].mxu1  ;;  %v2440_v49 = vpop.f32.mrb[137].mxu0  ;;  %3280 = vmatmul.mubr.f32.gmra.mrb[198].mxu1 %v2545_v46  ;;  %3425 = vmatmul.mubr.f32.gmra.mrb[198].mxu0 %v2547_v15  ;;  %v6998_v54 = vld [vmem:[#allocation85_spill] sm:$0xff]  ;;  %v1614_v50 = vadd.f32 %v6999_v6, %v6499_v28  ;;  %v1729_v34 = vmax.f32 %v1449_v14, 0.0 }
 0x411   : > { %v2554_v32 = vmul.f32 %v2279_v37, %v1705_v33  ;;  %v2556_v5 = vmul.f32 %v2440_v49, %v1707_v58  ;;  %v1453_v12 = vadd.f32 %v6998_v54, %v6494_v19  ;;  %v7000_v33 = vld [vmem:[#allocation86_spill] sm:$0xff]  ;;  %v1616_v58 = vadd.f32 %v7001_v4, %v6507_v29  ;;  %v7010_v54 = vld [vmem:[#allocation95_spill] sm:$0xff] }
 0x412   : > { %v1455_v51 = vadd.f32 %v7000_v33, %v6502_v41  ;;  %v1731_v53 = vmax.f32 %v1610_v24, 0.0  ;;  %v1738_v47 = vmax.f32 %v1614_v50, 0.0  ;;  %v1467_v14 = vadd.f32 %v7008_v55, %v6502_v41  ;;  %v7011_v50 = vld [vmem:[#allocation110_spill] sm:$0xff]  ;;  %v7012_v33 = vld [vmem:[#allocation96_spill] sm:$0xff] }
 0x413   : > { %v2283_v22 = vpop.f32.mrb[122].mxu1  ;;  %v2444_v45 = vpop.f32.mrb[138].mxu0  ;;  %3284 = vmatprep.mubr.f32.mxu1 %v2554_v32  ;;  %3429 = vmatprep.mubr.f32.mxu0 %v2556_v5  ;;  %v1736_v5 = vmax.f32 %v1453_v12, 0.0  ;;  %v1628_v24 = vadd.f32 %v7009_v2, %v6507_v29  ;;  %v1471_v12 = vadd.f32 %v7010_v54, %v6494_v19  ;;  %v1754_v6 = vmax.f32 %v1626_v38, 0.0 }
 0x414   : > { %v2561_v56 = vmul.f32 %v2283_v22, %v1712_v18  ;;  %v2563_v36 = vmul.f32 %v2444_v45, %v1714_v26  ;;  %v2285_v0 = vpop.f32.mrb[123].mxu1  ;;  %v2446_v52 = vpop.f32.mrb[139].mxu0  ;;  %3285 = vmatmul.mubr.f32.gmra.mrb[200].mxu1 %v2553_v8  ;;  %3430 = vmatmul.mubr.f32.gmra.mrb[200].mxu0 %v2555_v25  ;;  %v7002_v18 = vld [vmem:[#allocation89_spill] sm:$0xff]  ;;  %v7003_v26 = vld [vmem:[#allocation103_spill] sm:$0xff] }
 0x415   : > { %v2562_v44 = vmul.f32 %v2285_v0, %v1713_v31  ;;  %v2564_v40 = vmul.f32 %v2446_v52, %v1715_v43  ;;  %v1459_v60 = vadd.f32 %v7002_v18, %v6494_v19  ;;  %v1620_v27 = vadd.f32 %v7003_v26, %v6499_v28 }
 0x416   : > { %v1737_v31 = vmax.f32 %v1455_v51, 0.0  ;;  %v1739_v43 = vmax.f32 %v1616_v58, 0.0  ;;  %v1473_v51 = vadd.f32 %v7012_v33, %v6502_v41  ;;  %v1755_v4 = vmax.f32 %v1628_v24, 0.0  ;;  %v7013_v58 = vld [vmem:[#allocation111_spill] sm:$0xff] }
 0x417   : > { %v2289_v63 = vpop.f32.mrb[124].mxu1  ;;  %v2450_v62 = vpop.f32.mrb[140].mxu0  ;;  %3289 = vmatprep.mubr.f32.mxu1 %v2562_v44  ;;  %3434 = vmatprep.mubr.f32.mxu0 %v2564_v40 }
 0x418   : > { %v2569_v3 = vmul.f32 %v2289_v63, %v1720_v10  ;;  %v2571_v46 = vmul.f32 %v2450_v62, %v1722_v7  ;;  %v2291_v15 = vpop.f32.mrb[125].mxu1  ;;  %v2452_v11 = vpop.f32.mrb[141].mxu0  ;;  %3290 = vmatmul.mubr.f32.gmra.mrb[202].mxu1 %v2561_v56  ;;  %3435 = vmatmul.mubr.f32.gmra.mrb[202].mxu0 %v2563_v36  ;;  %v1744_v10 = vmax.f32 %v1459_v60, 0.0  ;;  %v1746_v7 = vmax.f32 %v1620_v27, 0.0 }
 0x419   : > { %v2570_v13 = vmul.f32 %v2291_v15, %v1721_v48  ;;  %v2572_v1 = vmul.f32 %v2452_v11, %v1723_v42  ;;  %v1745_v48 = vmax.f32 %v1461_v39, 0.0  ;;  %v1747_v42 = vmax.f32 %v1622_v23, 0.0 }
 0x41b   : > { %v2295_v16 = vpop.f32.mrb[126].mxu1  ;;  %v2456_v59 = vpop.f32.mrb[142].mxu0  ;;  %3294 = vmatprep.mubr.f32.mxu1 %v2570_v13  ;;  %3439 = vmatprep.mubr.f32.mxu0 %v2572_v1 }
 0x41c   : > { %v2577_v20 = vmul.f32 %v2295_v16, %v1728_v30  ;;  %v2579_v8 = vmul.f32 %v2456_v59, %v1730_v17  ;;  %v2297_v25 = vpop.f32.mrb[127].mxu1  ;;  %v2458_v37 = vpop.f32.mrb[143].mxu0  ;;  %3295 = vmatmul.mubr.f32.gmra.mrb[204].mxu1 %v2569_v3  ;;  %3440 = vmatmul.mubr.f32.gmra.mrb[204].mxu0 %v2571_v46  ;;  %v1752_v30 = vmax.f32 %v1465_v35, 0.0  ;;  %v1632_v17 = vadd.f32 %v7011_v50, %v6499_v28 }
 0x41d   : > { %v2578_v49 = vmul.f32 %v2297_v25, %v1729_v34  ;;  %v2580_v32 = vmul.f32 %v2458_v37, %v1731_v53  ;;  %v1753_v34 = vmax.f32 %v1467_v14, 0.0  ;;  %v1634_v53 = vadd.f32 %v7013_v58, %v6507_v29 }
 0x41f   : > { %v2301_v22 = vpop.f32.mrb[128].mxu1  ;;  %v2462_v45 = vpop.f32.mrb[144].mxu0  ;;  %3299 = vmatprep.mubr.f32.mxu1 %v2578_v49  ;;  %3444 = vmatprep.mubr.f32.mxu0 %v2580_v32  ;;  %v1760_v49 = vmax.f32 %v1471_v12, 0.0  ;;  %v1762_v32 = vmax.f32 %v1632_v17, 0.0  ;;  %v1763_v41 = vmax.f32 %v1634_v53, 0.0 }
 0x420   : > { %v2585_v56 = vmul.f32 %v2301_v22, %v1736_v5  ;;  %v2587_v36 = vmul.f32 %v2462_v45, %v1738_v47  ;;  %v2303_v0 = vpop.f32.mrb[129].mxu1  ;;  %v2464_v52 = vpop.f32.mrb[145].mxu0  ;;  %3300 = vmatmul.mubr.f32.gmra.mrb[206].mxu1 %v2577_v20  ;;  %3445 = vmatmul.mubr.f32.gmra.mrb[206].mxu0 %v2579_v8  ;;  %v1761_v5 = vmax.f32 %v1473_v51, 0.0 }
 0x421   : > { %v2586_v44 = vmul.f32 %v2303_v0, %v1737_v31  ;;  %v2588_v40 = vmul.f32 %v2464_v52, %v1739_v43 }
 0x423   : > { %v2307_v63 = vpop.f32.mrb[130].mxu1  ;;  %v2468_v62 = vpop.f32.mrb[146].mxu0  ;;  %3304 = vmatprep.mubr.f32.mxu1 %v2586_v44  ;;  %3449 = vmatprep.mubr.f32.mxu0 %v2588_v40 }
 0x424   : > { %v2593_v3 = vmul.f32 %v2307_v63, %v1744_v10  ;;  %v2595_v46 = vmul.f32 %v2468_v62, %v1746_v7  ;;  %v2309_v15 = vpop.f32.mrb[131].mxu1  ;;  %v2470_v11 = vpop.f32.mrb[147].mxu0  ;;  %3305 = vmatmul.mubr.f32.gmra.mrb[208].mxu1 %v2585_v56  ;;  %3450 = vmatmul.mubr.f32.gmra.mrb[208].mxu0 %v2587_v36 }
 0x425   : > { %v2594_v13 = vmul.f32 %v2309_v15, %v1745_v48  ;;  %v2596_v1 = vmul.f32 %v2470_v11, %v1747_v42 }
 0x427   : > { %v2313_v16 = vpop.f32.mrb[132].mxu1  ;;  %v2474_v59 = vpop.f32.mrb[148].mxu0  ;;  %3309 = vmatprep.mubr.f32.mxu1 %v2594_v13  ;;  %3454 = vmatprep.mubr.f32.mxu0 %v2596_v1 }
 0x428   : > { %v2601_v20 = vmul.f32 %v2313_v16, %v1752_v30  ;;  %v2603_v8 = vmul.f32 %v2474_v59, %v1754_v6  ;;  %v2315_v25 = vpop.f32.mrb[133].mxu1  ;;  %v2476_v19 = vpop.f32.mrb[149].mxu0  ;;  %3310 = vmatmul.mubr.f32.gmra.mrb[210].mxu1 %v2593_v3  ;;  %3455 = vmatmul.mubr.f32.gmra.mrb[210].mxu0 %v2595_v46 }
 0x429   : > { %v2602_v37 = vmul.f32 %v2315_v25, %v1753_v34  ;;  %v2604_v28 = vmul.f32 %v2476_v19, %v1755_v4 }
 0x42b   : > { %v2319_v18 = vpop.f32.mrb[134].mxu1  ;;  %v2480_v60 = vpop.f32.mrb[150].mxu0  ;;  %3314 = vmatprep.mubr.f32.mxu1 %v2602_v37  ;;  %3459 = vmatprep.mubr.f32.mxu0 %v2604_v28 }
 0x42c   : > { %v2609_v29 = vmul.f32 %v2319_v18, %v1760_v49  ;;  %v2611_v47 = vmul.f32 %v2480_v60, %v1762_v32  ;;  %v2321_v26 = vpop.f32.mrb[135].mxu1  ;;  %v2482_v27 = vpop.f32.mrb[151].mxu0  ;;  %3315 = vmatmul.mubr.f32.gmra.mrb[212].mxu1 %v2601_v20  ;;  %3460 = vmatmul.mubr.f32.gmra.mrb[212].mxu0 %v2603_v8 }
 0x42d   : > { %v2610_v31 = vmul.f32 %v2321_v26, %v1761_v5  ;;  %v2612_v9 = vmul.f32 %v2482_v27, %v1763_v41 }
 0x42f   : > { %v4160_v39 = vpop.f32.mrb[136].mxu1  ;;  %3319 = vmatprep.mubr.f32.mxu1 %v2610_v31  ;;  %3464 = vmatprep.mubr.f32.mxu0 %v2612_v9 }
 0x430   : > { %v2811_v43 = vpop.f32.mrb[137].mxu1  ;;  %3320 = vmatmul.mubr.f32.gmra.mrb[214].mxu1 %v2609_v29  ;;  %3465 = vmatmul.mubr.f32.gmra.mrb[214].mxu0 %v2611_v47 }
 0x433   : > { %v4163_v61 = vpop.f32.mrb[138].mxu1 }
 0x434   : > { %v2821_v23 = vpop.f32.mrb[139].mxu1 }
 0x437   : > { %v4166_v22 = vpop.f32.mrb[140].mxu1 }
 0x438   : > { %v2831_v45 = vpop.f32.mrb[141].mxu1 }
 0x43b   : > { %v6637_v56 = vpop.f32.mrb[142].mxu1 }
 0x43c   : > { %v6639_v36 = vpop.f32.mrb[143].mxu1 }
 0x43f   : > { %v6641_v0 = vpop.f32.mrb[144].mxu1 }
 0x440   : > { %v6643_v52 = vpop.f32.mrb[145].mxu1 }
 0x443   : > { %v6645_v44 = vpop.f32.mrb[146].mxu1 }
 0x444   : > { %v6647_v40 = vpop.f32.mrb[147].mxu1 }
 0x447   : > { %v6649_v10 = vpop.f32.mrb[148].mxu1 }
 0x448   : > { %v6651_v21 = vpop.f32.mrb[149].mxu1 }
 0x44b   : > { %v6653_v35 = vpop.f32.mrb[150].mxu1 }
 0x44c   : > { %v6655_v7 = vpop.f32.mrb[151].mxu1 }
 0x487   : > { %v3868_v57 = vpop.f32.mrb[152].mxu1  ;;  %v3948_v38 = vpop.f32.mrb[152].mxu0 }
 0x488   : > { %v3869_v48 = vpop.f32.mrb[153].mxu1  ;;  %v3949_v55 = vpop.f32.mrb[153].mxu0 }
 0x489   : > { %v3870_v14 = vadd.f32 %v3869_v48, %v3868_v57  ;;  %v3950_v42 = vadd.f32 %v3949_v55, %v3948_v38 }
 0x48b   : > { %v2957_v2 = vadd.f32 %v3870_v14, %v2811_v43  ;;  %v3871_v24 = vpop.f32.mrb[154].mxu1  ;;  %v3951_v63 = vpop.f32.mrb[154].mxu0 }
 0x48c   : > { %v3872_v62 = vpop.f32.mrb[155].mxu1  ;;  %v3952_v3 = vpop.f32.mrb[155].mxu0 }
 0x48d   : > { %v6657_v46 = vadd.f32 %v3950_v42, %v2957_v2  ;;  %v3873_v15 = vadd.f32 %v3872_v62, %v3871_v24  ;;  %v3953_v11 = vadd.f32 %v3952_v3, %v3951_v63 }
 0x48f   : > { %v2962_v13 = vadd.f32 %v4160_v39, %v3873_v15  ;;  %v3874_v1 = vpop.f32.mrb[156].mxu1  ;;  %v3954_v30 = vpop.f32.mrb[156].mxu0 }
 0x490   : > { %v3875_v54 = vpop.f32.mrb[157].mxu1  ;;  %v3955_v12 = vpop.f32.mrb[157].mxu0 }
 0x491   : > { %v6659_v6 = vadd.f32 %v3953_v11, %v2962_v13  ;;  %v3876_v50 = vadd.f32 %v3875_v54, %v3874_v1  ;;  %v3956_v17 = vadd.f32 %v3955_v12, %v3954_v30 }
 0x493   : > { %v2967_v34 = vadd.f32 %v3876_v50, %v2821_v23  ;;  %v3877_v33 = vpop.f32.mrb[158].mxu1  ;;  %v3957_v51 = vpop.f32.mrb[158].mxu0 }
 0x494   : > { %v3878_v4 = vpop.f32.mrb[159].mxu1  ;;  %v3958_v58 = vpop.f32.mrb[159].mxu0 }
 0x495   : > { %v6661_v53 = vadd.f32 %v3956_v17, %v2967_v34  ;;  %v3879_v16 = vadd.f32 %v3878_v4, %v3877_v33  ;;  %v3959_v59 = vadd.f32 %v3958_v58, %v3957_v51 }
 0x497   : > { %v2972_v20 = vadd.f32 %v4163_v61, %v3879_v16  ;;  %v3880_v8 = vpop.f32.mrb[160].mxu1  ;;  %v3960_v25 = vpop.f32.mrb[160].mxu0 }
 0x498   : > { %v3881_v19 = vpop.f32.mrb[161].mxu1  ;;  %v3961_v37 = vpop.f32.mrb[161].mxu0 }
 0x499   : > { %v6663_v28 = vadd.f32 %v3959_v59, %v2972_v20  ;;  %v3882_v49 = vadd.f32 %v3881_v19, %v3880_v8  ;;  %v3962_v32 = vadd.f32 %v3961_v37, %v3960_v25 }
 0x49b   : > { %v2977_v5 = vadd.f32 %v3882_v49, %v2831_v45  ;;  %v3883_v41 = vpop.f32.mrb[162].mxu1  ;;  %v3963_v18 = vpop.f32.mrb[162].mxu0 }
 0x49c   : > { %v3884_v60 = vpop.f32.mrb[163].mxu1  ;;  %v3964_v29 = vpop.f32.mrb[163].mxu0 }
 0x49d   : > { %v6665_v47 = vadd.f32 %v3962_v32, %v2977_v5  ;;  %v3885_v26 = vadd.f32 %v3884_v60, %v3883_v41  ;;  %v3965_v27 = vadd.f32 %v3964_v29, %v3963_v18 }
 0x49f   : > { %v2982_v31 = vadd.f32 %v4166_v22, %v3885_v26  ;;  %v3886_v9 = vpop.f32.mrb[164].mxu1  ;;  %v3966_v39 = vpop.f32.mrb[164].mxu0 }
 0x4a0   : > { %v3887_v43 = vpop.f32.mrb[165].mxu1  ;;  %v3967_v61 = vpop.f32.mrb[165].mxu0 }
 0x4a1   : > { %v6667_v23 = vadd.f32 %v3965_v27, %v2982_v31  ;;  %v3888_v57 = vadd.f32 %v3887_v43, %v3886_v9  ;;  %v3968_v38 = vadd.f32 %v3967_v61, %v3966_v39 }
 0x4a3   : > { %v2987_v48 = vadd.f32 %v3888_v57, %v6639_v36  ;;  %v3889_v45 = vpop.f32.mrb[166].mxu1  ;;  %v3969_v55 = vpop.f32.mrb[166].mxu0 }
 0x4a4   : > { %v3890_v14 = vpop.f32.mrb[167].mxu1  ;;  %v3970_v42 = vpop.f32.mrb[167].mxu0 }
 0x4a5   : > { %v6670_v2 = vadd.f32 %v3968_v38, %v2987_v48  ;;  %v3891_v24 = vadd.f32 %v3890_v14, %v3889_v45  ;;  %v3971_v63 = vadd.f32 %v3970_v42, %v3969_v55 }
 0x4a7   : > { %v2992_v22 = vadd.f32 %v6637_v56, %v3891_v24  ;;  %v3892_v62 = vpop.f32.mrb[168].mxu1  ;;  %v3972_v3 = vpop.f32.mrb[168].mxu0 }
 0x4a8   : > { %v3893_v15 = vpop.f32.mrb[169].mxu1  ;;  %v3973_v11 = vpop.f32.mrb[169].mxu0 }
 0x4a9   : > { %v6673_v13 = vadd.f32 %v3971_v63, %v2992_v22  ;;  %v3894_v1 = vadd.f32 %v3893_v15, %v3892_v62  ;;  %v3974_v30 = vadd.f32 %v3973_v11, %v3972_v3 }
 0x4ab   : > { %v2997_v36 = vadd.f32 %v3894_v1, %v6643_v52  ;;  %v3895_v54 = vpop.f32.mrb[170].mxu1  ;;  %v3975_v12 = vpop.f32.mrb[170].mxu0 }
 0x4ac   : > { %v3896_v50 = vpop.f32.mrb[171].mxu1  ;;  %v3976_v17 = vpop.f32.mrb[171].mxu0 }
 0x4ad   : > { %v6676_v34 = vadd.f32 %v3974_v30, %v2997_v36  ;;  %v3897_v33 = vadd.f32 %v3896_v50, %v3895_v54  ;;  %v3977_v51 = vadd.f32 %v3976_v17, %v3975_v12 }
 0x4af   : > { %v3002_v56 = vadd.f32 %v6641_v0, %v3897_v33  ;;  %v3898_v4 = vpop.f32.mrb[172].mxu1  ;;  %v3978_v58 = vpop.f32.mrb[172].mxu0 }
 0x4b0   : > { %v3899_v16 = vpop.f32.mrb[173].mxu1  ;;  %v3979_v59 = vpop.f32.mrb[173].mxu0 }
 0x4b1   : > { %v6679_v20 = vadd.f32 %v3977_v51, %v3002_v56  ;;  %v3900_v8 = vadd.f32 %v3899_v16, %v3898_v4  ;;  %v3980_v25 = vadd.f32 %v3979_v59, %v3978_v58 }
 0x4b3   : > { %v3007_v52 = vadd.f32 %v3900_v8, %v6647_v40  ;;  %v3901_v19 = vpop.f32.mrb[174].mxu1  ;;  %v3981_v37 = vpop.f32.mrb[174].mxu0 }
 0x4b4   : > { %v3902_v49 = vpop.f32.mrb[175].mxu1  ;;  %v3982_v32 = vpop.f32.mrb[175].mxu0 }
 0x4b5   : > { %v6682_v5 = vadd.f32 %v3980_v25, %v3007_v52  ;;  %v3903_v41 = vadd.f32 %v3902_v49, %v3901_v19  ;;  %v3983_v18 = vadd.f32 %v3982_v32, %v3981_v37 }
 0x4b7   : > { %v3012_v0 = vadd.f32 %v6645_v44, %v3903_v41  ;;  %v3904_v60 = vpop.f32.mrb[176].mxu1  ;;  %v3984_v29 = vpop.f32.mrb[176].mxu0 }
 0x4b8   : > { %v3905_v26 = vpop.f32.mrb[177].mxu1  ;;  %v3985_v27 = vpop.f32.mrb[177].mxu0 }
 0x4b9   : > { %v6685_v31 = vadd.f32 %v3983_v18, %v3012_v0  ;;  %v3906_v9 = vadd.f32 %v3905_v26, %v3904_v60  ;;  %v3986_v39 = vadd.f32 %v3985_v27, %v3984_v29 }
 0x4bb   : > { %v3017_v40 = vadd.f32 %v3906_v9, %v6651_v21  ;;  %v3907_v43 = vpop.f32.mrb[178].mxu1  ;;  %v3987_v61 = vpop.f32.mrb[178].mxu0 }
 0x4bc   : > { %v3908_v57 = vpop.f32.mrb[179].mxu1  ;;  %v3988_v38 = vpop.f32.mrb[179].mxu0 }
 0x4bd   : > { %v6688_v48 = vadd.f32 %v3986_v39, %v3017_v40  ;;  %v3909_v45 = vadd.f32 %v3908_v57, %v3907_v43  ;;  %v3989_v55 = vadd.f32 %v3988_v38, %v3987_v61 }
 0x4bf   : > { %v3022_v44 = vadd.f32 %v6649_v10, %v3909_v45  ;;  %v3910_v14 = vpop.f32.mrb[180].mxu1  ;;  %v3990_v42 = vpop.f32.mrb[180].mxu0 }
 0x4c0   : > { %v3911_v24 = vpop.f32.mrb[181].mxu1  ;;  %v3991_v63 = vpop.f32.mrb[181].mxu0 }
 0x4c1   : > { %v6691_v22 = vadd.f32 %v3989_v55, %v3022_v44  ;;  %v3912_v62 = vadd.f32 %v3911_v24, %v3910_v14  ;;  %v3992_v3 = vadd.f32 %v3991_v63, %v3990_v42 }
 0x4c3   : > { %v3027_v21 = vadd.f32 %v3912_v62, %v6655_v7  ;;  %v3913_v15 = vpop.f32.mrb[182].mxu1  ;;  %v3993_v11 = vpop.f32.mrb[182].mxu0 }
 0x4c4   : > { %v3914_v1 = vpop.f32.mrb[183].mxu1  ;;  %v3994_v30 = vpop.f32.mrb[183].mxu0 }
 0x4c5   : > { %v6694_v36 = vadd.f32 %v3992_v3, %v3027_v21  ;;  %v3915_v54 = vadd.f32 %v3914_v1, %v3913_v15  ;;  %v3995_v12 = vadd.f32 %v3994_v30, %v3993_v11 }
 0x4c7   : > { %v3032_v10 = vadd.f32 %v6653_v35, %v3915_v54  ;;  %v4028_v50 = vpop.f32.mrb[184].mxu1  ;;  %v4108_v17 = vpop.f32.mrb[184].mxu0 }
 0x4c8   : > { %v4029_v33 = vpop.f32.mrb[185].mxu1  ;;  %v4109_v51 = vpop.f32.mrb[185].mxu0 }
 0x4c9   : > { %v6697_v56 = vadd.f32 %v3995_v12, %v3032_v10  ;;  %v4030_v4 = vadd.f32 %v4029_v33, %v4028_v50  ;;  %v4110_v58 = vadd.f32 %v4109_v51, %v4108_v17 }
 0x4cb   : > { %v3247_v7 = vadd.f32 %v4030_v4, %v6657_v46  ;;  %v4031_v16 = vpop.f32.mrb[186].mxu1  ;;  %v4111_v59 = vpop.f32.mrb[186].mxu0 }
 0x4cc   : > { %v4032_v8 = vpop.f32.mrb[187].mxu1  ;;  %v4112_v25 = vpop.f32.mrb[187].mxu0 }
 0x4cd   : > { %v3392_v52 = vadd.f32 %v4110_v58, %v3247_v7  ;;  %v4033_v19 = vadd.f32 %v4032_v8, %v4031_v16  ;;  %v4113_v37 = vadd.f32 %v4112_v25, %v4111_v59 }
 0x4cf   : > { %3470 = vst [vmem:[%s6702_s14] sm:$0xff] %v3392_v52  ;;  %v3252_v35 = vadd.f32 %v4033_v19, %v6659_v6  ;;  %v4034_v49 = vpop.f32.mrb[188].mxu1  ;;  %v4114_v32 = vpop.f32.mrb[188].mxu0 }
 0x4d0   : > { %v4035_v41 = vpop.f32.mrb[189].mxu1  ;;  %v4115_v46 = vpop.f32.mrb[189].mxu0 }
 0x4d1   : > { %v3397_v18 = vadd.f32 %v4113_v37, %v3252_v35  ;;  %v4036_v0 = vadd.f32 %v4035_v41, %v4034_v49  ;;  %v4116_v60 = vadd.f32 %v4115_v46, %v4114_v32 }
 0x4d3   : > { %3471 = vst [vmem:[%s6702_s14 + $0x8] sm:$0xff] %v3397_v18  ;;  %v3257_v29 = vadd.f32 %v4036_v0, %v6661_v53  ;;  %v4037_v26 = vpop.f32.mrb[190].mxu1  ;;  %v4117_v27 = vpop.f32.mrb[190].mxu0 }
 0x4d4   : > { %v4038_v9 = vpop.f32.mrb[191].mxu1  ;;  %v4118_v39 = vpop.f32.mrb[191].mxu0 }
 0x4d5   : > { %v3402_v40 = vadd.f32 %v4116_v60, %v3257_v29  ;;  %v4039_v43 = vadd.f32 %v4038_v9, %v4037_v26  ;;  %v4119_v61 = vadd.f32 %v4118_v39, %v4117_v27 }
 0x4d7   : > { %3472 = vst [vmem:[%s6702_s14 + $0x10] sm:$0xff] %v3402_v40  ;;  %v3262_v6 = vadd.f32 %v4039_v43, %v6663_v28  ;;  %v4040_v57 = vpop.f32.mrb[192].mxu1  ;;  %v4120_v38 = vpop.f32.mrb[192].mxu0 }
 0x4d8   : > { %v4041_v45 = vpop.f32.mrb[193].mxu1  ;;  %v4121_v55 = vpop.f32.mrb[193].mxu0 }
 0x4d9   : > { %v3407_v44 = vadd.f32 %v4119_v61, %v3262_v6  ;;  %v4042_v14 = vadd.f32 %v4041_v45, %v4040_v57  ;;  %v4122_v42 = vadd.f32 %v4121_v55, %v4120_v38 }
 0x4db   : > { %3473 = vst [vmem:[%s6702_s14 + $0x18] sm:$0xff] %v3407_v44  ;;  %v3267_v53 = vadd.f32 %v4042_v14, %v6665_v47  ;;  %v4043_v24 = vpop.f32.mrb[194].mxu1  ;;  %v4123_v63 = vpop.f32.mrb[194].mxu0 }
 0x4dc   : > { %v4044_v62 = vpop.f32.mrb[195].mxu1  ;;  %v4124_v3 = vpop.f32.mrb[195].mxu0 }
 0x4dd   : > { %v3412_v21 = vadd.f32 %v4122_v42, %v3267_v53  ;;  %v4045_v15 = vadd.f32 %v4044_v62, %v4043_v24  ;;  %v4125_v11 = vadd.f32 %v4124_v3, %v4123_v63 }
 0x4df   : > { %3474 = vst [vmem:[%s6702_s14 + $0x20] sm:$0xff] %v3412_v21  ;;  %v3272_v28 = vadd.f32 %v4045_v15, %v6667_v23  ;;  %v4046_v1 = vpop.f32.mrb[196].mxu1  ;;  %v4126_v30 = vpop.f32.mrb[196].mxu0 }
 0x4e0   : > { %v4047_v54 = vpop.f32.mrb[197].mxu1  ;;  %v4127_v12 = vpop.f32.mrb[197].mxu0 }
 0x4e1   : > { %v3417_v10 = vadd.f32 %v4125_v11, %v3272_v28  ;;  %v4048_v50 = vadd.f32 %v4047_v54, %v4046_v1  ;;  %v4128_v17 = vadd.f32 %v4127_v12, %v4126_v30 }
 0x4e3   : > { %3475 = vst [vmem:[%s6702_s14 + $0x28] sm:$0xff] %v3417_v10  ;;  %v3277_v47 = vadd.f32 %v4048_v50, %v6670_v2  ;;  %v4049_v33 = vpop.f32.mrb[198].mxu1  ;;  %v4129_v51 = vpop.f32.mrb[198].mxu0 }
 0x4e4   : > { %v4050_v4 = vpop.f32.mrb[199].mxu1  ;;  %v4130_v58 = vpop.f32.mrb[199].mxu0 }
 0x4e5   : > { %v3422_v7 = vadd.f32 %v4128_v17, %v3277_v47  ;;  %v4051_v16 = vadd.f32 %v4050_v4, %v4049_v33  ;;  %v4131_v59 = vadd.f32 %v4130_v58, %v4129_v51 }
 0x4e7   : > { %3476 = vst [vmem:[%s6702_s14 + $0x30] sm:$0xff] %v3422_v7  ;;  %v3282_v23 = vadd.f32 %v4051_v16, %v6673_v13  ;;  %v4052_v8 = vpop.f32.mrb[200].mxu1  ;;  %v4132_v25 = vpop.f32.mrb[200].mxu0 }
 0x4e8   : > { %v4053_v52 = vpop.f32.mrb[201].mxu1  ;;  %v4133_v19 = vpop.f32.mrb[201].mxu0 }
 0x4e9   : > { %v3427_v37 = vadd.f32 %v4131_v59, %v3282_v23  ;;  %v4054_v35 = vadd.f32 %v4053_v52, %v4052_v8  ;;  %v4134_v49 = vadd.f32 %v4133_v19, %v4132_v25 }
 0x4eb   : > { %3477 = vst [vmem:[%s6702_s14 + $0x38] sm:$0xff] %v3427_v37  ;;  %v3287_v2 = vadd.f32 %v4054_v35, %v6676_v34  ;;  %v4055_v32 = vpop.f32.mrb[202].mxu1  ;;  %v4135_v41 = vpop.f32.mrb[202].mxu0 }
 0x4ec   : > { %v4056_v46 = vpop.f32.mrb[203].mxu1  ;;  %v4136_v18 = vpop.f32.mrb[203].mxu0 }
 0x4ed   : > { %v3432_v0 = vadd.f32 %v4134_v49, %v3287_v2  ;;  %v4057_v60 = vadd.f32 %v4056_v46, %v4055_v32  ;;  %v4137_v29 = vadd.f32 %v4136_v18, %v4135_v41 }
 0x4ef   : > { %3478 = vst [vmem:[%s6702_s14 + $0x40] sm:$0xff] %v3432_v0  ;;  %v3292_v13 = vadd.f32 %v4057_v60, %v6679_v20  ;;  %v4058_v26 = vpop.f32.mrb[204].mxu1  ;;  %v4138_v27 = vpop.f32.mrb[204].mxu0 }
 0x4f0   : > { %v4059_v9 = vpop.f32.mrb[205].mxu1  ;;  %v4139_v39 = vpop.f32.mrb[205].mxu0 }
 0x4f1   : > { %v3437_v40 = vadd.f32 %v4137_v29, %v3292_v13  ;;  %v4060_v43 = vadd.f32 %v4059_v9, %v4058_v26  ;;  %v4140_v61 = vadd.f32 %v4139_v39, %v4138_v27 }
 0x4f3   : > { %3479 = vst [vmem:[%s6702_s14 + $0x48] sm:$0xff] %v3437_v40  ;;  %v3297_v34 = vadd.f32 %v4060_v43, %v6682_v5  ;;  %v4061_v6 = vpop.f32.mrb[206].mxu1  ;;  %v4141_v57 = vpop.f32.mrb[206].mxu0 }
 0x4f4   : > { %v4062_v38 = vpop.f32.mrb[207].mxu1  ;;  %v4142_v45 = vpop.f32.mrb[207].mxu0 }
 0x4f5   : > { %v3442_v55 = vadd.f32 %v4140_v61, %v3297_v34  ;;  %v4063_v44 = vadd.f32 %v4062_v38, %v4061_v6  ;;  %v4143_v14 = vadd.f32 %v4142_v45, %v4141_v57 }
 0x4f7   : > { %3480 = vst [vmem:[%s6702_s14 + $0x50] sm:$0xff] %v3442_v55  ;;  %v3302_v20 = vadd.f32 %v4063_v44, %v6685_v31  ;;  %v4064_v42 = vpop.f32.mrb[208].mxu1  ;;  %v4144_v53 = vpop.f32.mrb[208].mxu0 }
 0x4f8   : > { %v4065_v24 = vpop.f32.mrb[209].mxu1  ;;  %v4145_v63 = vpop.f32.mrb[209].mxu0 }
 0x4f9   : > { %v3447_v62 = vadd.f32 %v4143_v14, %v3302_v20  ;;  %v4066_v3 = vadd.f32 %v4065_v24, %v4064_v42  ;;  %v4146_v21 = vadd.f32 %v4145_v63, %v4144_v53 }
 0x4fb   : > { %3481 = vst [vmem:[%s6702_s14 + $0x58] sm:$0xff] %v3447_v62  ;;  %v3307_v5 = vadd.f32 %v4066_v3, %v6688_v48  ;;  %v4067_v15 = vpop.f32.mrb[210].mxu1  ;;  %v4147_v11 = vpop.f32.mrb[210].mxu0 }
 0x4fc   : > { %v4068_v28 = vpop.f32.mrb[211].mxu1  ;;  %v4148_v1 = vpop.f32.mrb[211].mxu0 }
 0x4fd   : > { %v3452_v30 = vadd.f32 %v4146_v21, %v3307_v5  ;;  %v4069_v54 = vadd.f32 %v4068_v28, %v4067_v15  ;;  %v4149_v12 = vadd.f32 %v4148_v1, %v4147_v11 }
 0x4ff   : > { %3482 = vst [vmem:[%s6702_s14 + $0x60] sm:$0xff] %v3452_v30  ;;  %v3312_v31 = vadd.f32 %v4069_v54, %v6691_v22  ;;  %v4070_v10 = vpop.f32.mrb[212].mxu1  ;;  %v4150_v50 = vpop.f32.mrb[212].mxu0 }
 0x500   : > { %v4071_v17 = vpop.f32.mrb[213].mxu1  ;;  %v4151_v47 = vpop.f32.mrb[213].mxu0 }
 0x501   : > { %v3457_v33 = vadd.f32 %v4149_v12, %v3312_v31  ;;  %v4072_v48 = vadd.f32 %v4071_v17, %v4070_v10  ;;  %v4152_v51 = vadd.f32 %v4151_v47, %v4150_v50 }
 0x503   : > { %3483 = vst [vmem:[%s6702_s14 + $0x68] sm:$0xff] %v3457_v33  ;;  %v3317_v4 = vadd.f32 %v4072_v48, %v6694_v36  ;;  %v4073_v58 = vpop.f32.mrb[214].mxu1  ;;  %v4153_v7 = vpop.f32.mrb[214].mxu0 }
 0x504   : > { %v4074_v16 = vpop.f32.mrb[215].mxu1  ;;  %v4154_v22 = vpop.f32.mrb[215].mxu0 }
 0x505   : > { %v3462_v59 = vadd.f32 %v4152_v51, %v3317_v4  ;;  %v4075_v23 = vadd.f32 %v4074_v16, %v4073_v58  ;;  %v4155_v8 = vadd.f32 %v4154_v22, %v4153_v7 }
 0x507   : > { %3484 = vst [vmem:[%s6702_s14 + $0x70] sm:$0xff] %v3462_v59  ;;  %v3322_v25 = vadd.f32 %v4075_v23, %v6697_v56 }
 0x509   : > { %v3467_v36 = vadd.f32 %v4155_v8, %v3322_v25 }
 0x50b   : > { %3485 = vst [vmem:[%s6702_s14 + $0x78] sm:$0xff] %v3467_v36 }
 0x50c   : > { %4819 = shalt.err (!%p4816_p9)
}
 0x50d   : > { %s4820_s22 = scalar_lea.hbm %s6739_s18, 2048  ;;  %s4824_s20 = scalar_lea.hbm %s6795_s9, 4096 }
 0x50e   : > { %p4821_p0 = scmp.ne.s32.totalorder %s6739_s18, %s4820_s22  ;;  %p4825_p10 = scmp.lt.u32.totalorder %s6739_s18, %s6795_s9 }
 0x50f   : > { %p4826_p3 = scmp.lt.u32.totalorder %s4824_s20, %s4820_s22  ;;  %p4828_p5 = scmp.lt.u32.totalorder %s4820_s22, %s6739_s18 }
 0x510   : > { %p4822_p11 = pnand %p4821_p0, %p5114_p8 }
 0x511   : > { %p4827_p4 = por %p4826_p3, %p4825_p10 }
 0x512   : > { %p4823_p6 = pneg %p4822_p11 }
 0x513   : > { %p4829_p7 = por %p4828_p5, %p4827_p4 }
 0x515   : > { %p4830_p12 = pnand %p4829_p7, %p4823_p6 }
 0x517   : > { %4833 = shalt.err (!%p4830_p12)
}
 0x518   : > { %s4893_s21 = smov 128   ;;  %s4894_s2 = smov 8  }
 0x519   : > { %4504 = dma.vmem_to_hbm [thread:$0]  (%p5114_p8), %s6741_s27, 2048, %s6739_s18, %s3487_s25, %s4893_s21, %s4893_s21, %s4894_s2  }
 0x51a PF: > { %s7014_s17 = sld [smem:[#allocation16_spill]]  ;;  %s7015_s13 = sld [smem:[#allocation17_spill]] }
 0x51b   : > { %p7017_p1 = scmp.ge.s32.totalorder %s4880_s12, 2 }
 0x520   : > { %s3515_s16 = sand.u32 1, %s7014_s17   ;;  %p7016_p2 = scmp.ne.s32.totalorder %s7015_s13, 0 }
 0x521   : > { %s3516_s30 = scalar_lea.sflag [#allocation4], %s3515_s16 }
 0x522   : > { %p4524_p13 = pnand %p7017_p1, %p7016_p2 }
 0x524   : > { %4863 = dma.done.wait (!%p4524_p13), %s3516_s30, 2048  }
 0x525   : > { %4865 = vsyncadd (!%p4524_p13), %s3516_s30, 4294965248  ;;  %p24_p9 = scmp.ge.s32.totalorder %s5101_s28, 4   ;;  %s7018_s30 = smov %s4872_s10 }
 0x526   : > { %s7019_s10 = smov %s4876_s11  ;;  %s7020_s11 = smov %s5110_s26 }
 0x527   : > { %s7021_s12 = smov %s5101_s28  ;;  %26 = sbr.rel (!%p24_p9) target bundleno = 9 (0x9), region = 120 }
 0x52e   :  { %3521 = vsyncpa [#allocation3], 1 }
 0x52f   :  { %3523 = vsyncpa [#allocation3 + $0x1], 1 }
 0x530   :  { %3524 = vsyncpa [#allocation6], 1 }
 0x531   :  { %3525 = vsyncpa [#allocation9], 1 }
 0x532   :  { %3526 = vsyncpa [#allocation4], 1 }
 0x533   :  { %3528 = vsyncpa [#allocation4 + $0x1], 1 }

</bundles_post_ra>
